<compile_context>
chip_gen: v7x
topology: tpu7x:2x2x1
jax: 0.10.0
libtpu: 0.0.40
codegen_flags: <defaults>
</compile_context>

<pallas_src>
import functools

import numpy as np
import jax
import jax.numpy as jnp
from jax import lax
from jax.experimental import pallas as pl
from jax.experimental.pallas import tpu as pltpu

BN_EPS = 1e-5

# Left halo width in the padded VMEM scratch: >= 2 and a multiple of 8 so the
# interior store lands on a sublane-group boundary (aligned store).
_LPAD = 8


# ----------------------------- Pallas kernel ------------------------------ #
def _cgdf_kernel(x_ref,
                 w_dw_ref, sh_dw_ref,
                 w_dd_ref, sh_dd_ref,
                 wa_ref, wb_ref, sh_pw_ref,
                 w1_ref, b1_ref, w2_ref, b2_ref,
                 o_ref,
                 xp_ref, cols_ref,
                 *, H, W, C, C_out, add_residual):
    HW = H * W

    # ---- zero-padded activation built in VMEM (halo handled in-kernel) ----
    x = x_ref[0].astype(jnp.float32)                          # (H, W, C)
    xp_ref[...] = jnp.zeros_like(xp_ref)                      # cheap border zero
    xp_ref[2:2 + H, _LPAD:_LPAD + W, :] = x                   # aligned interior

    # ---- pre-shift the 5 distinct column windows once; every conv tap below
    #      then only slices the leading H axis of an aligned slab (free) -----
    for ws in range(5):
        c0 = _LPAD - 2 + ws
        cols_ref[ws] = xp_ref[:, c0:c0 + W, :]

    def dw_conv(w9, off, dil):
        acc = jnp.zeros((H, W, C), jnp.float32)
        for ki in range(3):
            hs = off + ki * dil
            for kj in range(3):
                ws = off + kj * dil
                acc = acc + cols_ref[ws, hs:hs + H] * w9[ki * 3 + kj]
        return acc

    # Depthwise 3x3 (pad=1) and dilated depthwise 3x3 (pad=2, dil=2).  The BN
    # scale is already folded into the taps; only the shift remains.  VPU math
    # stays f32 (v5e note).
    w_dw = w_dw_ref[...]                                      # (9, C)
    w_dd = w_dd_ref[...]                                      # (9, C)
    a = jnp.maximum(dw_conv(w_dw, 1, 1) + sh_dw_ref[...], 0.0)
    b = jnp.maximum(dw_conv(w_dd, 0, 2) + sh_dd_ref[...], 0.0)

    # ---- channel_shuffle + grouped 1x1 conv + BN, computed transposed:
    #      y^T (C_out, HW) = Wa @ a^T + Wb @ b^T   (bf16 operands, f32 acc) ---
    a16 = a.reshape(HW, C).astype(jnp.bfloat16)
    b16 = b.reshape(HW, C).astype(jnp.bfloat16)
    nt = (((1,), (1,)), ((), ()))                             # lhs @ rhs.T
    y = lax.dot_general(wa_ref[...], a16, nt,
                        preferred_element_type=jnp.float32)
    y = y + lax.dot_general(wb_ref[...], b16, nt,
                            preferred_element_type=jnp.float32)
    y = jnp.maximum(y + sh_pw_ref[...], 0.0)                  # (C_out, HW)

    # ---- SE: lane-axis global pool + tiny FCs as broadcast + reduce --------
    s = jnp.sum(y, axis=1, keepdims=True) * (1.0 / HW)        # (C_out, 1)
    h = jnp.maximum(
        jnp.sum(w1_ref[...] * s, axis=0, keepdims=True) + b1_ref[...], 0.0)
    g = jax.nn.sigmoid(
        jnp.sum(w2_ref[...] * h, axis=1, keepdims=True) + b2_ref[...])
    y = y * g                                                 # (C_out, HW)

    if add_residual:
        # Transpose the residual (HW, C) -> (C, HW) on the (idle) MXU via an
        # identity matmul instead of a standalone value relayout.
        ii = lax.broadcasted_iota(jnp.int32, (C, C), 0)
        jj = lax.broadcasted_iota(jnp.int32, (C, C), 1)
        eye = (ii == jj).astype(jnp.float32)
        y = y + lax.dot_general(eye, x.reshape(HW, C), nt,
                                preferred_element_type=jnp.float32)

    o_ref[...] = y[None].astype(o_ref.dtype)                  # lane-dense store


# ------------------------------ wrapper glue ------------------------------ #
def cgdf_forward(x_nchw, kp, *, stride, in_channels, out_channels):
    """Fused CGDF forward. Input NCHW, output NCHW (matches the PyTorch module)."""
    if stride != 1:
        # TODO(synk): stride>1 (strided depthwise windows) is not implemented
        # in the Pallas kernel; only stride=1 is supported here.
        raise NotImplementedError("CGDF Pallas kernel supports stride=1 only")

    B, C, H, W = x_nchw.shape
    assert C == in_channels
    C_out = out_channels
    HW = H * W
    add_residual = (in_channels == out_channels)              # stride == 1 here

    # channels-last for the conv stage (C on the lane axis).
    x_nhwc = jnp.transpose(x_nchw, (0, 2, 3, 1))

    kernel = functools.partial(
        _cgdf_kernel, H=H, W=W, C=C, C_out=C_out, add_residual=add_residual)

    def full(arr):
        nd = arr.ndim
        return pl.BlockSpec(arr.shape, lambda b, _nd=nd: (0,) * _nd)

    WP = _LPAD + W + 2                                        # padded scratch width

    # TODO(synk): for large H add a row-block grid axis (with a 4-row halo) so
    # the pipeline is deeper and VMEM stays bounded; one image per step is
    # fine at these demo sizes.
    grid_spec = pltpu.PrefetchScalarGridSpec(
        num_scalar_prefetch=0,
        grid=(B,),
        in_specs=[
            pl.BlockSpec((1, H, W, C), lambda b: (b, 0, 0, 0)),
            full(kp['w_dw9']), full(kp['sh_dw']),
            full(kp['w_dd9']), full(kp['sh_dd']),
            full(kp['w_pw_a']), full(kp['w_pw_b']), full(kp['sh_pw']),
            full(kp['w1']), full(kp['b1']), full(kp['w2']), full(kp['b2']),
        ],
        out_specs=pl.BlockSpec((1, C_out, HW), lambda b: (b, 0, 0)),
        scratch_shapes=[
            pltpu.VMEM((H + 4, WP, C), jnp.float32),          # zero-padded act
            pltpu.VMEM((5, H + 4, W, C), jnp.float32),        # 5 shifted slabs
        ],
    )

    flops = B * (2 * 9 * HW * C * 2                 # two depthwise branches
                 + 2 * 2 * HW * C * C_out           # two pointwise matmuls
                 + (2 * HW * C * C if add_residual else 0)
                 + 8 * HW * C_out)                  # bias / relu / SE scale
    weight_bytes = sum(int(v.size) * v.dtype.itemsize for v in kp.values())
    bytes_accessed = (int(x_nchw.size) * x_nchw.dtype.itemsize
                      + B * C_out * HW * x_nchw.dtype.itemsize
                      + weight_bytes)

    out_flat = pl.pallas_call(
        kernel,
        out_shape=jax.ShapeDtypeStruct((B, C_out, HW), x_nchw.dtype),
        grid_spec=grid_spec,
        compiler_params=pltpu.CompilerParams(
            dimension_semantics=("parallel",),
            vmem_limit_bytes=32 * 1024 * 1024),
        cost_estimate=pl.CostEstimate(
            flops=int(flops),
            transcendentals=int(B * C_out),
            bytes_accessed=int(bytes_accessed)),
    )(x_nhwc,
      kp['w_dw9'], kp['sh_dw'], kp['w_dd9'], kp['sh_dd'],
      kp['w_pw_a'], kp['w_pw_b'], kp['sh_pw'],
      kp['w1'], kp['b1'], kp['w2'], kp['b2'])

    return out_flat.reshape(B, C_out, H, W)                   # NCHW, free reshape


# --------------------- parameter init & BN/shuffle fold -------------------- #
def init_params(key, in_channels, out_channels, groups=2, reduction=16):
    C, Co = in_channels, out_channels
    C_red = max(Co // reduction, 1)
    ks = jax.random.split(key, 24)

    def n(k, shape, scale=0.1):
        return scale * jax.random.normal(k, shape, jnp.float32)

    def bn(k0, k1, k2, k3, c):
        return (1.0 + n(ks[k0], (c,)), n(ks[k1], (c,)),
                n(ks[k2], (c,)), 0.5 + jnp.abs(n(ks[k3], (c,))))

    p = {}
    # conv_dw: depthwise 3x3, pad=1, bias=True, + BN + ReLU (assumed block)
    p['w_dw'] = n(ks[0], (C, 1, 3, 3))
    p['b_dw'] = n(ks[1], (C,))
    p['bn1'] = bn(2, 3, 4, 5, C)
    # depthwise_dilated: depthwise 3x3, pad=2, dil=2, bias=True, + BN + ReLU
    p['w_dd'] = n(ks[6], (C, 1, 3, 3))
    p['b_dd'] = n(ks[7], (C,))
    p['bn2'] = bn(8, 9, 10, 11, C)
    # conv_pw_shuffle: grouped 1x1 (groups=2), bias=True, + BN + ReLU
    p['w_pw'] = n(ks[12], (Co, 2 * C // groups, 1, 1))
    p['b_pw'] = n(ks[13], (Co,))
    p['bn3'] = bn(14, 15, 16, 17, Co)
    # SE
    p['fc1_w'] = n(ks[18], (C_red, Co))
    p['fc1_b'] = n(ks[19], (C_red,))
    p['fc2_w'] = n(ks[20], (Co, C_red))
    p['fc2_b'] = n(ks[21], (Co,))
    return p


def fold_params(p, groups=2):
    C = p['w_dw'].shape[0]
    Co = p['w_pw'].shape[0]
    C2 = 2 * C

    def fold_bn(bn_p, bias):
        gamma, beta, mean, var = bn_p
        scale = gamma / jnp.sqrt(var + BN_EPS)
        shift = beta + (bias - mean) * scale
        return scale, shift

    sc1, sh1 = fold_bn(p['bn1'], p['b_dw'])
    sc2, sh2 = fold_bn(p['bn2'], p['b_dd'])
    sc3, sh3 = fold_bn(p['bn3'], p['b_pw'])

    kp = {}
    # Depthwise taps with the BN scale folded in (kernel only adds the shift).
    w_dw9 = jnp.transpose(p['w_dw'][:, 0], (1, 2, 0)).reshape(9, C)
    w_dd9 = jnp.transpose(p['w_dd'][:, 0], (1, 2, 0)).reshape(9, C)
    kp['w_dw9'] = w_dw9 * sc1[None, :]
    kp['w_dd9'] = w_dd9 * sc2[None, :]
    kp['sh_dw'] = sh1.reshape(1, C)
    kp['sh_dd'] = sh2.reshape(1, C)

    # Fold channel_shuffle (a permutation) and the grouped 1x1 conv (block
    # diagonal) into one dense (2C, Co) matrix, fold BN scale, then split into
    # per-branch halves transposed for the (Co, HW) output matmul (bf16).
    Gc = C2 // groups
    og = Co // groups
    w_pw = np.asarray(p['w_pw'])[:, :, 0, 0]                  # (Co, Gc)
    W_dense = np.zeros((C2, Co), np.float32)
    for g in range(groups):
        W_dense[g * Gc:(g + 1) * Gc, g * og:(g + 1) * og] = w_pw[g * og:(g + 1) * og].T
    j = np.arange(C2)
    perm = (j % Gc) * groups + (j // Gc)                      # shuffled[j] = cat[perm[j]]
    W_eff = np.zeros_like(W_dense)
    W_eff[perm, :] = W_dense                                  # out = cat @ W_eff
    W_eff = jnp.asarray(W_eff) * sc3[None, :]
    kp['w_pw_a'] = W_eff[:C].T.astype(jnp.bfloat16)           # (Co, C)
    kp['w_pw_b'] = W_eff[C:].T.astype(jnp.bfloat16)           # (Co, C)
    kp['sh_pw'] = sh3.reshape(Co, 1)

    # SE weights laid out for the broadcast+reduce formulation.
    kp['w1'] = p['fc1_w'].T                                   # (Co, C_red)
    kp['b1'] = p['fc1_b'].reshape(1, -1)                      # (1, C_red)
    kp['w2'] = p['fc2_w']                                     # (Co, C_red)
    kp['b2'] = p['fc2_b'].reshape(Co, 1)                      # (Co, 1)
    return kp


# --------------------------- pure-JAX reference ---------------------------- #
def reference_forward(x_nchw, p, stride, groups=2):
    x_nhwc = jnp.transpose(x_nchw, (0, 2, 3, 1))
    C = p['w_dw'].shape[0]
    Co = p['w_pw'].shape[0]

    def dw_branch(w, bias, bn_p, pad, dil):
        w_hwio = jnp.transpose(w, (2, 3, 1, 0))               # (3,3,1,C)
        y = jax.lax.conv_general_dilated(
            x_nhwc, w_hwio, window_strides=(stride, stride),
            padding=((pad, pad), (pad, pad)), rhs_dilation=(dil, dil),
            dimension_numbers=('NHWC', 'HWIO', 'NHWC'),
            feature_group_count=C)
        y = y + bias
        gamma, beta, mean, var = bn_p
        y = (y - mean) / jnp.sqrt(var + BN_EPS) * gamma + beta
        return jnp.maximum(y, 0.0)

    a = dw_branch(p['w_dw'], p['b_dw'], p['bn1'], 1, 1)
    b = dw_branch(p['w_dd'], p['b_dd'], p['bn2'], 2, 2)
    cat = jnp.concatenate([a, b], axis=-1)                    # (B,Ho,Wo,2C)

    C2 = 2 * C
    Gc = C2 // groups
    j = np.arange(C2)
    perm = (j % Gc) * groups + (j // Gc)
    shuf = cat[..., perm]

    og = Co // groups
    outs = []
    for g in range(groups):
        xg = shuf[..., g * Gc:(g + 1) * Gc]
        wg = p['w_pw'][g * og:(g + 1) * og, :, 0, 0]          # (og, Gc)
        outs.append(jnp.einsum('bhwc,oc->bhwo', xg, wg))
    y = jnp.concatenate(outs, axis=-1) + p['b_pw']
    gamma, beta, mean, var = p['bn3']
    y = jnp.maximum((y - mean) / jnp.sqrt(var + BN_EPS) * gamma + beta, 0.0)

    s = jnp.mean(y, axis=(1, 2))                              # (B, Co)
    h = jnp.maximum(s @ p['fc1_w'].T + p['fc1_b'], 0.0)
    g_ = jax.nn.sigmoid(h @ p['fc2_w'].T + p['fc2_b'])
    y = y * g_[:, None, None, :]
    if stride == 1 and C == Co:
        y = y + x_nhwc
    return jnp.transpose(y, (0, 3, 1, 2))                     # back to NCHW


# ---------------------------------- main ----------------------------------- #
if __name__ == "__main__":
    B, C_in, H, W = 2, 32, 16, 16
    C_out, stride, groups = 32, 1, 2   # stride=1 & C_in==C_out -> residual path

    key = jax.random.PRNGKey(0)
    kx, kparams_key = jax.random.split(key)
    x_nchw = jax.random.normal(kx, (B, C_in, H, W), jnp.float32)

    params = init_params(kparams_key, C_in, C_out, groups=groups, reduction=16)
    kparams = fold_params(params, groups=groups)

    out = cgdf_forward(x_nchw, kparams, stride=stride,
                       in_channels=C_in, out_channels=C_out)
    out = jax.block_until_ready(out)

    ref = reference_forward(x_nchw, params, stride, groups=groups)
    # The pointwise matmul uses bf16 operands with f32 accumulation, so the
    # comparison tolerance is at the bf16-rounding level (the all-f32 path of
    # this kernel matched the reference to ~2e-4).
    np.testing.assert_allclose(np.asarray(out), np.asarray(ref),
                               atol=2e-2, rtol=2e-2)
    print("KERNEL_OK")
</pallas_src>

<mosaic_0001>
module attributes {stable_mosaic.version = 11 : i64} {
  func.func @_cgdf_kernel(%arg0: i32, %arg1: memref<1x16x16x32xf32, #tpu.memory_space<vmem>>, %arg2: memref<9x32xf32, #tpu.memory_space<vmem>>, %arg3: memref<1x32xf32, #tpu.memory_space<vmem>>, %arg4: memref<9x32xf32, #tpu.memory_space<vmem>>, %arg5: memref<1x32xf32, #tpu.memory_space<vmem>>, %arg6: memref<32x32xbf16, #tpu.memory_space<vmem>>, %arg7: memref<32x32xbf16, #tpu.memory_space<vmem>>, %arg8: memref<32x1xf32, #tpu.memory_space<vmem>>, %arg9: memref<32x2xf32, #tpu.memory_space<vmem>>, %arg10: memref<1x2xf32, #tpu.memory_space<vmem>>, %arg11: memref<32x2xf32, #tpu.memory_space<vmem>>, %arg12: memref<32x1xf32, #tpu.memory_space<vmem>>, %arg13: memref<1x32x256xf32, #tpu.memory_space<vmem>>, %arg14: memref<20x26x32xf32, #tpu.memory_space<vmem>>, %arg15: memref<5x20x16x32xf32, #tpu.memory_space<vmem>>) attributes {dimension_semantics = [#tpu.dimension_semantics<parallel>], iteration_bounds = array<i64: 2>, scalar_prefetch = 0 : i64, scratch_operands = 2 : i64, tpu.core_type = #tpu.core_type<tc>, window_params = [{transform_indices = @transform_0, window_bounds = array<i64: 1, 16, 16, 32>}, {pipeline_mode = #tpu.pipeline_mode<synchronous>, transform_indices = @transform_1, window_bounds = array<i64: 9, 32>}, {pipeline_mode = #tpu.pipeline_mode<synchronous>, transform_indices = @transform_2, window_bounds = array<i64: 1, 32>}, {pipeline_mode = #tpu.pipeline_mode<synchronous>, transform_indices = @transform_3, window_bounds = array<i64: 9, 32>}, {pipeline_mode = #tpu.pipeline_mode<synchronous>, transform_indices = @transform_4, window_bounds = array<i64: 1, 32>}, {pipeline_mode = #tpu.pipeline_mode<synchronous>, transform_indices = @transform_5, window_bounds = array<i64: 32, 32>}, {pipeline_mode = #tpu.pipeline_mode<synchronous>, transform_indices = @transform_6, window_bounds = array<i64: 32, 32>}, {pipeline_mode = #tpu.pipeline_mode<synchronous>, transform_indices = @transform_7, window_bounds = array<i64: 32, 1>}, {pipeline_mode = #tpu.pipeline_mode<synchronous>, transform_indices = @transform_8, window_bounds = array<i64: 32, 2>}, {pipeline_mode = #tpu.pipeline_mode<synchronous>, transform_indices = @transform_9, window_bounds = array<i64: 1, 2>}, {pipeline_mode = #tpu.pipeline_mode<synchronous>, transform_indices = @transform_10, window_bounds = array<i64: 32, 2>}, {pipeline_mode = #tpu.pipeline_mode<synchronous>, transform_indices = @transform_11, window_bounds = array<i64: 32, 1>}, {transform_indices = @transform_12, window_bounds = array<i64: 1, 32, 256>}]} {
    %c0 = arith.constant 0 : index
    %c0_0 = arith.constant 0 : index
    %c0_1 = arith.constant 0 : index
    %c0_2 = arith.constant 0 : index
    %0 = vector.load %arg1[%c0, %c0_0, %c0_1, %c0_2] : memref<1x16x16x32xf32, #tpu.memory_space<vmem>>, vector<1x16x16x32xf32>
    %1 = vector.shape_cast %0 : vector<1x16x16x32xf32> to vector<16x16x32xf32>
    %cst = arith.constant 0.000000e+00 : f32
    %2 = vector.broadcast %cst : f32 to vector<20x26x32xf32>
    %c0_3 = arith.constant 0 : index
    %c0_4 = arith.constant 0 : index
    %c0_5 = arith.constant 0 : index
    %3 = vector.load %arg14[%c0_3, %c0_4, %c0_5] : memref<20x26x32xf32, #tpu.memory_space<vmem>>, vector<20x26x32xf32>
    tpu.vector_store %arg14[%c0_3, %c0_4, %c0_5], %2 {strides = array<i32>} : memref<20x26x32xf32, #tpu.memory_space<vmem>>, vector<20x26x32xf32>,
    %c2 = arith.constant 2 : index
    %c8 = arith.constant 8 : index
    %c0_6 = arith.constant 0 : index
    %4 = vector.load %arg14[%c2, %c8, %c0_6] : memref<20x26x32xf32, #tpu.memory_space<vmem>>, vector<16x16x32xf32>
    tpu.vector_store %arg14[%c2, %c8, %c0_6], %1 {strides = array<i32>} : memref<20x26x32xf32, #tpu.memory_space<vmem>>, vector<16x16x32xf32>,
    %c0_7 = arith.constant 0 : index
    %c6 = arith.constant 6 : index
    %c0_8 = arith.constant 0 : index
    %5 = vector.load %arg14[%c0_7, %c6, %c0_8] : memref<20x26x32xf32, #tpu.memory_space<vmem>>, vector<20x16x32xf32>
    %c0_9 = arith.constant 0 : index
    %c0_10 = arith.constant 0 : index
    %c0_11 = arith.constant 0 : index
    %c0_12 = arith.constant 0 : index
    %6 = vector.load %arg15[%c0_9, %c0_10, %c0_11, %c0_12] : memref<5x20x16x32xf32, #tpu.memory_space<vmem>>, vector<1x20x16x32xf32>
    %7 = vector.shape_cast %6 : vector<1x20x16x32xf32> to vector<20x16x32xf32>
    %8 = vector.shape_cast %5 : vector<20x16x32xf32> to vector<1x20x16x32xf32>
    tpu.vector_store %arg15[%c0_9, %c0_10, %c0_11, %c0_12], %8 {strides = array<i32>} : memref<5x20x16x32xf32, #tpu.memory_space<vmem>>, vector<1x20x16x32xf32>,
    %c0_13 = arith.constant 0 : index
    %c7 = arith.constant 7 : index
    %c0_14 = arith.constant 0 : index
    %9 = vector.load %arg14[%c0_13, %c7, %c0_14] : memref<20x26x32xf32, #tpu.memory_space<vmem>>, vector<20x16x32xf32>
    %c1 = arith.constant 1 : index
    %c0_15 = arith.constant 0 : index
    %c0_16 = arith.constant 0 : index
    %c0_17 = arith.constant 0 : index
    %10 = vector.load %arg15[%c1, %c0_15, %c0_16, %c0_17] : memref<5x20x16x32xf32, #tpu.memory_space<vmem>>, vector<1x20x16x32xf32>
    %11 = vector.shape_cast %10 : vector<1x20x16x32xf32> to vector<20x16x32xf32>
    %12 = vector.shape_cast %9 : vector<20x16x32xf32> to vector<1x20x16x32xf32>
    tpu.vector_store %arg15[%c1, %c0_15, %c0_16, %c0_17], %12 {strides = array<i32>} : memref<5x20x16x32xf32, #tpu.memory_space<vmem>>, vector<1x20x16x32xf32>,
    %c0_18 = arith.constant 0 : index
    %c8_19 = arith.constant 8 : index
    %c0_20 = arith.constant 0 : index
    %13 = vector.load %arg14[%c0_18, %c8_19, %c0_20] : memref<20x26x32xf32, #tpu.memory_space<vmem>>, vector<20x16x32xf32>
    %c2_21 = arith.constant 2 : index
    %c0_22 = arith.constant 0 : index
    %c0_23 = arith.constant 0 : index
    %c0_24 = arith.constant 0 : index
    %14 = vector.load %arg15[%c2_21, %c0_22, %c0_23, %c0_24] : memref<5x20x16x32xf32, #tpu.memory_space<vmem>>, vector<1x20x16x32xf32>
    %15 = vector.shape_cast %14 : vector<1x20x16x32xf32> to vector<20x16x32xf32>
    %16 = vector.shape_cast %13 : vector<20x16x32xf32> to vector<1x20x16x32xf32>
    tpu.vector_store %arg15[%c2_21, %c0_22, %c0_23, %c0_24], %16 {strides = array<i32>} : memref<5x20x16x32xf32, #tpu.memory_space<vmem>>, vector<1x20x16x32xf32>,
    %c0_25 = arith.constant 0 : index
    %c9 = arith.constant 9 : index
    %c0_26 = arith.constant 0 : index
    %17 = vector.load %arg14[%c0_25, %c9, %c0_26] : memref<20x26x32xf32, #tpu.memory_space<vmem>>, vector<20x16x32xf32>
    %c3 = arith.constant 3 : index
    %c0_27 = arith.constant 0 : index
    %c0_28 = arith.constant 0 : index
    %c0_29 = arith.constant 0 : index
    %18 = vector.load %arg15[%c3, %c0_27, %c0_28, %c0_29] : memref<5x20x16x32xf32, #tpu.memory_space<vmem>>, vector<1x20x16x32xf32>
    %19 = vector.shape_cast %18 : vector<1x20x16x32xf32> to vector<20x16x32xf32>
    %20 = vector.shape_cast %17 : vector<20x16x32xf32> to vector<1x20x16x32xf32>
    tpu.vector_store %arg15[%c3, %c0_27, %c0_28, %c0_29], %20 {strides = array<i32>} : memref<5x20x16x32xf32, #tpu.memory_space<vmem>>, vector<1x20x16x32xf32>,
    %c0_30 = arith.constant 0 : index
    %c10 = arith.constant 10 : index
    %c0_31 = arith.constant 0 : index
    %21 = vector.load %arg14[%c0_30, %c10, %c0_31] : memref<20x26x32xf32, #tpu.memory_space<vmem>>, vector<20x16x32xf32>
    %c4 = arith.constant 4 : index
    %c0_32 = arith.constant 0 : index
    %c0_33 = arith.constant 0 : index
    %c0_34 = arith.constant 0 : index
    %22 = vector.load %arg15[%c4, %c0_32, %c0_33, %c0_34] : memref<5x20x16x32xf32, #tpu.memory_space<vmem>>, vector<1x20x16x32xf32>
    %23 = vector.shape_cast %22 : vector<1x20x16x32xf32> to vector<20x16x32xf32>
    %24 = vector.shape_cast %21 : vector<20x16x32xf32> to vector<1x20x16x32xf32>
    tpu.vector_store %arg15[%c4, %c0_32, %c0_33, %c0_34], %24 {strides = array<i32>} : memref<5x20x16x32xf32, #tpu.memory_space<vmem>>, vector<1x20x16x32xf32>,
    %c0_35 = arith.constant 0 : index
    %c0_36 = arith.constant 0 : index
    %25 = vector.load %arg2[%c0_35, %c0_36] : memref<9x32xf32, #tpu.memory_space<vmem>>, vector<9x32xf32>
    %c0_37 = arith.constant 0 : index
    %c0_38 = arith.constant 0 : index
    %26 = vector.load %arg4[%c0_37, %c0_38] : memref<9x32xf32, #tpu.memory_space<vmem>>, vector<9x32xf32>
    %cst_39 = arith.constant 0.000000e+00 : f32
    %27 = vector.broadcast %cst_39 : f32 to vector<16x16x32xf32>
    %c1_40 = arith.constant 1 : index
    %c1_41 = arith.constant 1 : index
    %c0_42 = arith.constant 0 : index
    %c0_43 = arith.constant 0 : index
    %28 = vector.load %arg15[%c1_40, %c1_41, %c0_42, %c0_43] : memref<5x20x16x32xf32, #tpu.memory_space<vmem>>, vector<1x16x16x32xf32>
    %29 = vector.shape_cast %28 : vector<1x16x16x32xf32> to vector<16x16x32xf32>
    %30 = vector.extract_strided_slice %25 {offsets = [0, 0], sizes = [1, 32], strides = [1, 1]} : vector<9x32xf32> to vector<1x32xf32>
    %31 = vector.shape_cast %30 : vector<1x32xf32> to vector<32xf32>
    %32 = vector.shape_cast %31 : vector<32xf32> to vector<1x1x32xf32>
    %33 = vector.broadcast %32 : vector<1x1x32xf32> to vector<16x16x32xf32>
    %34 = arith.mulf %29, %33 : vector<16x16x32xf32>
    %35 = arith.addf %27, %34 : vector<16x16x32xf32>
    %c2_44 = arith.constant 2 : index
    %c1_45 = arith.constant 1 : index
    %c0_46 = arith.constant 0 : index
    %c0_47 = arith.constant 0 : index
    %36 = vector.load %arg15[%c2_44, %c1_45, %c0_46, %c0_47] : memref<5x20x16x32xf32, #tpu.memory_space<vmem>>, vector<1x16x16x32xf32>
    %37 = vector.shape_cast %36 : vector<1x16x16x32xf32> to vector<16x16x32xf32>
    %38 = vector.extract_strided_slice %25 {offsets = [1, 0], sizes = [1, 32], strides = [1, 1]} : vector<9x32xf32> to vector<1x32xf32>
    %39 = vector.shape_cast %38 : vector<1x32xf32> to vector<32xf32>
    %40 = vector.shape_cast %39 : vector<32xf32> to vector<1x1x32xf32>
    %41 = vector.broadcast %40 : vector<1x1x32xf32> to vector<16x16x32xf32>
    %42 = arith.mulf %37, %41 : vector<16x16x32xf32>
    %43 = arith.addf %35, %42 : vector<16x16x32xf32>
    %c3_48 = arith.constant 3 : index
    %c1_49 = arith.constant 1 : index
    %c0_50 = arith.constant 0 : index
    %c0_51 = arith.constant 0 : index
    %44 = vector.load %arg15[%c3_48, %c1_49, %c0_50, %c0_51] : memref<5x20x16x32xf32, #tpu.memory_space<vmem>>, vector<1x16x16x32xf32>
    %45 = vector.shape_cast %44 : vector<1x16x16x32xf32> to vector<16x16x32xf32>
    %46 = vector.extract_strided_slice %25 {offsets = [2, 0], sizes = [1, 32], strides = [1, 1]} : vector<9x32xf32> to vector<1x32xf32>
    %47 = vector.shape_cast %46 : vector<1x32xf32> to vector<32xf32>
    %48 = vector.shape_cast %47 : vector<32xf32> to vector<1x1x32xf32>
    %49 = vector.broadcast %48 : vector<1x1x32xf32> to vector<16x16x32xf32>
    %50 = arith.mulf %45, %49 : vector<16x16x32xf32>
    %51 = arith.addf %43, %50 : vector<16x16x32xf32>
    %c1_52 = arith.constant 1 : index
    %c2_53 = arith.constant 2 : index
    %c0_54 = arith.constant 0 : index
    %c0_55 = arith.constant 0 : index
    %52 = vector.load %arg15[%c1_52, %c2_53, %c0_54, %c0_55] : memref<5x20x16x32xf32, #tpu.memory_space<vmem>>, vector<1x16x16x32xf32>
    %53 = vector.shape_cast %52 : vector<1x16x16x32xf32> to vector<16x16x32xf32>
    %54 = vector.extract_strided_slice %25 {offsets = [3, 0], sizes = [1, 32], strides = [1, 1]} : vector<9x32xf32> to vector<1x32xf32>
    %55 = vector.shape_cast %54 : vector<1x32xf32> to vector<32xf32>
    %56 = vector.shape_cast %55 : vector<32xf32> to vector<1x1x32xf32>
    %57 = vector.broadcast %56 : vector<1x1x32xf32> to vector<16x16x32xf32>
    %58 = arith.mulf %53, %57 : vector<16x16x32xf32>
    %59 = arith.addf %51, %58 : vector<16x16x32xf32>
    %c2_56 = arith.constant 2 : index
    %c2_57 = arith.constant 2 : index
    %c0_58 = arith.constant 0 : index
    %c0_59 = arith.constant 0 : index
    %60 = vector.load %arg15[%c2_56, %c2_57, %c0_58, %c0_59] : memref<5x20x16x32xf32, #tpu.memory_space<vmem>>, vector<1x16x16x32xf32>
    %61 = vector.shape_cast %60 : vector<1x16x16x32xf32> to vector<16x16x32xf32>
    %62 = vector.extract_strided_slice %25 {offsets = [4, 0], sizes = [1, 32], strides = [1, 1]} : vector<9x32xf32> to vector<1x32xf32>
    %63 = vector.shape_cast %62 : vector<1x32xf32> to vector<32xf32>
    %64 = vector.shape_cast %63 : vector<32xf32> to vector<1x1x32xf32>
    %65 = vector.broadcast %64 : vector<1x1x32xf32> to vector<16x16x32xf32>
    %66 = arith.mulf %61, %65 : vector<16x16x32xf32>
    %67 = arith.addf %59, %66 : vector<16x16x32xf32>
    %c3_60 = arith.constant 3 : index
    %c2_61 = arith.constant 2 : index
    %c0_62 = arith.constant 0 : index
    %c0_63 = arith.constant 0 : index
    %68 = vector.load %arg15[%c3_60, %c2_61, %c0_62, %c0_63] : memref<5x20x16x32xf32, #tpu.memory_space<vmem>>, vector<1x16x16x32xf32>
    %69 = vector.shape_cast %68 : vector<1x16x16x32xf32> to vector<16x16x32xf32>
    %70 = vector.extract_strided_slice %25 {offsets = [5, 0], sizes = [1, 32], strides = [1, 1]} : vector<9x32xf32> to vector<1x32xf32>
    %71 = vector.shape_cast %70 : vector<1x32xf32> to vector<32xf32>
    %72 = vector.shape_cast %71 : vector<32xf32> to vector<1x1x32xf32>
    %73 = vector.broadcast %72 : vector<1x1x32xf32> to vector<16x16x32xf32>
    %74 = arith.mulf %69, %73 : vector<16x16x32xf32>
    %75 = arith.addf %67, %74 : vector<16x16x32xf32>
    %c1_64 = arith.constant 1 : index
    %c3_65 = arith.constant 3 : index
    %c0_66 = arith.constant 0 : index
    %c0_67 = arith.constant 0 : index
    %76 = vector.load %arg15[%c1_64, %c3_65, %c0_66, %c0_67] : memref<5x20x16x32xf32, #tpu.memory_space<vmem>>, vector<1x16x16x32xf32>
    %77 = vector.shape_cast %76 : vector<1x16x16x32xf32> to vector<16x16x32xf32>
    %78 = vector.extract_strided_slice %25 {offsets = [6, 0], sizes = [1, 32], strides = [1, 1]} : vector<9x32xf32> to vector<1x32xf32>
    %79 = vector.shape_cast %78 : vector<1x32xf32> to vector<32xf32>
    %80 = vector.shape_cast %79 : vector<32xf32> to vector<1x1x32xf32>
    %81 = vector.broadcast %80 : vector<1x1x32xf32> to vector<16x16x32xf32>
    %82 = arith.mulf %77, %81 : vector<16x16x32xf32>
    %83 = arith.addf %75, %82 : vector<16x16x32xf32>
    %c2_68 = arith.constant 2 : index
    %c3_69 = arith.constant 3 : index
    %c0_70 = arith.constant 0 : index
    %c0_71 = arith.constant 0 : index
    %84 = vector.load %arg15[%c2_68, %c3_69, %c0_70, %c0_71] : memref<5x20x16x32xf32, #tpu.memory_space<vmem>>, vector<1x16x16x32xf32>
    %85 = vector.shape_cast %84 : vector<1x16x16x32xf32> to vector<16x16x32xf32>
    %86 = vector.extract_strided_slice %25 {offsets = [7, 0], sizes = [1, 32], strides = [1, 1]} : vector<9x32xf32> to vector<1x32xf32>
    %87 = vector.shape_cast %86 : vector<1x32xf32> to vector<32xf32>
    %88 = vector.shape_cast %87 : vector<32xf32> to vector<1x1x32xf32>
    %89 = vector.broadcast %88 : vector<1x1x32xf32> to vector<16x16x32xf32>
    %90 = arith.mulf %85, %89 : vector<16x16x32xf32>
    %91 = arith.addf %83, %90 : vector<16x16x32xf32>
    %c3_72 = arith.constant 3 : index
    %c3_73 = arith.constant 3 : index
    %c0_74 = arith.constant 0 : index
    %c0_75 = arith.constant 0 : index
    %92 = vector.load %arg15[%c3_72, %c3_73, %c0_74, %c0_75] : memref<5x20x16x32xf32, #tpu.memory_space<vmem>>, vector<1x16x16x32xf32>
    %93 = vector.shape_cast %92 : vector<1x16x16x32xf32> to vector<16x16x32xf32>
    %94 = vector.extract_strided_slice %25 {offsets = [8, 0], sizes = [1, 32], strides = [1, 1]} : vector<9x32xf32> to vector<1x32xf32>
    %95 = vector.shape_cast %94 : vector<1x32xf32> to vector<32xf32>
    %96 = vector.shape_cast %95 : vector<32xf32> to vector<1x1x32xf32>
    %97 = vector.broadcast %96 : vector<1x1x32xf32> to vector<16x16x32xf32>
    %98 = arith.mulf %93, %97 : vector<16x16x32xf32>
    %99 = arith.addf %91, %98 : vector<16x16x32xf32>
    %c0_76 = arith.constant 0 : index
    %c0_77 = arith.constant 0 : index
    %100 = vector.load %arg3[%c0_76, %c0_77] : memref<1x32xf32, #tpu.memory_space<vmem>>, vector<1x32xf32>
    %101 = vector.shape_cast %100 : vector<1x32xf32> to vector<1x1x32xf32>
    %102 = vector.broadcast %101 : vector<1x1x32xf32> to vector<16x16x32xf32>
    %103 = arith.addf %99, %102 : vector<16x16x32xf32>
    %cst_78 = arith.constant 0.000000e+00 : f32
    %104 = vector.broadcast %cst_78 : f32 to vector<16x16x32xf32>
    %105 = arith.maximumf %103, %104 : vector<16x16x32xf32>
    %cst_79 = arith.constant 0.000000e+00 : f32
    %106 = vector.broadcast %cst_79 : f32 to vector<16x16x32xf32>
    %c0_80 = arith.constant 0 : index
    %c0_81 = arith.constant 0 : index
    %c0_82 = arith.constant 0 : index
    %c0_83 = arith.constant 0 : index
    %107 = vector.load %arg15[%c0_80, %c0_81, %c0_82, %c0_83] : memref<5x20x16x32xf32, #tpu.memory_space<vmem>>, vector<1x16x16x32xf32>
    %108 = vector.shape_cast %107 : vector<1x16x16x32xf32> to vector<16x16x32xf32>
    %109 = vector.extract_strided_slice %26 {offsets = [0, 0], sizes = [1, 32], strides = [1, 1]} : vector<9x32xf32> to vector<1x32xf32>
    %110 = vector.shape_cast %109 : vector<1x32xf32> to vector<32xf32>
    %111 = vector.shape_cast %110 : vector<32xf32> to vector<1x1x32xf32>
    %112 = vector.broadcast %111 : vector<1x1x32xf32> to vector<16x16x32xf32>
    %113 = arith.mulf %108, %112 : vector<16x16x32xf32>
    %114 = arith.addf %106, %113 : vector<16x16x32xf32>
    %c2_84 = arith.constant 2 : index
    %c0_85 = arith.constant 0 : index
    %c0_86 = arith.constant 0 : index
    %c0_87 = arith.constant 0 : index
    %115 = vector.load %arg15[%c2_84, %c0_85, %c0_86, %c0_87] : memref<5x20x16x32xf32, #tpu.memory_space<vmem>>, vector<1x16x16x32xf32>
    %116 = vector.shape_cast %115 : vector<1x16x16x32xf32> to vector<16x16x32xf32>
    %117 = vector.extract_strided_slice %26 {offsets = [1, 0], sizes = [1, 32], strides = [1, 1]} : vector<9x32xf32> to vector<1x32xf32>
    %118 = vector.shape_cast %117 : vector<1x32xf32> to vector<32xf32>
    %119 = vector.shape_cast %118 : vector<32xf32> to vector<1x1x32xf32>
    %120 = vector.broadcast %119 : vector<1x1x32xf32> to vector<16x16x32xf32>
    %121 = arith.mulf %116, %120 : vector<16x16x32xf32>
    %122 = arith.addf %114, %121 : vector<16x16x32xf32>
    %c4_88 = arith.constant 4 : index
    %c0_89 = arith.constant 0 : index
    %c0_90 = arith.constant 0 : index
    %c0_91 = arith.constant 0 : index
    %123 = vector.load %arg15[%c4_88, %c0_89, %c0_90, %c0_91] : memref<5x20x16x32xf32, #tpu.memory_space<vmem>>, vector<1x16x16x32xf32>
    %124 = vector.shape_cast %123 : vector<1x16x16x32xf32> to vector<16x16x32xf32>
    %125 = vector.extract_strided_slice %26 {offsets = [2, 0], sizes = [1, 32], strides = [1, 1]} : vector<9x32xf32> to vector<1x32xf32>
    %126 = vector.shape_cast %125 : vector<1x32xf32> to vector<32xf32>
    %127 = vector.shape_cast %126 : vector<32xf32> to vector<1x1x32xf32>
    %128 = vector.broadcast %127 : vector<1x1x32xf32> to vector<16x16x32xf32>
    %129 = arith.mulf %124, %128 : vector<16x16x32xf32>
    %130 = arith.addf %122, %129 : vector<16x16x32xf32>
    %c0_92 = arith.constant 0 : index
    %c2_93 = arith.constant 2 : index
    %c0_94 = arith.constant 0 : index
    %c0_95 = arith.constant 0 : index
    %131 = vector.load %arg15[%c0_92, %c2_93, %c0_94, %c0_95] : memref<5x20x16x32xf32, #tpu.memory_space<vmem>>, vector<1x16x16x32xf32>
    %132 = vector.shape_cast %131 : vector<1x16x16x32xf32> to vector<16x16x32xf32>
    %133 = vector.extract_strided_slice %26 {offsets = [3, 0], sizes = [1, 32], strides = [1, 1]} : vector<9x32xf32> to vector<1x32xf32>
    %134 = vector.shape_cast %133 : vector<1x32xf32> to vector<32xf32>
    %135 = vector.shape_cast %134 : vector<32xf32> to vector<1x1x32xf32>
    %136 = vector.broadcast %135 : vector<1x1x32xf32> to vector<16x16x32xf32>
    %137 = arith.mulf %132, %136 : vector<16x16x32xf32>
    %138 = arith.addf %130, %137 : vector<16x16x32xf32>
    %c2_96 = arith.constant 2 : index
    %c2_97 = arith.constant 2 : index
    %c0_98 = arith.constant 0 : index
    %c0_99 = arith.constant 0 : index
    %139 = vector.load %arg15[%c2_96, %c2_97, %c0_98, %c0_99] : memref<5x20x16x32xf32, #tpu.memory_space<vmem>>, vector<1x16x16x32xf32>
    %140 = vector.shape_cast %139 : vector<1x16x16x32xf32> to vector<16x16x32xf32>
    %141 = vector.extract_strided_slice %26 {offsets = [4, 0], sizes = [1, 32], strides = [1, 1]} : vector<9x32xf32> to vector<1x32xf32>
    %142 = vector.shape_cast %141 : vector<1x32xf32> to vector<32xf32>
    %143 = vector.shape_cast %142 : vector<32xf32> to vector<1x1x32xf32>
    %144 = vector.broadcast %143 : vector<1x1x32xf32> to vector<16x16x32xf32>
    %145 = arith.mulf %140, %144 : vector<16x16x32xf32>
    %146 = arith.addf %138, %145 : vector<16x16x32xf32>
    %c4_100 = arith.constant 4 : index
    %c2_101 = arith.constant 2 : index
    %c0_102 = arith.constant 0 : index
    %c0_103 = arith.constant 0 : index
    %147 = vector.load %arg15[%c4_100, %c2_101, %c0_102, %c0_103] : memref<5x20x16x32xf32, #tpu.memory_space<vmem>>, vector<1x16x16x32xf32>
    %148 = vector.shape_cast %147 : vector<1x16x16x32xf32> to vector<16x16x32xf32>
    %149 = vector.extract_strided_slice %26 {offsets = [5, 0], sizes = [1, 32], strides = [1, 1]} : vector<9x32xf32> to vector<1x32xf32>
    %150 = vector.shape_cast %149 : vector<1x32xf32> to vector<32xf32>
    %151 = vector.shape_cast %150 : vector<32xf32> to vector<1x1x32xf32>
    %152 = vector.broadcast %151 : vector<1x1x32xf32> to vector<16x16x32xf32>
    %153 = arith.mulf %148, %152 : vector<16x16x32xf32>
    %154 = arith.addf %146, %153 : vector<16x16x32xf32>
    %c0_104 = arith.constant 0 : index
    %c4_105 = arith.constant 4 : index
    %c0_106 = arith.constant 0 : index
    %c0_107 = arith.constant 0 : index
    %155 = vector.load %arg15[%c0_104, %c4_105, %c0_106, %c0_107] : memref<5x20x16x32xf32, #tpu.memory_space<vmem>>, vector<1x16x16x32xf32>
    %156 = vector.shape_cast %155 : vector<1x16x16x32xf32> to vector<16x16x32xf32>
    %157 = vector.extract_strided_slice %26 {offsets = [6, 0], sizes = [1, 32], strides = [1, 1]} : vector<9x32xf32> to vector<1x32xf32>
    %158 = vector.shape_cast %157 : vector<1x32xf32> to vector<32xf32>
    %159 = vector.shape_cast %158 : vector<32xf32> to vector<1x1x32xf32>
    %160 = vector.broadcast %159 : vector<1x1x32xf32> to vector<16x16x32xf32>
    %161 = arith.mulf %156, %160 : vector<16x16x32xf32>
    %162 = arith.addf %154, %161 : vector<16x16x32xf32>
    %c2_108 = arith.constant 2 : index
    %c4_109 = arith.constant 4 : index
    %c0_110 = arith.constant 0 : index
    %c0_111 = arith.constant 0 : index
    %163 = vector.load %arg15[%c2_108, %c4_109, %c0_110, %c0_111] : memref<5x20x16x32xf32, #tpu.memory_space<vmem>>, vector<1x16x16x32xf32>
    %164 = vector.shape_cast %163 : vector<1x16x16x32xf32> to vector<16x16x32xf32>
    %165 = vector.extract_strided_slice %26 {offsets = [7, 0], sizes = [1, 32], strides = [1, 1]} : vector<9x32xf32> to vector<1x32xf32>
    %166 = vector.shape_cast %165 : vector<1x32xf32> to vector<32xf32>
    %167 = vector.shape_cast %166 : vector<32xf32> to vector<1x1x32xf32>
    %168 = vector.broadcast %167 : vector<1x1x32xf32> to vector<16x16x32xf32>
    %169 = arith.mulf %164, %168 : vector<16x16x32xf32>
    %170 = arith.addf %162, %169 : vector<16x16x32xf32>
    %c4_112 = arith.constant 4 : index
    %c4_113 = arith.constant 4 : index
    %c0_114 = arith.constant 0 : index
    %c0_115 = arith.constant 0 : index
    %171 = vector.load %arg15[%c4_112, %c4_113, %c0_114, %c0_115] : memref<5x20x16x32xf32, #tpu.memory_space<vmem>>, vector<1x16x16x32xf32>
    %172 = vector.shape_cast %171 : vector<1x16x16x32xf32> to vector<16x16x32xf32>
    %173 = vector.extract_strided_slice %26 {offsets = [8, 0], sizes = [1, 32], strides = [1, 1]} : vector<9x32xf32> to vector<1x32xf32>
    %174 = vector.shape_cast %173 : vector<1x32xf32> to vector<32xf32>
    %175 = vector.shape_cast %174 : vector<32xf32> to vector<1x1x32xf32>
    %176 = vector.broadcast %175 : vector<1x1x32xf32> to vector<16x16x32xf32>
    %177 = arith.mulf %172, %176 : vector<16x16x32xf32>
    %178 = arith.addf %170, %177 : vector<16x16x32xf32>
    %c0_116 = arith.constant 0 : index
    %c0_117 = arith.constant 0 : index
    %179 = vector.load %arg5[%c0_116, %c0_117] : memref<1x32xf32, #tpu.memory_space<vmem>>, vector<1x32xf32>
    %180 = vector.shape_cast %179 : vector<1x32xf32> to vector<1x1x32xf32>
    %181 = vector.broadcast %180 : vector<1x1x32xf32> to vector<16x16x32xf32>
    %182 = arith.addf %178, %181 : vector<16x16x32xf32>
    %cst_118 = arith.constant 0.000000e+00 : f32
    %183 = vector.broadcast %cst_118 : f32 to vector<16x16x32xf32>
    %184 = arith.maximumf %182, %183 : vector<16x16x32xf32>
    %185 = vector.shape_cast %105 : vector<16x16x32xf32> to vector<256x32xf32>
    %186 = arith.truncf %185 : vector<256x32xf32> to vector<256x32xbf16>
    %187 = vector.shape_cast %184 : vector<16x16x32xf32> to vector<256x32xf32>
    %188 = arith.truncf %187 : vector<256x32xf32> to vector<256x32xbf16>
    %c0_119 = arith.constant 0 : index
    %c0_120 = arith.constant 0 : index
    %189 = vector.load %arg6[%c0_119, %c0_120] : memref<32x32xbf16, #tpu.memory_space<vmem>>, vector<32x32xbf16>
    %cst_121 = arith.constant dense<0.000000e+00> : vector<32x256xf32>
    %190 = tpu.matmul %189, %186, %cst_121 {dimension_numbers = #tpu.dot_dimension_numbers<[1], [1], [0], [0], [0, 0, 1, 0], [], []>} : vector<32x32xbf16>, vector<256x32xbf16>, vector<32x256xf32> -> vector<32x256xf32>
    %c0_122 = arith.constant 0 : index
    %c0_123 = arith.constant 0 : index
    %191 = vector.load %arg7[%c0_122, %c0_123] : memref<32x32xbf16, #tpu.memory_space<vmem>>, vector<32x32xbf16>
    %cst_124 = arith.constant dense<0.000000e+00> : vector<32x256xf32>
    %192 = tpu.matmul %191, %188, %cst_124 {dimension_numbers = #tpu.dot_dimension_numbers<[1], [1], [0], [0], [0, 0, 1, 0], [], []>} : vector<32x32xbf16>, vector<256x32xbf16>, vector<32x256xf32> -> vector<32x256xf32>
    %193 = arith.addf %190, %192 : vector<32x256xf32>
    %c0_125 = arith.constant 0 : index
    %c0_126 = arith.constant 0 : index
    %194 = vector.load %arg8[%c0_125, %c0_126] : memref<32x1xf32, #tpu.memory_space<vmem>>, vector<32x1xf32>
    %195 = vector.broadcast %194 : vector<32x1xf32> to vector<32x256xf32>
    %196 = arith.addf %193, %195 : vector<32x256xf32>
    %cst_127 = arith.constant 0.000000e+00 : f32
    %197 = vector.broadcast %cst_127 : f32 to vector<32x256xf32>
    %198 = arith.maximumf %196, %197 : vector<32x256xf32>
    %cst_128 = arith.constant dense<0.000000e+00> : vector<32xf32>
    %199 = vector.multi_reduction <add>, %198, %cst_128 [1] : vector<32x256xf32> to vector<32xf32>
    %200 = vector.shape_cast %199 : vector<32xf32> to vector<32x1xf32>
    %cst_129 = arith.constant 3.906250e-03 : f32
    %201 = vector.broadcast %cst_129 : f32 to vector<32x1xf32>
    %202 = arith.mulf %200, %201 : vector<32x1xf32>
    %c0_130 = arith.constant 0 : index
    %c0_131 = arith.constant 0 : index
    %203 = vector.load %arg9[%c0_130, %c0_131] : memref<32x2xf32, #tpu.memory_space<vmem>>, vector<32x2xf32>
    %204 = vector.broadcast %202 : vector<32x1xf32> to vector<32x2xf32>
    %205 = arith.mulf %203, %204 : vector<32x2xf32>
    %cst_132 = arith.constant dense<0.000000e+00> : vector<2xf32>
    %206 = vector.multi_reduction <add>, %205, %cst_132 [0] : vector<32x2xf32> to vector<2xf32>
    %207 = vector.shape_cast %206 : vector<2xf32> to vector<1x2xf32>
    %c0_133 = arith.constant 0 : index
    %c0_134 = arith.constant 0 : index
    %208 = vector.load %arg10[%c0_133, %c0_134] : memref<1x2xf32, #tpu.memory_space<vmem>>, vector<1x2xf32>
    %209 = arith.addf %207, %208 : vector<1x2xf32>
    %cst_135 = arith.constant 0.000000e+00 : f32
    %210 = vector.broadcast %cst_135 : f32 to vector<1x2xf32>
    %211 = arith.maximumf %209, %210 : vector<1x2xf32>
    %c0_136 = arith.constant 0 : index
    %c0_137 = arith.constant 0 : index
    %212 = vector.load %arg11[%c0_136, %c0_137] : memref<32x2xf32, #tpu.memory_space<vmem>>, vector<32x2xf32>
    %213 = vector.broadcast %211 : vector<1x2xf32> to vector<32x2xf32>
    %214 = arith.mulf %212, %213 : vector<32x2xf32>
    %cst_138 = arith.constant dense<0.000000e+00> : vector<32xf32>
    %215 = vector.multi_reduction <add>, %214, %cst_138 [1] : vector<32x2xf32> to vector<32xf32>
    %216 = vector.shape_cast %215 : vector<32xf32> to vector<32x1xf32>
    %c0_139 = arith.constant 0 : index
    %c0_140 = arith.constant 0 : index
    %217 = vector.load %arg12[%c0_139, %c0_140] : memref<32x1xf32, #tpu.memory_space<vmem>>, vector<32x1xf32>
    %218 = arith.addf %216, %217 : vector<32x1xf32>
    %219 = arith.negf %218 : vector<32x1xf32>
    %220 = math.exp %219 : vector<32x1xf32>
    %cst_141 = arith.constant 1.000000e+00 : f32
    %221 = vector.broadcast %cst_141 : f32 to vector<32x1xf32>
    %222 = arith.addf %221, %220 : vector<32x1xf32>
    %223 = arith.divf %221, %222 : vector<32x1xf32>
    %224 = vector.broadcast %223 : vector<32x1xf32> to vector<32x256xf32>
    %225 = arith.mulf %198, %224 : vector<32x256xf32>
    %226 = tpu.iota {dimensions = array<i32: 0>} : vector<32x32xi32>
    %227 = tpu.iota {dimensions = array<i32: 1>} : vector<32x32xi32>
    %228 = arith.cmpi eq, %226, %227 : vector<32x32xi32>
    %229 = arith.extui %228 : vector<32x32xi1> to vector<32x32xi32>
    %230 = arith.sitofp %229 : vector<32x32xi32> to vector<32x32xf32>
    %231 = vector.shape_cast %1 : vector<16x16x32xf32> to vector<256x32xf32>
    %cst_142 = arith.constant dense<0.000000e+00> : vector<32x256xf32>
    %232 = tpu.matmul %230, %231, %cst_142 {dimension_numbers = #tpu.dot_dimension_numbers<[1], [1], [0], [0], [0, 0, 1, 0], [], []>} : vector<32x32xf32>, vector<256x32xf32>, vector<32x256xf32> -> vector<32x256xf32>
    %233 = arith.addf %225, %232 : vector<32x256xf32>
    %234 = vector.shape_cast %233 : vector<32x256xf32> to vector<1x32x256xf32>
    %c0_143 = arith.constant 0 : index
    %c0_144 = arith.constant 0 : index
    %c0_145 = arith.constant 0 : index
    %235 = vector.load %arg13[%c0_143, %c0_144, %c0_145] : memref<1x32x256xf32, #tpu.memory_space<vmem>>, vector<1x32x256xf32>
    tpu.vector_store %arg13[%c0_143, %c0_144, %c0_145], %234 {strides = array<i32>} : memref<1x32x256xf32, #tpu.memory_space<vmem>>, vector<1x32x256xf32>,
    return
  }
  func.func @transform_0(%arg0: i32) -> (i32, i32, i32, i32) {
    %c0_i32 = arith.constant 0 : i32
    %c0_i32_0 = arith.constant 0 : i32
    %c0_i32_1 = arith.constant 0 : i32
    %c0_i32_2 = arith.constant 0 : i32
    return %arg0, %c0_i32, %c0_i32_0, %c0_i32_1 : i32, i32, i32, i32
  }
  func.func @transform_1(%arg0: i32) -> (i32, i32) {
    %c0_i32 = arith.constant 0 : i32
    %c0_i32_0 = arith.constant 0 : i32
    %c0_i32_1 = arith.constant 0 : i32
    return %c0_i32, %c0_i32_0 : i32, i32
  }
  func.func @transform_2(%arg0: i32) -> (i32, i32) {
    %c0_i32 = arith.constant 0 : i32
    %c0_i32_0 = arith.constant 0 : i32
    %c0_i32_1 = arith.constant 0 : i32
    return %c0_i32, %c0_i32_0 : i32, i32
  }
  func.func @transform_3(%arg0: i32) -> (i32, i32) {
    %c0_i32 = arith.constant 0 : i32
    %c0_i32_0 = arith.constant 0 : i32
    %c0_i32_1 = arith.constant 0 : i32
    return %c0_i32, %c0_i32_0 : i32, i32
  }
  func.func @transform_4(%arg0: i32) -> (i32, i32) {
    %c0_i32 = arith.constant 0 : i32
    %c0_i32_0 = arith.constant 0 : i32
    %c0_i32_1 = arith.constant 0 : i32
    return %c0_i32, %c0_i32_0 : i32, i32
  }
  func.func @transform_5(%arg0: i32) -> (i32, i32) {
    %c0_i32 = arith.constant 0 : i32
    %c0_i32_0 = arith.constant 0 : i32
    %c0_i32_1 = arith.constant 0 : i32
    return %c0_i32, %c0_i32_0 : i32, i32
  }
  func.func @transform_6(%arg0: i32) -> (i32, i32) {
    %c0_i32 = arith.constant 0 : i32
    %c0_i32_0 = arith.constant 0 : i32
    %c0_i32_1 = arith.constant 0 : i32
    return %c0_i32, %c0_i32_0 : i32, i32
  }
  func.func @transform_7(%arg0: i32) -> (i32, i32) {
    %c0_i32 = arith.constant 0 : i32
    %c0_i32_0 = arith.constant 0 : i32
    %c0_i32_1 = arith.constant 0 : i32
    return %c0_i32, %c0_i32_0 : i32, i32
  }
  func.func @transform_8(%arg0: i32) -> (i32, i32) {
    %c0_i32 = arith.constant 0 : i32
    %c0_i32_0 = arith.constant 0 : i32
    %c0_i32_1 = arith.constant 0 : i32
    return %c0_i32, %c0_i32_0 : i32, i32
  }
  func.func @transform_9(%arg0: i32) -> (i32, i32) {
    %c0_i32 = arith.constant 0 : i32
    %c0_i32_0 = arith.constant 0 : i32
    %c0_i32_1 = arith.constant 0 : i32
    return %c0_i32, %c0_i32_0 : i32, i32
  }
  func.func @transform_10(%arg0: i32) -> (i32, i32) {
    %c0_i32 = arith.constant 0 : i32
    %c0_i32_0 = arith.constant 0 : i32
    %c0_i32_1 = arith.constant 0 : i32
    return %c0_i32, %c0_i32_0 : i32, i32
  }
  func.func @transform_11(%arg0: i32) -> (i32, i32) {
    %c0_i32 = arith.constant 0 : i32
    %c0_i32_0 = arith.constant 0 : i32
    %c0_i32_1 = arith.constant 0 : i32
    return %c0_i32, %c0_i32_0 : i32, i32
  }
  func.func @transform_12(%arg0: i32) -> (i32, i32, i32) {
    %c0_i32 = arith.constant 0 : i32
    %c0_i32_0 = arith.constant 0 : i32
    %c0_i32_1 = arith.constant 0 : i32
    return %arg0, %c0_i32, %c0_i32_0 : i32, i32, i32
  }
}

</mosaic_0001>

<bundles_post_ra>
// kernel: tpu_custom_call.1
= control target key start
LH: loop header
LB: loop body
LE: loop exit
PB: predicated region body
PF: predicated region fallthrough
CT: control target
= control target key end

     0   :  { %17 = vsyncpa [#allocation5], 0  ;;  %s6798_s0 = inlined_call_operand.hbm [shape: f32[2,16,16,32], index: 0, kind: input, shape index: {}]   ;;  %s6799_s1 = inlined_call_operand.vmem [shape: f32[9,32], index: 1, kind: input, shape index: {}]   ;;  %s6800_s2 = inlined_call_operand.vmem [shape: f32[1,32], index: 2, kind: input, shape index: {}]   ;;  %s6801_s3 = inlined_call_operand.vmem [shape: f32[9,32], index: 3, kind: input, shape index: {}]   ;;  %s6802_s4 = inlined_call_operand.vmem [shape: f32[1,32], index: 4, kind: input, shape index: {}]   ;;  %s6803_s5 = inlined_call_operand.vmem [shape: bf16[32,32], index: 5, kind: input, shape index: {}]   ;;  %s6804_s6 = inlined_call_operand.vmem [shape: bf16[32,32], index: 6, kind: input, shape index: {}]   ;;  %s6805_s7 = inlined_call_operand.vmem [shape: f32[32,1], index: 7, kind: input, shape index: {}]   ;;  %s6806_s8 = inlined_call_operand.vmem [shape: f32[32,2], index: 8, kind: input, shape index: {}]   ;;  %s6807_s9 = inlined_call_operand.vmem [shape: f32[1,2], index: 9, kind: input, shape index: {}]   ;;  %s6808_s10 = inlined_call_operand.vmem [shape: f32[32,2], index: 10, kind: input, shape index: {}]   ;;  %s6809_s11 = inlined_call_operand.vmem [shape: f32[32,1], index: 11, kind: input, shape index: {}]   ;;  %s6810_s12 = inlined_call_operand.hbm [shape: f32[2,32,256], index: 12, kind: output, shape index: {}]  }
   0x1   :  { %19 = vsyncpa [#allocation5 + $0x1], 0 }
   0x2   :  { %20 = vsyncpa [#allocation6], 0 }
   0x3   :  { %22 = vsyncpa [#allocation6 + $0x1], 0  ;;  %s4182_s21 = smov 0   ;;  %s4184_s22 = smov 0  }
   0x4   :  { %s4186_s23 = smov 0   ;;  %s4188_s24 = smov 0  }
   0x5 LB: > { %6877 = sst [smem:[#allocation10_spill]] %s4103_s23  ;;  %s4203_s25 = sadd.s32 4294967295, %s4107_s24   ;;  %s4107_s24 = sphi %s4188_s24, %s7012_s24   ;;  %s4103_s23 = sphi %s4186_s23, %s7014_s23   ;;  %s4099_s22 = sphi %s4184_s22, %s7016_s22   ;;  %s4095_s21 = sphi %s4182_s21, %s7015_s21  }
   0x6   : > { %s3670_s26 = sadd.s32 4294967294, %s4107_s24   ;;  %s4207_s27 = sadd.s32 1, %s4107_s24  }
   0x7   : > { %6878 = sst [smem:[#allocation11_spill]] %s4207_s27  ;;  %s35_s28 = sadd.s32 1, %s4103_s23 }
   0x8   : > { %s32_s29 = ssub.s32 %s4107_s24, %s4207_s27  ;;  %p42_p0 = scmp.ne.s32.totalorder %s4103_s23, %s4099_s22 }
   0x9   : > { %p33_p1 = scmp.eq.s32.totalorder %s32_s29, 0  ;;  %p43_p2 = scmp.eq.s32.totalorder %s4107_s24, 0 }
   0xa   : > { %p48_p3 = scmp.ne.s32.totalorder %s4099_s22, %s4095_s21  ;;  %p49_p4 = scmp.eq.s32.totalorder %s4203_s25, 0 }
   0xb   : > { %s4219_s30 = scalar_select %p33_p1, %s4103_s23, %s35_s28  }
   0xc   : > { %p4221_p5 = por %p43_p2, %p42_p0  ;;  %p4225_p6 = por %p49_p4, %p48_p3 }
   0xd   : > { %6879 = sst [smem:[#allocation12_spill]] %s4219_s30  ;;  %p303_p7 = scmp.eq.s32.totalorder %s4203_s25, 1 }
   0xe   : > { %p309_p8 = scmp.eq.s32.totalorder %s3670_s26, 1  ;;  %p3906_p10 = scmp.lt.s32.totalorder %s4107_s24, 2 }
   0xf   : > { %p4232_p11 = por %p303_p7, %p42_p0  ;;  %s362_s17 = sand.u32 1, %s4103_s23  }
  0x10   : > { %p4236_p12 = por %p309_p8, %p48_p3  ;;  %s3740_s18 = sshll.u32 %s4107_s24, 12 }
  0x11   : > { %s6882_s15 = scalar_select %p4232_p11, 1, 0 }
  0x12   : > { %s6883_s16 = scalar_select %p4236_p12, 1, 0 }
  0x13   : > { %s3673_s19 = sshll.u32 %s362_s17, 8  ;;  %s4245_s29 = scalar_lea.hbm %s6798_s0, %s3740_s18 }
  0x14   : > { %s366_s26 = scalar_lea.vmem [#allocation4], %s3673_s19  ;;  %p4249_p13 = pnand %p3906_p10, %p4221_p5 }
  0x15   : > { %s373_s30 = sshll.u32 %s366_s26, 4  ;;  %s4255_s23 = scalar_lea.sflag [#allocation5], %s362_s17  ;;  %s4253_s30 = int_to_ptr.vmem [resolvable:$true] %s373_s30 }
  0x16   : > { %s4011_s20 = scalar_lea.hbm %s4245_s29, 4096  ;;  %p4013_p1 = pneg %p4249_p13 }
  0x17   : > { %p4012_p0 = scmp.ne.s32.totalorder %s4245_s29, %s4011_s20  ;;  %s4016_s19 = scalar_lea.hbm %s6798_s0, 8192 }
  0x18   : > { %p4017_p4 = scmp.lt.u32.totalorder %s4245_s29, %s6798_s0  ;;  %p4018_p5 = scmp.lt.u32.totalorder %s4016_s19, %s4011_s20 }
  0x19   : > { %p4014_p2 = pnand %p4013_p1, %p4012_p0  ;;  %p4020_p8 = scmp.lt.u32.totalorder %s4011_s20, %s4245_s29 }
  0x1a   : > { %p4019_p7 = por %p4018_p5, %p4017_p4 }
  0x1b   : > { %p4015_p3 = pneg %p4014_p2 }
  0x1c   : > { %p4021_p10 = por %p4020_p8, %p4019_p7 }
  0x1e   : > { %p4022_p9 = pnand %p4021_p10, %p4015_p3 }
  0x20   : > { %4025 = shalt.err (!%p4022_p9)
}
  0x21   : > { %s4026_s17 = scalar_lea.vmem %s4253_s30, 4096  ;;  %s4109_s18 = smov [#allocation4]  }
  0x22   : > { %p4027_p0 = scmp.ne.s32.totalorder %s4253_s30, %s4026_s17  ;;  %s4031_s13 = sshll.u32 %s4109_s18, 4  ;;  %s4032_s13 = int_to_ptr.vmem [resolvable:$false] %s4031_s13 }
  0x23   : > { %s4033_s28 = scalar_lea.vmem %s4032_s13, 8192  ;;  %p4034_p11 = scmp.lt.s32.totalorder %s4253_s30, %s4032_s13 }
  0x24   : > { %p4029_p2 = pnand %p4027_p0, %p4013_p1  ;;  %p4035_p4 = scmp.lt.s32.totalorder %s4033_s28, %s4026_s17 }
  0x26   : > { %p4030_p12 = pneg %p4029_p2  ;;  %p4036_p5 = por %p4035_p4, %p4034_p11 }
  0x28   : > { %p4037_p7 = pnand %p4036_p5, %p4030_p12 }
  0x2a   : > { %4040 = shalt.err (!%p4037_p7)
}
  0x2b   : > { %s4110_s20 = smov 128   ;;  %s4111_s19 = smov 8  }
  0x2c   : > { %3901 = dma.hbm_to_vmem [thread:$0]  (!%p4249_p13), %s4245_s29, 4096, %s4253_s30, %s4255_s23, %s4110_s20, %s4110_s20, %s4111_s19  }
  0x2d   : > { %p3676_p9 = scmp.ge.s32.totalorder %s4107_s24, 1  ;;  %p381_p1 = scmp.lt.s32.totalorder %s4107_s24, 3 }
  0x2f   : > { %p382_p3 = pnand %p3676_p9, %p381_p1 }
  0x31   : > { %385 = sbr.rel (%p382_p3) target bundleno = 1214 (0x4be), region = 68 }
  0x38   : > { %s4286_s26 = sand.u32 1, %s4099_s22  }
  0x39   : > { %s3677_s17 = sshll.u32 %s4286_s26, 8  ;;  %s388_s18 = scalar_lea.sflag [#allocation5], %s4286_s26 }
  0x3a   : > { %s4290_s13 = scalar_lea.vmem [#allocation4], %s3677_s17 }
  0x3b   : > { %4086 = dma.done.wait (%p4225_p6), %s388_s18, 4096  }
  0x3c   : > { %4088 = vsyncadd (%p4225_p6), %s388_s18, 4294963200  ;;  %vm465_vm0 = vcmask 261120   ;;  %vm469_vm1 = vcmask 254976   ;;  %v6815_v0 = vmov 0.0   ;;  %v4457_v1 = vld [vmem:[%s4290_s13 + $0x60] sm:$0xff]  ;;  %v4460_v2 = vld [vmem:[%s4290_s13 + $0x68] sm:$0xff]  ;;  %v6817_v7 = vlaneseq }
  0x3d   : > { %499 = vst.msk [vmem:[#allocation2 + $0x100] sm:$0xff] %vm465_vm0, %v6815_v0  ;;  %500 = vst.msk [vmem:[#allocation2 + $0x108] sm:$0xff] %vm465_vm0, %v6815_v0  ;;  %v4463_v3 = vld [vmem:[%s4290_s13 + $0x80] sm:$0xff]  ;;  %v4466_v4 = vld [vmem:[%s4290_s13 + $0x88] sm:$0xff]  ;;  %vm3250_vm7 = vcmask 15360   ;;  %s3678_s20 = sshll.u32 %s4286_s26, 6 }
  0x3e   : > { %501 = vst.msk [vmem:[#allocation2 + $0x110] sm:$0xff] %vm465_vm0, %v6815_v0  ;;  %507 = vst.msk [vmem:[#allocation2 + $0x140] sm:$0xff] %vm465_vm0, %v6815_v0  ;;  %v4469_v5 = vld [vmem:[%s4290_s13 + $0xa0] sm:$0xff]  ;;  %v4472_v6 = vld [vmem:[%s4290_s13 + $0xa8] sm:$0xff]  ;;  %v4503_v13 = vshrl.u32 %v6817_v7, 7  ;;  %s431_s19 = scalar_lea.vmem [#allocation7], %s3678_s20 }
  0x3f   : > { %502 = vst.msk [vmem:[#allocation2 + $0x118] sm:$0x3] %vm469_vm1, %v6815_v0  ;;  %510 = vst.msk [vmem:[#allocation2 + $0x158] sm:$0x3] %vm469_vm1, %v6815_v0  ;;  %v4487_v8 = vld [vmem:[%s4290_s13] sm:$0xff]  ;;  %v4490_v9 = vld [vmem:[%s4290_s13 + $0x8] sm:$0xff] }
  0x40   : > { %508 = vst.msk [vmem:[#allocation2 + $0x148] sm:$0xff] %vm465_vm0, %v6815_v0  ;;  %509 = vst.msk [vmem:[#allocation2 + $0x150] sm:$0xff] %vm465_vm0, %v6815_v0  ;;  %v4493_v10 = vld [vmem:[%s4290_s13 + $0x20] sm:$0xff]  ;;  %v4496_v11 = vld [vmem:[%s4290_s13 + $0x28] sm:$0xff]  ;;  %v4529_v27 = vsub.s32 0, %v4503_v13  ;;  %v1326_v28 = vsub.s32 3, %v4503_v13 }
  0x41   : > { %515 = vst.msk [vmem:[#allocation2 + $0x180] sm:$0xff] %vm465_vm0, %v6815_v0  ;;  %516 = vst.msk [vmem:[#allocation2 + $0x188] sm:$0xff] %vm465_vm0, %v6815_v0  ;;  %v4516_v22 = vld [vmem:[%s6799_s1] sm:$0xff]  ;;  %v1629_v32 = vsub.s32 6, %v4503_v13  ;;  %v1124_v36 = vsub.s32 1, %v4503_v13  ;;  %v1427_v37 = vsub.s32 4, %v4503_v13 }
  0x42   : > { %517 = vst.msk [vmem:[#allocation2 + $0x190] sm:$0xff] %vm465_vm0, %v6815_v0  ;;  %466 = vst.msk [vmem:[#allocation2] sm:$0xff] %vm465_vm0, %v6815_v0  ;;  %v4521_v23 = vld [vmem:[%s6801_s3] sm:$0xff]  ;;  %v1225_v41 = vsub.s32 2, %v4503_v13  ;;  %v1528_v42 = vsub.s32 5, %v4503_v13  ;;  %v1730_v43 = vsub.s32 7, %v4503_v13  ;;  %v4567_v51 = vrot.slane %v4516_v22, %v1326_v28 }
  0x43   : > { %518 = vst.msk [vmem:[#allocation2 + $0x198] sm:$0x3] %vm469_vm1, %v6815_v0  ;;  %470 = vst.msk [vmem:[#allocation2 + $0x18] sm:$0x3] %vm469_vm1, %v6815_v0  ;;  %v4551_v47 = vrot.slane %v4516_v22, %v1124_v36  ;;  %v4555_v48 = vrot.slane %v4521_v23, %v4529_v27  ;;  %v4558_v49 = vrot.slane %v4521_v23, %v1326_v28  ;;  %s3597_s17 = sshll.u32 %s431_s19, 4  ;;  %s3741_s18 = sshll.u32 %s4203_s25, 10  ;;  %s6745_s17 = int_to_ptr.vmem [resolvable:$true] %s3597_s17 }
  0x44   : > { %467 = vst.msk [vmem:[#allocation2 + $0x8] sm:$0xff] %vm465_vm0, %v6815_v0  ;;  %468 = vst.msk [vmem:[#allocation2 + $0x10] sm:$0xff] %vm465_vm0, %v6815_v0  ;;  %v4564_v50 = vrot.slane %v4516_v22, %v1225_v41  ;;  %v4570_v52 = vrot.slane %v4516_v22, %v1427_v37  ;;  %v4573_v53 = vrot.slane %v4521_v23, %v1629_v32  ;;  %s6754_s27 = scalar_lea.hbm %s6810_s12, %s3741_s18  ;;  %s3584_s25 = scalar_lea.sflag [#allocation6], %s4286_s26 }
  0x45   : > { %471 = vst.msk [vmem:[#allocation2 + $0x20] sm:$0xff] %vm465_vm0, %v6815_v0  ;;  %472 = vst.msk [vmem:[#allocation2 + $0x28] sm:$0xff] %vm465_vm0, %v6815_v0  ;;  %v4576_v57 = vrot.slane %v4516_v22, %v1528_v42  ;;  %v4579_v58 = vrot.slane %v4516_v22, %v1629_v32  ;;  %v4582_v59 = vrot.slane %v4521_v23, %v1124_v36  ;;  %s4041_s30 = scalar_lea.vmem %s6745_s17, 1024  ;;  %p7009_p11 = scmp.ne.s32.totalorder %s6882_s15, 0 }
  0x46   : > { %473 = vst.msk [vmem:[#allocation2 + $0x30] sm:$0xff] %vm465_vm0, %v6815_v0  ;;  %475 = vst.msk [vmem:[#allocation2 + $0x40] sm:$0xff] %vm465_vm0, %v6815_v0  ;;  %v4585_v60 = vrot.slane %v4521_v23, %v1427_v37  ;;  %p4042_p6 = scmp.ne.s32.totalorder %s6745_s17, %s4041_s30  ;;  %s4114_s14 = smov [#allocation7]  }
  0x47   : > { %474 = vst.msk [vmem:[#allocation2 + $0x38] sm:$0x3] %vm469_vm1, %v6815_v0  ;;  %478 = vst.msk [vmem:[#allocation2 + $0x58] sm:$0x3] %vm469_vm1, %v6815_v0  ;;  %s4045_s29 = sshll.u32 %s4114_s14, 4  ;;  %s4046_s29 = int_to_ptr.vmem [resolvable:$false] %s4045_s29 }
  0x48   : > { %476 = vst.msk [vmem:[#allocation2 + $0x48] sm:$0xff] %vm465_vm0, %v6815_v0  ;;  %477 = vst.msk [vmem:[#allocation2 + $0x50] sm:$0xff] %vm465_vm0, %v6815_v0  ;;  %p4043_p12 = pnand %p4042_p6, %p7009_p11  ;;  %s4047_s28 = scalar_lea.vmem %s4046_s29, 2048 }
  0x49   : > { %479 = vst.msk [vmem:[#allocation2 + $0x60] sm:$0xff] %vm465_vm0, %v6815_v0  ;;  %480 = vst.msk [vmem:[#allocation2 + $0x68] sm:$0xff] %vm465_vm0, %v6815_v0  ;;  %p4048_p8 = scmp.lt.s32.totalorder %s6745_s17, %s4046_s29  ;;  %p4049_p10 = scmp.lt.s32.totalorder %s4047_s28, %s4041_s30 }
  0x4a   : > { %481 = vst.msk [vmem:[#allocation2 + $0x70] sm:$0xff] %vm465_vm0, %v6815_v0  ;;  %483 = vst.msk [vmem:[#allocation2 + $0x80] sm:$0xff] %vm465_vm0, %v6815_v0  ;;  %p4044_p13 = pneg %p4043_p12 }
  0x4b   : > { %482 = vst.msk [vmem:[#allocation2 + $0x78] sm:$0x3] %vm469_vm1, %v6815_v0  ;;  %486 = vst.msk [vmem:[#allocation2 + $0x98] sm:$0x3] %vm469_vm1, %v6815_v0  ;;  %v580_v12 = vld [vmem:[#allocation2 + $0x6] sm:$0xff]  ;;  %v581_v14 = vld [vmem:[#allocation2 + $0xe] sm:$0xff]  ;;  %p4050_p0 = por %p4049_p10, %p4048_p8 }
  0x4c   : > { %484 = vst.msk [vmem:[#allocation2 + $0x88] sm:$0xff] %vm465_vm0, %v6815_v0  ;;  %485 = vst.msk [vmem:[#allocation2 + $0x90] sm:$0xff] %vm465_vm0, %v6815_v0  ;;  %v741_v15 = vld [vmem:[#allocation2 + $0x8] sm:$0xff]  ;;  %v742_v16 = vld [vmem:[#allocation2 + $0x10] sm:$0xff] }
  0x4d   : > { %487 = vst.msk [vmem:[#allocation2 + $0xa0] sm:$0xff] %vm465_vm0, %v6815_v0  ;;  %488 = vst.msk [vmem:[#allocation2 + $0xa8] sm:$0xff] %vm465_vm0, %v6815_v0  ;;  %v903_v17 = vld [vmem:[#allocation2 + $0xa] sm:$0xff]  ;;  %v904_v18 = vld [vmem:[#allocation2 + $0x12] sm:$0xff]  ;;  %p4051_p2 = pnand %p4050_p0, %p4044_p13 }
  0x4e   : > { %489 = vst.msk [vmem:[#allocation2 + $0xb0] sm:$0xff] %vm465_vm0, %v6815_v0  ;;  %491 = vst.msk [vmem:[#allocation2 + $0xc0] sm:$0xff] %vm465_vm0, %v6815_v0 }
  0x4f   : > { %490 = vst.msk [vmem:[#allocation2 + $0xb8] sm:$0x3] %vm469_vm1, %v6815_v0  ;;  %494 = vst.msk [vmem:[#allocation2 + $0xd8] sm:$0x3] %vm469_vm1, %v6815_v0 }
  0x50   : > { %492 = vst.msk [vmem:[#allocation2 + $0xc8] sm:$0xff] %vm465_vm0, %v6815_v0  ;;  %493 = vst.msk [vmem:[#allocation2 + $0xd0] sm:$0xff] %vm465_vm0, %v6815_v0 }
  0x51   : > { %495 = vst.msk [vmem:[#allocation2 + $0xe0] sm:$0xff] %vm465_vm0, %v6815_v0  ;;  %496 = vst.msk [vmem:[#allocation2 + $0xe8] sm:$0xff] %vm465_vm0, %v6815_v0 }
  0x52   : > { %497 = vst.msk [vmem:[#allocation2 + $0xf0] sm:$0xff] %vm465_vm0, %v6815_v0  ;;  %503 = vst.msk [vmem:[#allocation2 + $0x120] sm:$0xff] %vm465_vm0, %v6815_v0 }
  0x53   : > { %498 = vst.msk [vmem:[#allocation2 + $0xf8] sm:$0x3] %vm469_vm1, %v6815_v0  ;;  %506 = vst.msk [vmem:[#allocation2 + $0x138] sm:$0x3] %vm469_vm1, %v6815_v0 }
  0x54   : > { %504 = vst.msk [vmem:[#allocation2 + $0x128] sm:$0xff] %vm465_vm0, %v6815_v0  ;;  %505 = vst.msk [vmem:[#allocation2 + $0x130] sm:$0xff] %vm465_vm0, %v6815_v0 }
  0x55   : > { %511 = vst.msk [vmem:[#allocation2 + $0x160] sm:$0xff] %vm465_vm0, %v6815_v0  ;;  %512 = vst.msk [vmem:[#allocation2 + $0x168] sm:$0xff] %vm465_vm0, %v6815_v0 }
  0x56   : > { %513 = vst.msk [vmem:[#allocation2 + $0x170] sm:$0xff] %vm465_vm0, %v6815_v0  ;;  %519 = vst.msk [vmem:[#allocation2 + $0x1a0] sm:$0xff] %vm465_vm0, %v6815_v0 }
  0x57   : > { %514 = vst.msk [vmem:[#allocation2 + $0x178] sm:$0x3] %vm469_vm1, %v6815_v0  ;;  %522 = vst.msk [vmem:[#allocation2 + $0x1b8] sm:$0x3] %vm469_vm1, %v6815_v0 }
  0x58   : > { %520 = vst.msk [vmem:[#allocation2 + $0x1a8] sm:$0xff] %vm465_vm0, %v6815_v0  ;;  %521 = vst.msk [vmem:[#allocation2 + $0x1b0] sm:$0xff] %vm465_vm0, %v6815_v0 }
  0x59   : > { %523 = vst.msk [vmem:[#allocation2 + $0x1c0] sm:$0xff] %vm465_vm0, %v6815_v0  ;;  %524 = vst.msk [vmem:[#allocation2 + $0x1c8] sm:$0xff] %vm465_vm0, %v6815_v0 }
  0x5a   : > { %525 = vst.msk [vmem:[#allocation2 + $0x1d0] sm:$0xff] %vm465_vm0, %v6815_v0  ;;  %527 = vst.msk [vmem:[#allocation2 + $0x1e0] sm:$0xff] %vm465_vm0, %v6815_v0 }
  0x5b   : > { %526 = vst.msk [vmem:[#allocation2 + $0x1d8] sm:$0x3] %vm469_vm1, %v6815_v0  ;;  %530 = vst.msk [vmem:[#allocation2 + $0x1f8] sm:$0x3] %vm469_vm1, %v6815_v0 }
  0x5c   : > { %528 = vst.msk [vmem:[#allocation2 + $0x1e8] sm:$0xff] %vm465_vm0, %v6815_v0  ;;  %529 = vst.msk [vmem:[#allocation2 + $0x1f0] sm:$0xff] %vm465_vm0, %v6815_v0 }
  0x5d   : > { %531 = vst.msk [vmem:[#allocation2 + $0x200] sm:$0xff] %vm465_vm0, %v6815_v0  ;;  %532 = vst.msk [vmem:[#allocation2 + $0x208] sm:$0xff] %vm465_vm0, %v6815_v0 }
  0x5e   : > { %533 = vst.msk [vmem:[#allocation2 + $0x210] sm:$0xff] %vm465_vm0, %v6815_v0  ;;  %535 = vst.msk [vmem:[#allocation2 + $0x220] sm:$0xff] %vm465_vm0, %v6815_v0 }
  0x5f   : > { %534 = vst.msk [vmem:[#allocation2 + $0x218] sm:$0x3] %vm469_vm1, %v6815_v0  ;;  %538 = vst.msk [vmem:[#allocation2 + $0x238] sm:$0x3] %vm469_vm1, %v6815_v0 }
  0x60   : > { %536 = vst.msk [vmem:[#allocation2 + $0x228] sm:$0xff] %vm465_vm0, %v6815_v0  ;;  %537 = vst.msk [vmem:[#allocation2 + $0x230] sm:$0xff] %vm465_vm0, %v6815_v0 }
  0x61   : > { %539 = vst.msk [vmem:[#allocation2 + $0x240] sm:$0xff] %vm465_vm0, %v6815_v0  ;;  %540 = vst.msk [vmem:[#allocation2 + $0x248] sm:$0xff] %vm465_vm0, %v6815_v0 }
  0x62   : > { %541 = vst.msk [vmem:[#allocation2 + $0x250] sm:$0xff] %vm465_vm0, %v6815_v0  ;;  %543 = vst.msk [vmem:[#allocation2 + $0x260] sm:$0xff] %vm465_vm0, %v6815_v0 }
  0x63   : > { %542 = vst.msk [vmem:[#allocation2 + $0x258] sm:$0x3] %vm469_vm1, %v6815_v0  ;;  %546 = vst.msk [vmem:[#allocation2 + $0x278] sm:$0x3] %vm469_vm1, %v6815_v0 }
  0x64   : > { %544 = vst.msk [vmem:[#allocation2 + $0x268] sm:$0xff] %vm465_vm0, %v6815_v0  ;;  %545 = vst.msk [vmem:[#allocation2 + $0x270] sm:$0xff] %vm465_vm0, %v6815_v0 }
  0x65   : > { %6885 = vst [vmem:[#allocation13_spill] sm:$0xff] %v4457_v1  ;;  %6886 = vst [vmem:[#allocation14_spill] sm:$0xff] %v4460_v2 }
  0x66   : > { %6887 = vst [vmem:[#allocation15_spill] sm:$0xff] %v4463_v3  ;;  %6888 = vst [vmem:[#allocation16_spill] sm:$0xff] %v4466_v4 }
  0x67   : > { %6889 = vst [vmem:[#allocation17_spill] sm:$0xff] %v4469_v5  ;;  %6890 = vst [vmem:[#allocation18_spill] sm:$0xff] %v4472_v6 }
  0x68   : > { %560 = vst.msk [vmem:[#allocation2 + $0x108] sm:$0xff] %vm465_vm0, %v4457_v1  ;;  %561 = vst.msk [vmem:[#allocation2 + $0x110] sm:$0xff] %vm465_vm0, %v4460_v2 }
  0x69   : > { %564 = vst.msk [vmem:[#allocation2 + $0x148] sm:$0xff] %vm465_vm0, %v4463_v3  ;;  %565 = vst.msk [vmem:[#allocation2 + $0x150] sm:$0xff] %vm465_vm0, %v4466_v4 }
  0x6a   : > { %568 = vst.msk [vmem:[#allocation2 + $0x188] sm:$0xff] %vm465_vm0, %v4469_v5  ;;  %569 = vst.msk [vmem:[#allocation2 + $0x190] sm:$0xff] %vm465_vm0, %v4472_v6 }
  0x6b   : > { %6891 = vst [vmem:[#allocation19_spill] sm:$0xff] %v4487_v8  ;;  %6892 = vst [vmem:[#allocation20_spill] sm:$0xff] %v4490_v9 }
  0x6c   : > { %6893 = vst [vmem:[#allocation21_spill] sm:$0xff] %v4493_v10  ;;  %6894 = vst [vmem:[#allocation22_spill] sm:$0xff] %v4496_v11 }
  0x6d   : > { %548 = vst.msk [vmem:[#allocation2 + $0x48] sm:$0xff] %vm465_vm0, %v4487_v8  ;;  %549 = vst.msk [vmem:[#allocation2 + $0x50] sm:$0xff] %vm465_vm0, %v4490_v9 }
  0x6e   : > { %6895 = vst [vmem:[#allocation23_spill] sm:$0xff] %v4503_v13  ;;  %552 = vst.msk [vmem:[#allocation2 + $0x88] sm:$0xff] %vm465_vm0, %v4493_v10 }
  0x6f   : > { %553 = vst.msk [vmem:[#allocation2 + $0x90] sm:$0xff] %vm465_vm0, %v4496_v11  ;;  %620 = vst.msk [vmem:[#allocation3] sm:$0xff] %vm465_vm0, %v580_v12  ;;  %v596_v19 = vld [vmem:[#allocation2 + $0x106] sm:$0xff]  ;;  %v597_v20 = vld [vmem:[#allocation2 + $0x10e] sm:$0xff]  ;;  %v4591_v12 = vrot.slane %v4516_v22, %v1730_v43 }
  0x70   : > { %621 = vst.msk [vmem:[#allocation3 + $0x8] sm:$0xff] %vm465_vm0, %v581_v14  ;;  %782 = vst.msk [vmem:[#allocation3 + $0x280] sm:$0xff] %vm465_vm0, %v741_v15  ;;  %v600_v21 = vld [vmem:[#allocation2 + $0x146] sm:$0xff]  ;;  %v601_v24 = vld [vmem:[#allocation2 + $0x14e] sm:$0xff] }
  0x71   : > { %783 = vst.msk [vmem:[#allocation3 + $0x288] sm:$0xff] %vm465_vm0, %v742_v16  ;;  %944 = vst.msk [vmem:[#allocation3 + $0x500] sm:$0xff] %vm465_vm0, %v903_v17  ;;  %v604_v25 = vld [vmem:[#allocation2 + $0x186] sm:$0xff]  ;;  %v605_v26 = vld [vmem:[#allocation2 + $0x18e] sm:$0xff]  ;;  %v4594_v16 = vrot.slane %v4521_v23, %v1225_v41 }
  0x72   : > { %945 = vst.msk [vmem:[#allocation3 + $0x508] sm:$0xff] %vm465_vm0, %v904_v18  ;;  %636 = vst.msk [vmem:[#allocation3 + $0x80] sm:$0xff] %vm465_vm0, %v596_v19  ;;  %v757_v29 = vld [vmem:[#allocation2 + $0x108] sm:$0xff]  ;;  %v758_v30 = vld [vmem:[#allocation2 + $0x110] sm:$0xff]  ;;  %v4597_v18 = vrot.slane %v4521_v23, %v1528_v42  ;;  %v4600_v19 = vrot.slane %v4521_v23, %v1730_v43 }
  0x73   : > { %637 = vst.msk [vmem:[#allocation3 + $0x88] sm:$0xff] %vm465_vm0, %v597_v20  ;;  %640 = vst.msk [vmem:[#allocation3 + $0xa0] sm:$0xff] %vm465_vm0, %v600_v21  ;;  %v761_v31 = vld [vmem:[#allocation2 + $0x148] sm:$0xff]  ;;  %v762_v33 = vld [vmem:[#allocation2 + $0x150] sm:$0xff] }
  0x74   : > { %6896 = vst [vmem:[#allocation24_spill] sm:$0xff] %v4529_v27  ;;  %641 = vst.msk [vmem:[#allocation3 + $0xa8] sm:$0xff] %vm465_vm0, %v601_v24  ;;  %v765_v34 = vld [vmem:[#allocation2 + $0x188] sm:$0xff]  ;;  %v766_v35 = vld [vmem:[#allocation2 + $0x190] sm:$0xff] }
  0x75   : > { %644 = vst.msk [vmem:[#allocation3 + $0xc0] sm:$0xff] %vm465_vm0, %v604_v25  ;;  %645 = vst.msk [vmem:[#allocation3 + $0xc8] sm:$0xff] %vm465_vm0, %v605_v26  ;;  %v919_v38 = vld [vmem:[#allocation2 + $0x10a] sm:$0xff]  ;;  %v920_v39 = vld [vmem:[#allocation2 + $0x112] sm:$0xff] }
  0x76   : > { %798 = vst.msk [vmem:[#allocation3 + $0x300] sm:$0xff] %vm465_vm0, %v757_v29  ;;  %799 = vst.msk [vmem:[#allocation3 + $0x308] sm:$0xff] %vm465_vm0, %v758_v30  ;;  %v923_v40 = vld [vmem:[#allocation2 + $0x14a] sm:$0xff]  ;;  %v924_v44 = vld [vmem:[#allocation2 + $0x152] sm:$0xff] }
  0x77   : > { %802 = vst.msk [vmem:[#allocation3 + $0x320] sm:$0xff] %vm465_vm0, %v761_v31  ;;  %803 = vst.msk [vmem:[#allocation3 + $0x328] sm:$0xff] %vm465_vm0, %v762_v33  ;;  %v927_v45 = vld [vmem:[#allocation2 + $0x18a] sm:$0xff]  ;;  %v928_v46 = vld [vmem:[#allocation2 + $0x192] sm:$0xff] }
  0x78   : > { %806 = vst.msk [vmem:[#allocation3 + $0x340] sm:$0xff] %vm465_vm0, %v765_v34  ;;  %807 = vst.msk [vmem:[#allocation3 + $0x348] sm:$0xff] %vm465_vm0, %v766_v35  ;;  %v584_v54 = vld [vmem:[#allocation2 + $0x46] sm:$0xff]  ;;  %v585_v55 = vld [vmem:[#allocation2 + $0x4e] sm:$0xff] }
  0x79   : > { %960 = vst.msk [vmem:[#allocation3 + $0x580] sm:$0xff] %vm465_vm0, %v919_v38  ;;  %961 = vst.msk [vmem:[#allocation3 + $0x588] sm:$0xff] %vm465_vm0, %v920_v39  ;;  %v588_v56 = vld [vmem:[#allocation2 + $0x86] sm:$0xff]  ;;  %v589_v61 = vld [vmem:[#allocation2 + $0x8e] sm:$0xff] }
  0x7a   : > { %964 = vst.msk [vmem:[#allocation3 + $0x5a0] sm:$0xff] %vm465_vm0, %v923_v40  ;;  %6897 = vst [vmem:[#allocation25_spill] sm:$0xff] %v4551_v47  ;;  %v745_v62 = vld [vmem:[#allocation2 + $0x48] sm:$0xff]  ;;  %v746_v63 = vld [vmem:[#allocation2 + $0x50] sm:$0xff] }
  0x7b   : > { %965 = vst.msk [vmem:[#allocation3 + $0x5a8] sm:$0xff] %vm465_vm0, %v924_v44  ;;  %968 = vst.msk [vmem:[#allocation3 + $0x5c0] sm:$0xff] %vm465_vm0, %v927_v45  ;;  %v1984_v14 = vld [vmem:[#allocation3 + $0x80] sm:$0xff]  ;;  %v1985_v15 = vld [vmem:[#allocation3 + $0x88] sm:$0xff] }
  0x7c   : > { %969 = vst.msk [vmem:[#allocation3 + $0x5c8] sm:$0xff] %vm465_vm0, %v928_v46  ;;  %6898 = vst [vmem:[#allocation26_spill] sm:$0xff] %v4564_v50  ;;  %v2285_v17 = vld [vmem:[#allocation3 + $0xa0] sm:$0xff]  ;;  %v4608_v20 = vld [vmem:[%s6801_s3 + $0x8] ss:$0 sm:$0xff]  ;;  %v2020_v21 = vmul.f32 %v4555_v48, %v1984_v14  ;;  %v2021_v22 = vmul.f32 %v4555_v48, %v1985_v15 }
  0x7d   : > { %6899 = vst [vmem:[#allocation27_spill] sm:$0xff] %v4567_v51  ;;  %6900 = vst [vmem:[#allocation28_spill] sm:$0xff] %v4570_v52  ;;  %v2286_v24 = vld [vmem:[#allocation3 + $0xa8] sm:$0xff]  ;;  %v2321_v25 = vmul.f32 %v4558_v49, %v2285_v17  ;;  %v2555_v23 = vld [vmem:[#allocation3 + $0xc0] sm:$0xff]  ;;  %v4614_v28 = vmul.f32 %v2285_v17, %v4555_v48 }
  0x7e   : > { %6901 = vst [vmem:[#allocation29_spill] sm:$0xff] %v4576_v57  ;;  %6902 = vst [vmem:[#allocation30_spill] sm:$0xff] %v4579_v58  ;;  %v2556_v26 = vld [vmem:[#allocation3 + $0xc8] sm:$0xff]  ;;  %v1409_v29 = vld [vmem:[#allocation3 + $0x320] sm:$0xff]  ;;  %v2322_v32 = vmul.f32 %v4558_v49, %v2286_v24  ;;  %v4618_v33 = vmul.f32 %v4573_v53, %v2555_v23  ;;  %v4624_v35 = vmul.f32 %v2286_v24, %v4555_v48 }
  0x7f   : > { %624 = vst.msk [vmem:[#allocation3 + $0x20] sm:$0xff] %vm465_vm0, %v584_v54  ;;  %625 = vst.msk [vmem:[#allocation3 + $0x28] sm:$0xff] %vm465_vm0, %v585_v55  ;;  %v2084_v30 = vld [vmem:[#allocation3 + $0x300] sm:$0xff]  ;;  %v2085_v31 = vld [vmem:[#allocation3 + $0x308] sm:$0xff]  ;;  %v4621_v34 = vmul.f32 %v4573_v53, %v2556_v26  ;;  %v4627_v37 = vmul.f32 %v4570_v52, %v1409_v29  ;;  %v2389_v40 = vmul.f32 %v4585_v60, %v1409_v29 }
  0x80   : > { %628 = vst.msk [vmem:[#allocation3 + $0x40] sm:$0xff] %vm465_vm0, %v588_v56  ;;  %6903 = vst [vmem:[#allocation31_spill] sm:$0xff] %v4591_v12  ;;  %v1410_v36 = vld [vmem:[#allocation3 + $0x328] sm:$0xff]  ;;  %v2120_v38 = vmul.f32 %v4582_v59, %v2084_v30  ;;  %v2121_v39 = vmul.f32 %v4582_v59, %v2085_v31  ;;  %v4632_v41 = vld [vmem:[#allocation3 + $0x340] sm:$0xff]  ;;  %v4668_v11 = vmul.f32 %v4582_v59, %v1409_v29 }
  0x81   : > { %629 = vst.msk [vmem:[#allocation3 + $0x48] sm:$0xff] %vm465_vm0, %v589_v61  ;;  %786 = vst.msk [vmem:[#allocation3 + $0x2a0] sm:$0xff] %vm465_vm0, %v745_v62  ;;  %v4634_v42 = vld [vmem:[#allocation3 + $0x348] sm:$0xff]  ;;  %v4637_v43 = vmul.f32 %v4570_v52, %v1410_v36  ;;  %v2184_v44 = vld [vmem:[#allocation3 + $0x580] sm:$0xff]  ;;  %v2390_v46 = vmul.f32 %v4585_v60, %v1410_v36  ;;  %v4642_v55 = vmul.f32 %v4600_v19, %v4632_v41 }
  0x82   : > { %787 = vst.msk [vmem:[#allocation3 + $0x2a8] sm:$0xff] %vm465_vm0, %v746_v63  ;;  %6904 = vst [vmem:[#allocation32_spill] sm:$0xff] %v4627_v37  ;;  %v2185_v45 = vld [vmem:[#allocation3 + $0x588] sm:$0xff]  ;;  %v2454_v54 = vld [vmem:[#allocation3 + $0x5a0] sm:$0xff]  ;;  %v4646_v56 = vmul.f32 %v4600_v19, %v4634_v42  ;;  %v2152_v61 = vadd.f32 %v2120_v38, %v2020_v21  ;;  %v2153_v62 = vadd.f32 %v2121_v39, %v2021_v22 }
  0x83   : > { %6905 = vst [vmem:[#allocation33_spill] sm:$0xff] %v4637_v43  ;;  %v2220_v63 = vmul.f32 %v4594_v16, %v2184_v44  ;;  %v2221_v14 = vmul.f32 %v4594_v16, %v2185_v45  ;;  %v2455_v15 = vld [vmem:[#allocation3 + $0x5a8] sm:$0xff]  ;;  %v4650_v17 = vld [vmem:[#allocation3 + $0x5c0] sm:$0xff]  ;;  %v2490_v30 = vmul.f32 %v4597_v18, %v2454_v54  ;;  %v750_v38 = vld [vmem:[#allocation2 + $0x90] sm:$0xff]  ;;  %v4671_v10 = vmul.f32 %v4582_v59, %v1410_v36 }
  0x84   : > { %v4652_v24 = vld [vmem:[#allocation3 + $0x5c8] sm:$0xff]  ;;  %v2491_v31 = vmul.f32 %v4597_v18, %v2455_v15  ;;  %v4658_v0 = vmul.f32 %v4608_v20, %v4650_v17  ;;  %791 = vst.msk [vmem:[#allocation3 + $0x2c8] sm:$0xff] %vm465_vm0, %v750_v38  ;;  %v908_v7 = vld [vmem:[#allocation2 + $0x52] sm:$0xff]  ;;  %v4684_v29 = vmul.f32 %v2455_v15, %v4594_v16  ;;  %v4687_v36 = vmul.f32 %v2555_v23, %v4558_v49  ;;  %vm6600_vm2 = vmpackc.low %vm465_vm0, %vm465_vm0 }
  0x85   : > { %v4662_v21 = vmul.f32 %v4608_v20, %v4652_v24  ;;  %v749_v22 = vld [vmem:[#allocation2 + $0x88] sm:$0xff]  ;;  %v2252_v44 = vadd.f32 %v2220_v63, %v2152_v61  ;;  %v2253_v45 = vadd.f32 %v2221_v14, %v2153_v62  ;;  %v912_v1 = vld [vmem:[#allocation2 + $0x92] sm:$0xff]  ;;  %949 = vst.msk [vmem:[#allocation3 + $0x528] sm:$0xff] %vm465_vm0, %v908_v7  ;;  %v1968_v63 = vld [vmem:[#allocation3] sm:$0xff]  ;;  %v4681_v14 = vmul.f32 %v2454_v54, %v4594_v16 }
  0x86   : > { %v907_v39 = vld [vmem:[#allocation2 + $0x4a] sm:$0xff]  ;;  %790 = vst.msk [vmem:[#allocation3 + $0x2c0] sm:$0xff] %vm465_vm0, %v749_v22  ;;  %953 = vst.msk [vmem:[#allocation3 + $0x548] sm:$0xff] %vm465_vm0, %v912_v1  ;;  %v4690_v7 = vmul.f32 %v2556_v26, %v4558_v49  ;;  %v2004_v6 = vmul.f32 %v4555_v48, %v1968_v63  ;;  %v4795_v43 = vld [vmem:[%s4290_s13 + $0x18] sm:$0xff] }
  0x87   : > { %v911_v2 = vld [vmem:[#allocation2 + $0x8a] sm:$0xff]  ;;  %948 = vst.msk [vmem:[#allocation3 + $0x520] sm:$0xff] %vm465_vm0, %v907_v39  ;;  %v2354_v22 = vadd.f32 %v2322_v32, %v2253_v45  ;;  %v2068_v39 = vld [vmem:[#allocation3 + $0x280] sm:$0xff]  ;;  %6915 = vst [vmem:[#allocation43_spill] sm:$0xff] %v4795_v43 }
  0x88   : > { %952 = vst.msk [vmem:[#allocation3 + $0x540] sm:$0xff] %vm465_vm0, %v911_v2  ;;  %v4676_v61 = vld [vmem:[#allocation3 + $0x2a0] sm:$0xff]  ;;  %v2353_v2 = vadd.f32 %v2321_v25, %v2252_v44  ;;  %v1969_v54 = vld [vmem:[#allocation3 + $0x8] sm:$0xff]  ;;  %v2104_v26 = vmul.f32 %v4582_v59, %v2068_v39  ;;  %v4798_v37 = vld [vmem:[%s4290_s13 + $0x30] sm:$0xff] }
  0x89   : > { %v4678_v62 = vld [vmem:[#allocation3 + $0x2a8] sm:$0xff]  ;;  %v4694_v1 = vmul.f32 %v4570_v52, %v4676_v61  ;;  %v2005_v23 = vmul.f32 %v4555_v48, %v1969_v54  ;;  %v2168_v32 = vld [vmem:[#allocation3 + $0x500] sm:$0xff]  ;;  %v2422_v13 = vadd.f32 %v2390_v46, %v2354_v22  ;;  %v4719_v46 = vld [vmem:[%s4290_s13 + $0x70] sm:$0xff]  ;;  %6916 = vst [vmem:[#allocation44_spill] sm:$0xff] %v4798_v37 }
  0x8a   : > { %v4698_v38 = vmul.f32 %v4570_v52, %v4678_v62  ;;  %v2069_v15 = vld [vmem:[#allocation3 + $0x288] sm:$0xff]  ;;  %v4704_v45 = vld [vmem:[#allocation3 + $0x20] sm:$0xff]  ;;  %v2421_v5 = vadd.f32 %v2389_v40, %v2353_v2  ;;  %v2204_v9 = vmul.f32 %v4594_v16, %v2168_v32  ;;  %v2136_v8 = vadd.f32 %v2104_v26, %v2004_v6  ;;  %6908 = vst [vmem:[#allocation36_spill] sm:$0xff] %v4719_v46  ;;  %v4722_v2 = vld [vmem:[%s4290_s13 + $0x78] sm:$0xff] }
  0x8b   : > { %6906 = vst [vmem:[#allocation34_spill] sm:$0xff] %v4694_v1  ;;  %v2105_v25 = vmul.f32 %v4582_v59, %v2069_v15  ;;  %v2169_v44 = vld [vmem:[#allocation3 + $0x508] sm:$0xff]  ;;  %v4710_v39 = vld [vmem:[#allocation3 + $0x40] sm:$0xff]  ;;  %v2305_v3 = vmul.f32 %v4558_v49, %v4704_v45  ;;  %6909 = vst [vmem:[#allocation37_spill] sm:$0xff] %v4722_v2  ;;  %v2373_v52 = vmul.f32 %v4585_v60, %v4676_v61 }
  0x8c   : > { %6907 = vst [vmem:[#allocation35_spill] sm:$0xff] %v4698_v38  ;;  %v2205_v63 = vmul.f32 %v4594_v16, %v2169_v44  ;;  %v4708_v54 = vld [vmem:[#allocation3 + $0x28] sm:$0xff]  ;;  %v4725_v22 = vld [vmem:[%s4290_s13 + $0x90] sm:$0xff]  ;;  %v2522_v32 = vadd.f32 %v2490_v30, %v2421_v5  ;;  %v2523_v44 = vadd.f32 %v2491_v31, %v2422_v13  ;;  %v2374_v6 = vmul.f32 %v4585_v60, %v4678_v62 }
  0x8d   : > { %v4712_v15 = vld [vmem:[#allocation3 + $0x48] sm:$0xff]  ;;  %v2137_v4 = vadd.f32 %v2105_v25, %v2005_v23  ;;  %v2306_v40 = vmul.f32 %v4558_v49, %v4708_v54  ;;  %6910 = vst [vmem:[#allocation38_spill] sm:$0xff] %v4725_v22  ;;  %v4732_v23 = vld [vmem:[%s4290_s13 + $0x98] sm:$0xff]  ;;  %v4735_v26 = vld [vmem:[%s4290_s13 + $0xb0] sm:$0xff]  ;;  %v2236_v5 = vadd.f32 %v2204_v9, %v2136_v8  ;;  %v4750_v31 = vmul.f32 %v4573_v53, %v4710_v39 }
  0x8e   : > { %6911 = vst [vmem:[#allocation39_spill] sm:$0xff] %v4732_v23  ;;  %6912 = vst [vmem:[#allocation40_spill] sm:$0xff] %v4735_v26  ;;  %v4738_v25 = vld [vmem:[%s4290_s13 + $0xb8] sm:$0xff]  ;;  %v4746_v30 = vld [vmem:[#allocation3 + $0x520] sm:$0xff]  ;;  %v4754_v38 = vmul.f32 %v4573_v53, %v4712_v15  ;;  %v2624_v8 = vadd.f32 %v4621_v34, %v2523_v44 }
  0x8f   : > { %6913 = vst [vmem:[#allocation41_spill] sm:$0xff] %v4738_v25  ;;  %562 = vst.msk [vmem:[#allocation2 + $0x128] sm:$0xff] %vm465_vm0, %v4719_v46  ;;  %v2237_v13 = vadd.f32 %v2205_v63, %v2137_v4  ;;  %v4756_v1 = vld [vmem:[#allocation3 + $0x2c0] sm:$0xff]  ;;  %v4758_v46 = vld [vmem:[#allocation3 + $0x2c8] sm:$0xff]  ;;  %v2623_v4 = vadd.f32 %v4618_v33, %v2522_v32  ;;  %v2474_v63 = vmul.f32 %v4597_v18, %v4746_v30 }
  0x90   : > { %563 = vst.msk [vmem:[#allocation2 + $0x130] sm:$0xff] %vm465_vm0, %v4722_v2  ;;  %566 = vst.msk [vmem:[#allocation2 + $0x168] sm:$0xff] %vm465_vm0, %v4725_v22  ;;  %v4768_v9 = vld [vmem:[#allocation3 + $0x528] sm:$0xff]  ;;  %v4774_v2 = vmul.f32 %v4600_v19, %v4756_v1  ;;  %v4783_v33 = vld [vmem:[%s6802_s4] ss:$0 sm:$0xff]  ;;  %v2337_v34 = vadd.f32 %v2305_v3, %v2236_v5  ;;  %v2725_v58 = vadd.f32 %v4646_v56, %v2624_v8 }
  0x91   : > { %567 = vst.msk [vmem:[#allocation2 + $0x170] sm:$0xff] %vm465_vm0, %v4732_v23  ;;  %570 = vst.msk [vmem:[#allocation2 + $0x1a8] sm:$0xff] %vm465_vm0, %v4735_v26  ;;  %v4776_v23 = vld [vmem:[#allocation3 + $0x540] sm:$0xff]  ;;  %v4778_v26 = vld [vmem:[#allocation3 + $0x548] sm:$0xff]  ;;  %v2338_v32 = vadd.f32 %v2306_v40, %v2237_v13  ;;  %v2475_v44 = vmul.f32 %v4597_v18, %v4768_v9  ;;  %v2724_v12 = vadd.f32 %v4642_v55, %v2623_v4 }
  0x92   : > { %571 = vst.msk [vmem:[#allocation2 + $0x1b0] sm:$0xff] %vm465_vm0, %v4738_v25  ;;  %v4789_v25 = vmul.f32 %v4600_v19, %v4758_v46  ;;  %v4792_v22 = vld [vmem:[%s4290_s13 + $0x10] sm:$0xff]  ;;  %v4804_v3 = vmul.f32 %v4608_v20, %v4776_v23  ;;  %v4808_v40 = vmul.f32 %v4608_v20, %v4778_v26  ;;  %v4811_v5 = vld [vmem:[%s4290_s13 + $0x38] sm:$0xff]  ;;  %551 = vst.msk [vmem:[#allocation2 + $0x70] sm:$0xff] %vm465_vm0, %v4795_v43 }
  0x93   : > { %6914 = vst [vmem:[#allocation42_spill] sm:$0xff] %v4792_v22  ;;  %6917 = vst [vmem:[#allocation45_spill] sm:$0xff] %v4811_v5  ;;  %v582_v55 = vld [vmem:[#allocation2 + $0x26] sm:$0xff]  ;;  %v583_v56 = vld [vmem:[#allocation2 + $0x2e] sm:$0xff]  ;;  %v2405_v13 = vadd.f32 %v2373_v52, %v2337_v34  ;;  %v2406_v4 = vadd.f32 %v2374_v6, %v2338_v32  ;;  %v2156_v43 = vadd.f32 %v4668_v11, %v4614_v28 }
  0x94   : > { %550 = vst.msk [vmem:[#allocation2 + $0x68] sm:$0xff] %vm465_vm0, %v4792_v22  ;;  %554 = vst.msk [vmem:[#allocation2 + $0xa8] sm:$0xff] %vm465_vm0, %v4798_v37  ;;  %v743_v8 = vld [vmem:[#allocation2 + $0x28] sm:$0xff]  ;;  %v744_v22 = vld [vmem:[#allocation2 + $0x30] sm:$0xff]  ;;  %v2157_v37 = vadd.f32 %v4671_v10, %v4624_v35  ;;  %v2825_v52 = vadd.f32 %v4658_v0, %v2724_v12  ;;  %v2826_v6 = vadd.f32 %v4662_v21, %v2725_v58 }
  0x95   : > { %555 = vst.msk [vmem:[#allocation2 + $0xb0] sm:$0xff] %vm465_vm0, %v4811_v5  ;;  %622 = vst.msk [vmem:[#allocation3 + $0x10] sm:$0xff] %vm465_vm0, %v582_v55  ;;  %v905_v57 = vld [vmem:[#allocation2 + $0x2a] sm:$0xff]  ;;  %v906_v34 = vld [vmem:[#allocation2 + $0x32] sm:$0xff]  ;;  %v2393_v11 = vmul.f32 %v4632_v41, %v4585_v60  ;;  %v2394_v10 = vmul.f32 %v4634_v42, %v4585_v60  ;;  %v2506_v0 = vadd.f32 %v2474_v63, %v2405_v13 }
  0x96   : > { %623 = vst.msk [vmem:[#allocation3 + $0x18] sm:$0xff] %vm465_vm0, %v583_v56  ;;  %784 = vst.msk [vmem:[#allocation3 + $0x290] sm:$0xff] %vm465_vm0, %v743_v8  ;;  %v4833_v32 = vld [vmem:[%s4290_s13 + $0xc0] sm:$0xff]  ;;  %v4836_v55 = vld [vmem:[%s4290_s13 + $0xc8] sm:$0xff]  ;;  %v2507_v12 = vadd.f32 %v2475_v44, %v2406_v4  ;;  %v2257_v41 = vadd.f32 %v4684_v29, %v2157_v37  ;;  %v2864_v21 = vadd.f32 %v4783_v33, %v2825_v52 }
  0x97   : > { %785 = vst.msk [vmem:[#allocation3 + $0x298] sm:$0xff] %vm465_vm0, %v744_v22  ;;  %946 = vst.msk [vmem:[#allocation3 + $0x510] sm:$0xff] %vm465_vm0, %v905_v57  ;;  %v598_v58 = vld [vmem:[#allocation2 + $0x126] sm:$0xff]  ;;  %v599_v28 = vld [vmem:[#allocation2 + $0x12e] sm:$0xff]  ;;  %v2256_v57 = vadd.f32 %v4681_v14, %v2156_v43  ;;  %v2865_v42 = vadd.f32 %v4783_v33, %v2826_v6  ;;  %v2494_v56 = vmul.f32 %v4650_v17, %v4597_v18 }
  0x98   : > { %6918 = vst [vmem:[#allocation46_spill] sm:$0xff] %v4833_v32  ;;  %6919 = vst [vmem:[#allocation47_spill] sm:$0xff] %v4836_v55  ;;  %v602_v35 = vld [vmem:[#allocation2 + $0x166] sm:$0xff]  ;;  %v603_v22 = vld [vmem:[#allocation2 + $0x16e] sm:$0xff]  ;;  %v2495_v43 = vmul.f32 %v4652_v24, %v4597_v18  ;;  %v2607_v37 = vadd.f32 %v4750_v31, %v2506_v0  ;;  %v2608_v14 = vadd.f32 %v4754_v38, %v2507_v12  ;;  %v2896_v52 = vmax.f32 %v2864_v21, 0.0 }
  0x99   : > { %947 = vst.msk [vmem:[#allocation3 + $0x518] sm:$0xff] %vm465_vm0, %v906_v34  ;;  %572 = vst.msk [vmem:[#allocation2 + $0x1c8] sm:$0xff] %vm465_vm0, %v4833_v32  ;;  %v606_v63 = vld [vmem:[#allocation2 + $0x1a6] sm:$0xff]  ;;  %v607_v44 = vld [vmem:[#allocation2 + $0x1ae] sm:$0xff]  ;;  %v2357_v8 = vadd.f32 %v4687_v36, %v2256_v57  ;;  %v2358_v17 = vadd.f32 %v4690_v7, %v2257_v41  ;;  %v2897_v6 = vmax.f32 %v2865_v42, 0.0  ;;  %v2008_v38 = vmul.f32 %v4704_v45, %v4555_v48 }
  0x9a   : > { %573 = vst.msk [vmem:[#allocation2 + $0x1d0] sm:$0xff] %vm465_vm0, %v4836_v55  ;;  %638 = vst.msk [vmem:[#allocation3 + $0x90] sm:$0xff] %vm465_vm0, %v598_v58  ;;  %v759_v29 = vld [vmem:[#allocation2 + $0x128] sm:$0xff]  ;;  %v760_v13 = vld [vmem:[#allocation2 + $0x130] sm:$0xff]  ;;  %v2009_v0 = vmul.f32 %v4708_v54, %v4555_v48  ;;  %v2708_v36 = vadd.f32 %v4774_v2, %v2607_v37  ;;  %v2709_v7 = vadd.f32 %v4789_v25, %v2608_v14 }
  0x9b   : > { %639 = vst.msk [vmem:[#allocation3 + $0x98] sm:$0xff] %vm465_vm0, %v599_v28  ;;  %642 = vst.msk [vmem:[#allocation3 + $0xb0] sm:$0xff] %vm465_vm0, %v602_v35  ;;  %v763_v4 = vld [vmem:[#allocation2 + $0x168] sm:$0xff]  ;;  %v764_v24 = vld [vmem:[#allocation2 + $0x170] sm:$0xff]  ;;  %v2425_v35 = vadd.f32 %v2393_v11, %v2357_v8  ;;  %v2426_v57 = vadd.f32 %v2394_v10, %v2358_v17  ;;  %v2936_v41 = vpack.c.bf16 %v2897_v6, %v2896_v52 }
  0x9c   : > { %643 = vst.msk [vmem:[#allocation3 + $0xb8] sm:$0xff] %vm465_vm0, %v603_v22  ;;  %646 = vst.msk [vmem:[#allocation3 + $0xd0] sm:$0xff] %vm465_vm0, %v606_v63  ;;  %v767_v34 = vld [vmem:[#allocation2 + $0x1a8] sm:$0xff]  ;;  %v768_v31 = vld [vmem:[#allocation2 + $0x1b0] sm:$0xff]  ;;  %v2108_v54 = vmul.f32 %v4582_v59, %v4676_v61  ;;  %v2109_v2 = vmul.f32 %v4582_v59, %v4678_v62  ;;  %v2208_v25 = vmul.f32 %v4746_v30, %v4594_v16 }
  0x9d   : > { %647 = vst.msk [vmem:[#allocation3 + $0xd8] sm:$0xff] %vm465_vm0, %v607_v44  ;;  %800 = vst.msk [vmem:[#allocation3 + $0x310] sm:$0xff] %vm465_vm0, %v759_v29  ;;  %v921_v12 = vld [vmem:[#allocation2 + $0x12a] sm:$0xff]  ;;  %v922_v58 = vld [vmem:[#allocation2 + $0x132] sm:$0xff]  ;;  %v2809_v11 = vadd.f32 %v4804_v3, %v2708_v36  ;;  %v2810_v10 = vadd.f32 %v4808_v40, %v2709_v7  ;;  %v4891_v61 = vadd.f32 %v2494_v56, %v2425_v35  ;;  %3878 = vmatprep.subr.msk.bf16.mxu0 %vm465_vm0, %v2936_v41 }
  0x9e   : > { %801 = vst.msk [vmem:[#allocation3 + $0x318] sm:$0xff] %vm465_vm0, %v760_v13  ;;  %804 = vst.msk [vmem:[#allocation3 + $0x330] sm:$0xff] %vm465_vm0, %v763_v4  ;;  %v925_v28 = vld [vmem:[#allocation2 + $0x16a] sm:$0xff]  ;;  %v926_v45 = vld [vmem:[#allocation2 + $0x172] sm:$0xff]  ;;  %v4893_v37 = vadd.f32 %v2495_v43, %v2426_v57  ;;  %v2140_v40 = vadd.f32 %v2108_v54, %v2008_v38  ;;  %v4899_v14 = vadd.f32 %v2109_v2, %v2009_v0 }
  0x9f   : > { %805 = vst.msk [vmem:[#allocation3 + $0x338] sm:$0xff] %vm465_vm0, %v764_v24  ;;  %808 = vst.msk [vmem:[#allocation3 + $0x350] sm:$0xff] %vm465_vm0, %v767_v34  ;;  %v929_v21 = vld [vmem:[#allocation2 + $0x1aa] sm:$0xff]  ;;  %v930_v42 = vld [vmem:[#allocation2 + $0x1b2] sm:$0xff]  ;;  %v4903_v56 = vmul.f32 %v4768_v9, %v4594_v16  ;;  %v4907_v43 = vmul.f32 %v4710_v39, %v4558_v49  ;;  %v2848_v29 = vadd.f32 %v4783_v33, %v2809_v11 }
  0xa0   : > { %809 = vst.msk [vmem:[#allocation3 + $0x358] sm:$0xff] %vm465_vm0, %v768_v31  ;;  %962 = vst.msk [vmem:[#allocation3 + $0x590] sm:$0xff] %vm465_vm0, %v921_v12  ;;  %v586_v22 = vld [vmem:[#allocation2 + $0x66] sm:$0xff]  ;;  %v587_v63 = vld [vmem:[#allocation2 + $0x6e] sm:$0xff]  ;;  %v2849_v13 = vadd.f32 %v4783_v33, %v2810_v10  ;;  %v4918_v9 = vmul.f32 %v4712_v15, %v4558_v49  ;;  %v4922_v39 = vmul.f32 %v4756_v1, %v4585_v60 }
  0xa1   : > { %963 = vst.msk [vmem:[#allocation3 + $0x598] sm:$0xff] %vm465_vm0, %v922_v58  ;;  %966 = vst.msk [vmem:[#allocation3 + $0x5b0] sm:$0xff] %vm465_vm0, %v925_v28  ;;  %v590_v44 = vld [vmem:[#allocation2 + $0xa6] sm:$0xff]  ;;  %v591_v62 = vld [vmem:[#allocation2 + $0xae] sm:$0xff]  ;;  %v2240_v0 = vadd.f32 %v2208_v25, %v2140_v40  ;;  %v2880_v15 = vmax.f32 %v2848_v29, 0.0  ;;  %v2241_v32 = vadd.f32 %v4903_v56, %v4899_v14  ;;  %v5008_v14 = vmul.f32 %v4776_v23, %v4597_v18 }
  0xa2   : > { %967 = vst.msk [vmem:[#allocation3 + $0x5b8] sm:$0xff] %vm465_vm0, %v926_v45  ;;  %970 = vst.msk [vmem:[#allocation3 + $0x5d0] sm:$0xff] %vm465_vm0, %v929_v21  ;;  %v747_v30 = vld [vmem:[#allocation2 + $0x68] sm:$0xff]  ;;  %v748_v3 = vld [vmem:[#allocation2 + $0x70] sm:$0xff]  ;;  %v2881_v36 = vmax.f32 %v2849_v13, 0.0  ;;  %v5012_v56 = vmul.f32 %v4778_v26, %v4597_v18 }
  0xa3   : > { %971 = vst.msk [vmem:[#allocation3 + $0x5d8] sm:$0xff] %vm465_vm0, %v930_v42  ;;  %626 = vst.msk [vmem:[#allocation3 + $0x30] sm:$0xff] %vm465_vm0, %v586_v22  ;;  %v1986_v4 = vld [vmem:[#allocation3 + $0x90] sm:$0xff]  ;;  %v1987_v8 = vld [vmem:[#allocation3 + $0x98] sm:$0xff] }
  0xa4   : > { %627 = vst.msk [vmem:[#allocation3 + $0x38] sm:$0xff] %vm465_vm0, %v587_v63  ;;  %630 = vst.msk [vmem:[#allocation3 + $0x50] sm:$0xff] %vm465_vm0, %v590_v44  ;;  %v4911_v17 = vld [vmem:[#allocation3 + $0xb0] sm:$0xff]  ;;  %v2022_v52 = vmul.f32 %v4555_v48, %v1986_v4  ;;  %v2023_v6 = vmul.f32 %v4555_v48, %v1987_v8  ;;  %v4926_v24 = vld [vmem:[#allocation3 + $0xb8] sm:$0xff]  ;;  %v2928_v2 = vpack.c.bf16 %v2881_v36, %v2880_v15 }
  0xa5   : > { %631 = vst.msk [vmem:[#allocation3 + $0x58] sm:$0xff] %vm465_vm0, %v591_v62  ;;  %788 = vst.msk [vmem:[#allocation3 + $0x2b0] sm:$0xff] %vm465_vm0, %v747_v30  ;;  %v2323_v34 = vmul.f32 %v4558_v49, %v4911_v17  ;;  %v4930_v31 = vld [vmem:[#allocation3 + $0xd0] sm:$0xff]  ;;  %v4932_v38 = vld [vmem:[#allocation3 + $0xd8] sm:$0xff]  ;;  %v2324_v58 = vmul.f32 %v4558_v49, %v4926_v24 }
  0xa6   : > { %789 = vst.msk [vmem:[#allocation3 + $0x2b8] sm:$0xff] %vm465_vm0, %v748_v3  ;;  %v4934_v7 = vld [vmem:[#allocation3 + $0x330] sm:$0xff]  ;;  %v2087_v12 = vld [vmem:[#allocation3 + $0x318] sm:$0xff]  ;;  %v4940_v28 = vmul.f32 %v4573_v53, %v4930_v31  ;;  %v4950_v21 = vmul.f32 %v4573_v53, %v4932_v38  ;;  %v2969_v8 = vsel %vm465_vm0, %v2928_v2, 0 }
  0xa7   : > { %v2086_v1 = vld [vmem:[#allocation3 + $0x310] sm:$0xff]  ;;  %v4942_v35 = vld [vmem:[#allocation3 + $0x338] sm:$0xff]  ;;  %v2123_v41 = vmul.f32 %v4582_v59, %v2087_v12  ;;  %v2391_v45 = vmul.f32 %v4585_v60, %v4934_v7  ;;  %3743 = vmatpush3.bf16.xpose.msra.mxu0 %v2969_v8  ;;  %v5004_v8 = vmul.f32 %v4758_v46, %v4585_v60 }
  0xa8   : > { %v2122_v57 = vmul.f32 %v4582_v59, %v2086_v1  ;;  %v4952_v42 = vld [vmem:[#allocation3 + $0x350] sm:$0xff]  ;;  %v4954_v54 = vld [vmem:[#allocation3 + $0x358] sm:$0xff]  ;;  %v2392_v10 = vmul.f32 %v4585_v60, %v4942_v35 }
  0xa9   : > { %v2186_v25 = vld [vmem:[#allocation3 + $0x590] sm:$0xff]  ;;  %v2187_v11 = vld [vmem:[#allocation3 + $0x598] sm:$0xff]  ;;  %v4962_v63 = vmul.f32 %v4600_v19, %v4952_v42  ;;  %v4966_v44 = vmul.f32 %v4600_v19, %v4954_v54  ;;  %v2155_v30 = vadd.f32 %v2123_v41, %v2023_v6  ;;  %v751_v6 = vld [vmem:[#allocation2 + $0xa8] sm:$0xff] }
  0xaa   : > { %v4958_v22 = vld [vmem:[#allocation3 + $0x5b0] sm:$0xff]  ;;  %v2154_v62 = vadd.f32 %v2122_v57, %v2022_v52  ;;  %v2222_v3 = vmul.f32 %v4594_v16, %v2186_v25  ;;  %v2223_v40 = vmul.f32 %v4594_v16, %v2187_v11  ;;  %v4970_v29 = vld [vmem:[#allocation3 + $0x5b8] sm:$0xff]  ;;  %792 = vst.msk [vmem:[#allocation3 + $0x2d0] sm:$0xff] %vm465_vm0, %v751_v6 }
  0xab   : > { %v4972_v13 = vld [vmem:[#allocation3 + $0x5d0] sm:$0xff]  ;;  %v4974_v4 = vld [vmem:[#allocation3 + $0x5d8] sm:$0xff]  ;;  %v2492_v15 = vmul.f32 %v4597_v18, %v4958_v22  ;;  %v2493_v36 = vmul.f32 %v4597_v18, %v4970_v29 }
  0xac   : > { %v4983_v52 = vmul.f32 %v4608_v20, %v4972_v13  ;;  %v752_v1 = vld [vmem:[#allocation2 + $0xb0] sm:$0xff]  ;;  %v2254_v57 = vadd.f32 %v2222_v3, %v2154_v62  ;;  %v2255_v41 = vadd.f32 %v2223_v40, %v2155_v30  ;;  %v4987_v25 = vmul.f32 %v4608_v20, %v4974_v4  ;;  %v2171_v26 = vld [vmem:[#allocation3 + $0x518] sm:$0xff] }
  0xad   : > { %v909_v12 = vld [vmem:[#allocation2 + $0x6a] sm:$0xff]  ;;  %793 = vst.msk [vmem:[#allocation3 + $0x2d8] sm:$0xff] %vm465_vm0, %v752_v1  ;;  %v910_v2 = vld [vmem:[#allocation2 + $0x72] sm:$0xff]  ;;  %v2341_v40 = vadd.f32 %v4907_v43, %v2240_v0 }
  0xae   : > { %v913_v11 = vld [vmem:[#allocation2 + $0xaa] sm:$0xff]  ;;  %v914_v55 = vld [vmem:[#allocation2 + $0xb2] sm:$0xff]  ;;  %950 = vst.msk [vmem:[#allocation3 + $0x530] sm:$0xff] %vm465_vm0, %v909_v12  ;;  %951 = vst.msk [vmem:[#allocation3 + $0x538] sm:$0xff] %vm465_vm0, %v910_v2  ;;  %v2356_v6 = vadd.f32 %v2324_v58, %v2255_v41 }
  0xaf   : > { %954 = vst.msk [vmem:[#allocation3 + $0x550] sm:$0xff] %vm465_vm0, %v913_v11  ;;  %955 = vst.msk [vmem:[#allocation3 + $0x558] sm:$0xff] %vm465_vm0, %v914_v55  ;;  %v4997_v62 = vld [vmem:[#allocation3 + $0x2b0] sm:$0xff]  ;;  %v4999_v30 = vld [vmem:[#allocation3 + $0x2b8] sm:$0xff]  ;;  %v2355_v55 = vadd.f32 %v2323_v34, %v2254_v57 }
  0xb0   : > { %6920 = vst [vmem:[#allocation48_spill] sm:$0xff] %v4997_v62  ;;  %6921 = vst [vmem:[#allocation49_spill] sm:$0xff] %v4999_v30  ;;  %v1970_v3 = vld [vmem:[#allocation3 + $0x10] sm:$0xff]  ;;  %v1971_v1 = vld [vmem:[#allocation3 + $0x18] sm:$0xff]  ;;  %v5017_v43 = vmul.f32 %v4585_v60, %v4997_v62  ;;  %v2376_v34 = vmul.f32 %v4585_v60, %v4999_v30  ;;  %v2424_v57 = vadd.f32 %v2392_v10, %v2356_v6 }
  0xb1   : > { %v2006_v12 = vmul.f32 %v4555_v48, %v1970_v3  ;;  %v2070_v2 = vld [vmem:[#allocation3 + $0x290] sm:$0xff]  ;;  %v2071_v11 = vld [vmem:[#allocation3 + $0x298] sm:$0xff]  ;;  %v2007_v46 = vmul.f32 %v4555_v48, %v1971_v1  ;;  %v2423_v58 = vadd.f32 %v2391_v45, %v2355_v55  ;;  %v2207_v3 = vmul.f32 %v4594_v16, %v2171_v26  ;;  %v608_v45 = vld [vmem:[#allocation2 + $0x1c6] sm:$0xff] }
  0xb2   : > { %v2106_v23 = vmul.f32 %v4582_v59, %v2070_v2  ;;  %v2107_v0 = vmul.f32 %v4582_v59, %v2071_v11  ;;  %v2170_v5 = vld [vmem:[#allocation3 + $0x510] sm:$0xff]  ;;  %v5028_v50 = vld [vmem:[#allocation3 + $0x38] sm:$0xff]  ;;  %v769_v55 = vld [vmem:[#allocation2 + $0x1c8] sm:$0xff]  ;;  %v2525_v6 = vadd.f32 %v2493_v36, %v2424_v57  ;;  %648 = vst.msk [vmem:[#allocation3 + $0xe0] sm:$0xff] %vm465_vm0, %v608_v45  ;;  %v2342_v45 = vadd.f32 %v4918_v9, %v2241_v32 }
  0xb3   : > { %v5022_v51 = vld [vmem:[#allocation3 + $0x30] sm:$0xff]  ;;  %v2206_v41 = vmul.f32 %v4594_v16, %v2170_v5  ;;  %v5032_v2 = vld [vmem:[#allocation3 + $0x58] sm:$0xff]  ;;  %v2308_v30 = vmul.f32 %v4558_v49, %v5028_v50  ;;  %v2524_v5 = vadd.f32 %v2492_v15, %v2423_v58  ;;  %810 = vst.msk [vmem:[#allocation3 + $0x360] sm:$0xff] %vm465_vm0, %v769_v55 }
  0xb4   : > { %v5030_v1 = vld [vmem:[#allocation3 + $0x50] sm:$0xff]  ;;  %v2138_v11 = vadd.f32 %v2106_v23, %v2006_v12  ;;  %v2139_v47 = vadd.f32 %v2107_v0, %v2007_v46  ;;  %v2307_v27 = vmul.f32 %v4558_v49, %v5022_v51  ;;  %v5044_v62 = vmul.f32 %v4573_v53, %v5032_v2  ;;  %v5053_v57 = vld [vmem:[#allocation3 + $0x2d8] sm:$0xff] }
  0xb5   : > { %v609_v10 = vld [vmem:[#allocation2 + $0x1ce] sm:$0xff]  ;;  %v5040_v26 = vmul.f32 %v4573_v53, %v5030_v1 }
  0xb6   : > { %649 = vst.msk [vmem:[#allocation3 + $0xe8] sm:$0xff] %vm465_vm0, %v609_v10  ;;  %v770_v12 = vld [vmem:[#allocation2 + $0x1d0] sm:$0xff]  ;;  %v2238_v0 = vadd.f32 %v2206_v41, %v2138_v11  ;;  %v2239_v15 = vadd.f32 %v2207_v3, %v2139_v47  ;;  %v2409_v41 = vadd.f32 %v4922_v39, %v2341_v40  ;;  %v2625_v47 = vadd.f32 %v4940_v28, %v2524_v5  ;;  %v5062_v11 = vld [vmem:[#allocation3 + $0x538] sm:$0xff]  ;;  %v5080_v40 = vld [vmem:[%s4290_s13 + $0x48] sm:$0xff] }
  0xb7   : > { %v931_v46 = vld [vmem:[#allocation2 + $0x1ca] sm:$0xff]  ;;  %v932_v23 = vld [vmem:[#allocation2 + $0x1d2] sm:$0xff]  ;;  %811 = vst.msk [vmem:[#allocation3 + $0x368] sm:$0xff] %vm465_vm0, %v770_v12  ;;  %v2626_v3 = vadd.f32 %v4950_v21, %v2525_v6  ;;  %v2477_v39 = vmul.f32 %v4597_v18, %v5062_v11  ;;  %v2679_v28 = vmul.f32 %v4600_v19, %v5053_v57  ;;  %v5077_v21 = vld [vmem:[%s4290_s13 + $0x40] sm:$0xff] }
  0xb8   : > { %v5049_v36 = vld [vmem:[#allocation3 + $0x530] sm:$0xff]  ;;  %972 = vst.msk [vmem:[#allocation3 + $0x5e0] sm:$0xff] %vm465_vm0, %v931_v46  ;;  %973 = vst.msk [vmem:[#allocation3 + $0x5e8] sm:$0xff] %vm465_vm0, %v932_v23  ;;  %v5070_v46 = vld [vmem:[#allocation3 + $0x558] sm:$0xff]  ;;  %v2339_v32 = vadd.f32 %v2307_v27, %v2238_v0  ;;  %v2340_v9 = vadd.f32 %v2308_v30, %v2239_v15  ;;  %v2726_v6 = vadd.f32 %v4962_v63, %v2625_v47 }
  0xb9   : > { %v5051_v58 = vld [vmem:[#allocation3 + $0x2d0] sm:$0xff]  ;;  %v2476_v10 = vmul.f32 %v4597_v18, %v5049_v36  ;;  %6922 = vst [vmem:[#allocation50_spill] sm:$0xff] %v5070_v46  ;;  %6923 = vst [vmem:[#allocation51_spill] sm:$0xff] %v5077_v21  ;;  %v2727_v23 = vadd.f32 %v4966_v44, %v2626_v3  ;;  %v2780_v30 = vmul.f32 %v4608_v20, %v5070_v46  ;;  %v5096_v0 = vld [vmem:[%s4290_s13 + $0xd8] sm:$0xff] }
  0xba   : > { %v2678_v55 = vmul.f32 %v4600_v19, %v5051_v58  ;;  %v5068_v12 = vld [vmem:[#allocation3 + $0x550] sm:$0xff]  ;;  %6924 = vst [vmem:[#allocation52_spill] sm:$0xff] %v5080_v40  ;;  %556 = vst.msk [vmem:[#allocation2 + $0xc8] sm:$0xff] %vm465_vm0, %v5077_v21  ;;  %v5104_v44 = vld [vmem:[%s4290_s13 + $0x58] sm:$0xff]  ;;  %v2407_v15 = vadd.f32 %v5017_v43, %v2339_v32  ;;  %v2408_v47 = vadd.f32 %v2376_v34, %v2340_v9 }
  0xbb   : > { %v5083_v5 = vld [vmem:[%s4290_s13 + $0xd0] sm:$0xff]  ;;  %v2779_v27 = vmul.f32 %v4608_v20, %v5068_v12  ;;  %557 = vst.msk [vmem:[#allocation2 + $0xd0] sm:$0xff] %vm465_vm0, %v5080_v40  ;;  %6926 = vst [vmem:[#allocation54_spill] sm:$0xff] %v5096_v0  ;;  %v2410_v3 = vadd.f32 %v5004_v8, %v2342_v45  ;;  %v5109_v46 = vadd.f32 %v5008_v14, %v2409_v41  ;;  %v5121_v40 = vld [vmem:[%s4290_s13 + $0xe8] sm:$0xff] }
  0xbc   : > { %6925 = vst [vmem:[#allocation53_spill] sm:$0xff] %v5083_v5  ;;  %574 = vst.msk [vmem:[#allocation2 + $0x1e8] sm:$0xff] %vm465_vm0, %v5083_v5  ;;  %v5101_v63 = vld [vmem:[%s4290_s13 + $0x50] sm:$0xff]  ;;  %v5118_v5 = vld [vmem:[%s4290_s13 + $0xe0] sm:$0xff]  ;;  %v2827_v43 = vadd.f32 %v4983_v52, %v2726_v6  ;;  %v2828_v8 = vadd.f32 %v4987_v25, %v2727_v23  ;;  %v2026_v14 = vmul.f32 %v4911_v17, %v4555_v48 }
  0xbd   : > { %6927 = vst [vmem:[#allocation55_spill] sm:$0xff] %v5101_v63  ;;  %6928 = vst [vmem:[#allocation56_spill] sm:$0xff] %v5104_v44  ;;  %v2027_v34 = vmul.f32 %v4926_v24, %v4555_v48  ;;  %v2508_v45 = vadd.f32 %v2476_v10, %v2407_v15  ;;  %v2509_v41 = vadd.f32 %v2477_v39, %v2408_v47  ;;  %v5133_v32 = vld [vmem:[#allocation3 + $0xe0] sm:$0xff]  ;;  %v5135_v9 = vld [vmem:[#allocation3 + $0xe8] sm:$0xff] }
  0xbe   : > { %575 = vst.msk [vmem:[#allocation2 + $0x1f0] sm:$0xff] %vm465_vm0, %v5096_v0  ;;  %558 = vst.msk [vmem:[#allocation2 + $0xe8] sm:$0xff] %vm465_vm0, %v5101_v63  ;;  %v5137_v52 = vld [vmem:[#allocation3 + $0x360] sm:$0xff]  ;;  %v5140_v25 = vadd.f32 %v5012_v56, %v2410_v3  ;;  %v2126_v17 = vmul.f32 %v4582_v59, %v4934_v7  ;;  %v2866_v24 = vadd.f32 %v4783_v33, %v2827_v43  ;;  %v5150_v23 = vld [vmem:[#allocation3 + $0x368] sm:$0xff] }
  0xbf   : > { %559 = vst.msk [vmem:[#allocation2 + $0xf0] sm:$0xff] %vm465_vm0, %v5104_v44  ;;  %6929 = vst [vmem:[#allocation57_spill] sm:$0xff] %v5118_v5  ;;  %v2867_v6 = vadd.f32 %v4783_v33, %v2828_v8  ;;  %v2595_v10 = vmul.f32 %v4573_v53, %v5133_v32  ;;  %v2596_v39 = vmul.f32 %v4573_v53, %v5135_v9  ;;  %v5152_v15 = vld [vmem:[#allocation3 + $0x5e0] sm:$0xff]  ;;  %v5154_v47 = vld [vmem:[#allocation3 + $0x5e8] sm:$0xff] }
  0xc0   : > { %6930 = vst [vmem:[#allocation58_spill] sm:$0xff] %v5121_v40  ;;  %576 = vst.msk [vmem:[#allocation2 + $0x208] sm:$0xff] %vm465_vm0, %v5118_v5  ;;  %v2609_v56 = vadd.f32 %v5040_v26, %v2508_v45  ;;  %v2610_v7 = vadd.f32 %v5044_v62, %v2509_v41  ;;  %v2696_v3 = vmul.f32 %v4600_v19, %v5137_v52  ;;  %v2898_v8 = vmax.f32 %v2866_v24, 0.0 }
  0xc1   : > { %577 = vst.msk [vmem:[#allocation2 + $0x210] sm:$0xff] %vm465_vm0, %v5121_v40  ;;  %6931 = vst [vmem:[#allocation59_spill] sm:$0xff] %v5135_v9  ;;  %v2697_v43 = vmul.f32 %v4600_v19, %v5150_v23  ;;  %v2899_v40 = vmax.f32 %v2867_v6, 0.0  ;;  %v2627_v5 = vadd.f32 %v2595_v10, %v4891_v61  ;;  %v2628_v44 = vadd.f32 %v2596_v39, %v4893_v37  ;;  %v592_v26 = vld [vmem:[#allocation2 + $0xc6] sm:$0xff] }
  0xc2   : > { %6932 = vst [vmem:[#allocation60_spill] sm:$0xff] %v5137_v52  ;;  %6933 = vst [vmem:[#allocation61_spill] sm:$0xff] %v5150_v23  ;;  %v2710_v63 = vadd.f32 %v2678_v55, %v2609_v56  ;;  %v2711_v0 = vadd.f32 %v2679_v28, %v2610_v7  ;;  %v2797_v21 = vmul.f32 %v4608_v20, %v5152_v15  ;;  %v593_v45 = vld [vmem:[#allocation2 + $0xce] sm:$0xff] }
  0xc3   : > { %v2798_v62 = vmul.f32 %v4608_v20, %v5154_v47  ;;  %v753_v41 = vld [vmem:[#allocation2 + $0xc8] sm:$0xff]  ;;  %v2937_v52 = vpack.c.bf16 %v2899_v40, %v2898_v8  ;;  %v2728_v9 = vadd.f32 %v2696_v3, %v2627_v5  ;;  %v2729_v23 = vadd.f32 %v2697_v43, %v2628_v44  ;;  %632 = vst.msk [vmem:[#allocation3 + $0x60] sm:$0xff] %vm465_vm0, %v592_v26  ;;  %v754_v61 = vld [vmem:[#allocation2 + $0xd0] sm:$0xff] }
  0xc4   : > { %633 = vst.msk [vmem:[#allocation3 + $0x68] sm:$0xff] %vm465_vm0, %v593_v45  ;;  %794 = vst.msk [vmem:[#allocation3 + $0x2e0] sm:$0xff] %vm465_vm0, %v753_v41  ;;  %v915_v37 = vld [vmem:[#allocation2 + $0xca] sm:$0xff]  ;;  %v916_v55 = vld [vmem:[#allocation2 + $0xd2] sm:$0xff]  ;;  %v2127_v28 = vmul.f32 %v4582_v59, %v4942_v35  ;;  %v2811_v24 = vadd.f32 %v2779_v27, %v2710_v63  ;;  %v2812_v20 = vadd.f32 %v2780_v30, %v2711_v0 }
  0xc5   : > { %795 = vst.msk [vmem:[#allocation3 + $0x2e8] sm:$0xff] %vm465_vm0, %v754_v61  ;;  %956 = vst.msk [vmem:[#allocation3 + $0x560] sm:$0xff] %vm465_vm0, %v915_v37  ;;  %v610_v40 = vld [vmem:[#allocation2 + $0x1e6] sm:$0xff]  ;;  %v611_v5 = vld [vmem:[#allocation2 + $0x1ee] sm:$0xff]  ;;  %v2158_v6 = vadd.f32 %v2126_v17, %v2026_v14  ;;  %v2226_v10 = vmul.f32 %v4958_v22, %v4594_v16  ;;  %3879 = vmatprep.subr.msk.bf16.mxu0 %vm465_vm0, %v2937_v52  ;;  %v2829_v39 = vadd.f32 %v2797_v21, %v2728_v9 }
  0xc6   : > { %957 = vst.msk [vmem:[#allocation3 + $0x568] sm:$0xff] %vm465_vm0, %v916_v55  ;;  %v771_v44 = vld [vmem:[#allocation2 + $0x1e8] sm:$0xff]  ;;  %v2830_v56 = vadd.f32 %v2798_v62, %v2729_v23  ;;  %650 = vst.msk [vmem:[#allocation3 + $0xf0] sm:$0xff] %vm465_vm0, %v610_v40  ;;  %v772_v35 = vld [vmem:[#allocation2 + $0x1f0] sm:$0xff]  ;;  %v2159_v0 = vadd.f32 %v2127_v28, %v2027_v34  ;;  %v2227_v63 = vmul.f32 %v4970_v29, %v4594_v16 }
  0xc7   : > { %651 = vst.msk [vmem:[#allocation3 + $0xf8] sm:$0xff] %vm465_vm0, %v611_v5  ;;  %812 = vst.msk [vmem:[#allocation3 + $0x370] sm:$0xff] %vm465_vm0, %v771_v44  ;;  %v933_v27 = vld [vmem:[#allocation2 + $0x1ea] sm:$0xff]  ;;  %v934_v30 = vld [vmem:[#allocation2 + $0x1f2] sm:$0xff]  ;;  %v2850_v14 = vadd.f32 %v4783_v33, %v2811_v24  ;;  %v2851_v22 = vadd.f32 %v4783_v33, %v2812_v20  ;;  %v2258_v21 = vadd.f32 %v2226_v10, %v2158_v6 }
  0xc8   : > { %813 = vst.msk [vmem:[#allocation3 + $0x378] sm:$0xff] %vm465_vm0, %v772_v35  ;;  %974 = vst.msk [vmem:[#allocation3 + $0x5f0] sm:$0xff] %vm465_vm0, %v933_v27  ;;  %v2327_v9 = vmul.f32 %v4930_v31, %v4558_v49  ;;  %v594_v52 = vld [vmem:[#allocation2 + $0xe6] sm:$0xff]  ;;  %v595_v17 = vld [vmem:[#allocation2 + $0xee] sm:$0xff]  ;;  %v2868_v23 = vadd.f32 %v4783_v33, %v2829_v39  ;;  %v2869_v29 = vadd.f32 %v4783_v33, %v2830_v56 }
  0xc9   : > { %975 = vst.msk [vmem:[#allocation3 + $0x5f8] sm:$0xff] %vm465_vm0, %v934_v30  ;;  %v755_v34 = vld [vmem:[#allocation2 + $0xe8] sm:$0xff]  ;;  %v2259_v7 = vadd.f32 %v2227_v63, %v2159_v0  ;;  %v2328_v3 = vmul.f32 %v4932_v38, %v4558_v49  ;;  %634 = vst.msk [vmem:[#allocation3 + $0x70] sm:$0xff] %vm465_vm0, %v594_v52  ;;  %v756_v43 = vld [vmem:[#allocation2 + $0xf0] sm:$0xff]  ;;  %v2882_v62 = vmax.f32 %v2850_v14, 0.0  ;;  %v2883_v26 = vmax.f32 %v2851_v22, 0.0 }
  0xca   : > { %635 = vst.msk [vmem:[#allocation3 + $0x78] sm:$0xff] %vm465_vm0, %v595_v17  ;;  %796 = vst.msk [vmem:[#allocation3 + $0x2f0] sm:$0xff] %vm465_vm0, %v755_v34  ;;  %v917_v8 = vld [vmem:[#allocation2 + $0xea] sm:$0xff]  ;;  %v918_v31 = vld [vmem:[#allocation2 + $0xf2] sm:$0xff]  ;;  %v2359_v45 = vadd.f32 %v2327_v9, %v2258_v21  ;;  %v2395_v41 = vmul.f32 %v4952_v42, %v4585_v60  ;;  %v2900_v55 = vmax.f32 %v2868_v23, 0.0  ;;  %v2901_v28 = vmax.f32 %v2869_v29, 0.0 }
  0xcb   : > { %797 = vst.msk [vmem:[#allocation3 + $0x2f8] sm:$0xff] %vm465_vm0, %v756_v43  ;;  %958 = vst.msk [vmem:[#allocation3 + $0x570] sm:$0xff] %vm465_vm0, %v917_v8  ;;  %v612_v38 = vld [vmem:[#allocation2 + $0x206] sm:$0xff]  ;;  %v613_v61 = vld [vmem:[#allocation2 + $0x20e] sm:$0xff]  ;;  %v2360_v24 = vadd.f32 %v2328_v3, %v2259_v7  ;;  %v2396_v20 = vmul.f32 %v4954_v54, %v4585_v60  ;;  %v2929_v44 = vpack.c.bf16 %v2883_v26, %v2882_v62 }
  0xcc   : > { %959 = vst.msk [vmem:[#allocation3 + $0x578] sm:$0xff] %vm465_vm0, %v918_v31  ;;  %v773_v37 = vld [vmem:[#allocation2 + $0x208] sm:$0xff]  ;;  %652 = vst.msk [vmem:[#allocation3 + $0x100] sm:$0xff] %vm465_vm0, %v612_v38  ;;  %v774_v42 = vld [vmem:[#allocation2 + $0x210] sm:$0xff]  ;;  %v2427_v56 = vadd.f32 %v2395_v41, %v2359_v45  ;;  %v2496_v54 = vmul.f32 %v4972_v13, %v4597_v18  ;;  %v2497_v35 = vmul.f32 %v4974_v4, %v4597_v18 }
  0xcd   : > { %653 = vst.msk [vmem:[#allocation3 + $0x108] sm:$0xff] %vm465_vm0, %v613_v61  ;;  %814 = vst.msk [vmem:[#allocation3 + $0x380] sm:$0xff] %vm465_vm0, %v773_v37  ;;  %v935_v40 = vld [vmem:[#allocation2 + $0x20a] sm:$0xff]  ;;  %v936_v5 = vld [vmem:[#allocation2 + $0x212] sm:$0xff]  ;;  %v2938_v27 = vpack.c.bf16 %v2901_v28, %v2900_v55  ;;  %v2972_v22 = vsel %vm465_vm0, %v2929_v44, 0  ;;  %v2428_v43 = vadd.f32 %v2396_v20, %v2360_v24  ;;  %v2010_v20 = vmul.f32 %v5022_v51, %v4555_v48 }
  0xce   : > { %v5208_v6 = vld [vmem:[#allocation3 + $0x60] sm:$0xff]  ;;  %v5210_v10 = vld [vmem:[#allocation3 + $0x68] sm:$0xff]  ;;  %815 = vst.msk [vmem:[#allocation3 + $0x388] sm:$0xff] %vm465_vm0, %v774_v42  ;;  %976 = vst.msk [vmem:[#allocation3 + $0x600] sm:$0xff] %vm465_vm0, %v935_v40  ;;  %3745 = vmatpush3.bf16.xpose.msra.mxu0 %v2972_v22  ;;  %v2528_v8 = vadd.f32 %v2496_v54, %v2427_v56  ;;  %v2011_v42 = vmul.f32 %v5028_v50, %v4555_v48  ;;  %v2211_v51 = vmul.f32 %v5062_v11, %v4594_v16 }
  0xcf   : > { %v5212_v39 = vld [vmem:[#allocation3 + $0x2e0] sm:$0xff]  ;;  %977 = vst.msk [vmem:[#allocation3 + $0x608] sm:$0xff] %vm465_vm0, %v936_v5  ;;  %v2579_v30 = vmul.f32 %v4573_v53, %v5208_v6  ;;  %v2580_v0 = vmul.f32 %v4573_v53, %v5210_v10  ;;  %v5225_v63 = vld [vmem:[#allocation3 + $0x2e8] sm:$0xff]  ;;  %v5245_v34 = vld [vmem:[#allocation3 + $0xf0] sm:$0xff]  ;;  %3880 = vmatprep.subr.msk.bf16.mxu0 %vm465_vm0, %v2938_v27  ;;  %v2529_v37 = vadd.f32 %v2497_v35, %v2428_v43 }
  0xd0   : > { %v2680_v13 = vmul.f32 %v4600_v19, %v5212_v39  ;;  %v5229_v14 = vld [vmem:[#allocation3 + $0x560] sm:$0xff]  ;;  %v5231_v4 = vld [vmem:[#allocation3 + $0x568] sm:$0xff]  ;;  %v2681_v21 = vmul.f32 %v4600_v19, %v5225_v63  ;;  %v5247_v23 = vld [vmem:[#allocation3 + $0xf8] sm:$0xff]  ;;  %v2597_v45 = vmul.f32 %v4573_v53, %v5245_v34 }
  0xd1   : > { %v5239_v9 = vld [vmem:[%s6801_s3 + $0x8] ss:$0 sm:$0xff]  ;;  %v5249_v29 = vld [vmem:[#allocation3 + $0x370] sm:$0xff]  ;;  %v2611_v7 = vadd.f32 %v2579_v30, %v5109_v46  ;;  %v2612_v3 = vadd.f32 %v2580_v0, %v5140_v25  ;;  %v5253_v31 = vld [vmem:[#allocation3 + $0x378] sm:$0xff]  ;;  %v2598_v41 = vmul.f32 %v4573_v53, %v5247_v23  ;;  %v2210_v0 = vmul.f32 %v5049_v36, %v4594_v16 }
  0xd2   : > { %v2781_v52 = vmul.f32 %v5239_v9, %v5229_v14  ;;  %v2782_v17 = vmul.f32 %v5239_v9, %v5231_v4  ;;  %v5255_v62 = vld [vmem:[#allocation3 + $0x5f0] sm:$0xff]  ;;  %v5257_v26 = vld [vmem:[#allocation3 + $0x5f8] sm:$0xff]  ;;  %v2698_v46 = vmul.f32 %v4600_v19, %v5249_v29  ;;  %v2699_v25 = vmul.f32 %v4600_v19, %v5253_v31  ;;  %v6935_v27 = vld [vmem:[#allocation49_spill] sm:$0xff] }
  0xd3   : > { %v2712_v38 = vadd.f32 %v2680_v13, %v2611_v7  ;;  %v2713_v61 = vadd.f32 %v2681_v21, %v2612_v3  ;;  %v2799_v55 = vmul.f32 %v5239_v9, %v5255_v62  ;;  %v2629_v28 = vadd.f32 %v2597_v45, %v2528_v8  ;;  %v6934_v56 = vld [vmem:[#allocation48_spill] sm:$0xff]  ;;  %v5291_v43 = vld [vmem:[%s4290_s13 + $0xf0] sm:$0xff] }
  0xd4   : > { %v2800_v24 = vmul.f32 %v5239_v9, %v5257_v26  ;;  %v2630_v44 = vadd.f32 %v2598_v41, %v2529_v37  ;;  %v2110_v54 = vmul.f32 %v4582_v59, %v6934_v56  ;;  %v2111_v30 = vmul.f32 %v4582_v59, %v6935_v27  ;;  %6936 = vst [vmem:[#allocation48_spill] sm:$0xff] %v5291_v43  ;;  %v5293_v41 = vld [vmem:[#allocation3 + $0x70] sm:$0xff] }
  0xd5   : > { %v2813_v40 = vadd.f32 %v2781_v52, %v2712_v38  ;;  %v2814_v5 = vadd.f32 %v2782_v17, %v2713_v61  ;;  %v2730_v35 = vadd.f32 %v2698_v46, %v2629_v28  ;;  %v2311_v7 = vmul.f32 %v5030_v1, %v4558_v49  ;;  %v5296_v46 = vld [vmem:[%s4290_s13 + $0xf8] sm:$0xff]  ;;  %578 = vst.msk [vmem:[#allocation2 + $0x228] sm:$0xff] %vm465_vm0, %v5291_v43 }
  0xd6   : > { %v2731_v22 = vadd.f32 %v2699_v25, %v2630_v44  ;;  %v2142_v21 = vadd.f32 %v2110_v54, %v2010_v20  ;;  %v2143_v17 = vadd.f32 %v2111_v30, %v2011_v42  ;;  %v2312_v3 = vmul.f32 %v5032_v2, %v4558_v49  ;;  %6937 = vst [vmem:[#allocation49_spill] sm:$0xff] %v5296_v46  ;;  %v5305_v61 = vld [vmem:[#allocation3 + $0x78] sm:$0xff]  ;;  %v5312_v20 = vld [vmem:[#allocation3 + $0x2f0] sm:$0xff] }
  0xd7   : > { %v2852_v50 = vadd.f32 %v4783_v33, %v2813_v40  ;;  %v2853_v13 = vadd.f32 %v4783_v33, %v2814_v5  ;;  %v2831_v52 = vadd.f32 %v2799_v55, %v2730_v35  ;;  %v2379_v1 = vmul.f32 %v5051_v58, %v4585_v60  ;;  %579 = vst.msk [vmem:[#allocation2 + $0x230] sm:$0xff] %vm465_vm0, %v5296_v46  ;;  %v5314_v42 = vld [vmem:[#allocation3 + $0x2f8] sm:$0xff]  ;;  %v5316_v58 = vld [vmem:[#allocation3 + $0x570] sm:$0xff]  ;;  %v6938_v5 = vld [vmem:[#allocation50_spill] sm:$0xff] }
  0xd8   : > { %v2832_v45 = vadd.f32 %v2800_v24, %v2731_v22  ;;  %v2242_v11 = vadd.f32 %v2210_v0, %v2142_v21  ;;  %v2243_v38 = vadd.f32 %v2211_v51, %v2143_v17  ;;  %v2380_v2 = vmul.f32 %v5053_v57, %v4585_v60  ;;  %v5322_v54 = vld [vmem:[#allocation3 + $0x578] sm:$0xff]  ;;  %v1993_v0 = vld [vmem:[#allocation3 + $0xc8] sm:$0xff]  ;;  %v2092_v51 = vld [vmem:[#allocation3 + $0x340] sm:$0xff] }
  0xd9   : > { %v2884_v36 = vmax.f32 %v2852_v50, 0.0  ;;  %v2885_v8 = vmax.f32 %v2853_v13, 0.0  ;;  %v2870_v25 = vadd.f32 %v4783_v33, %v2831_v52  ;;  %v2480_v24 = vmul.f32 %v5068_v12, %v4597_v18  ;;  %v2093_v50 = vld [vmem:[#allocation3 + $0x348] sm:$0xff]  ;;  %v2192_v17 = vld [vmem:[#allocation3 + $0x5c0] sm:$0xff] }
  0xda   : > { %v2871_v55 = vadd.f32 %v4783_v33, %v2832_v45  ;;  %v2343_v28 = vadd.f32 %v2311_v7, %v2242_v11  ;;  %v2344_v57 = vadd.f32 %v2312_v3, %v2243_v38  ;;  %v2481_v44 = vmul.f32 %v6938_v5, %v4597_v18  ;;  %v1992_v33 = vld [vmem:[#allocation3 + $0xc0] sm:$0xff]  ;;  %v2193_v7 = vld [vmem:[#allocation3 + $0x5c8] sm:$0xff] }
  0xdb   : > { %v2930_v37 = vpack.c.bf16 %v2885_v8, %v2884_v36  ;;  %v2902_v40 = vmax.f32 %v2870_v25, 0.0  ;;  %v2581_v56 = vmul.f32 %v4573_v53, %v5293_v41  ;;  %v2582_v30 = vmul.f32 %v4573_v53, %v5305_v61  ;;  %v616_v11 = vld [vmem:[#allocation2 + $0x246] sm:$0xff]  ;;  %v617_v25 = vld [vmem:[#allocation2 + $0x24e] sm:$0xff] }
  0xdc   : > { %v2903_v12 = vmax.f32 %v2871_v55, 0.0  ;;  %v2411_v27 = vadd.f32 %v2379_v1, %v2343_v28  ;;  %v2412_v13 = vadd.f32 %v2380_v2, %v2344_v57  ;;  %v2682_v22 = vmul.f32 %v4600_v19, %v5312_v20  ;;  %v5339_v55 = vld [vmem:[#allocation3 + $0x100] sm:$0xff]  ;;  %v5341_v28 = vld [vmem:[#allocation3 + $0x108] sm:$0xff]  ;;  %656 = vst.msk [vmem:[#allocation3 + $0x120] sm:$0xff] %vm465_vm0, %v616_v11  ;;  %657 = vst.msk [vmem:[#allocation3 + $0x128] sm:$0xff] %vm465_vm0, %v617_v25 }
  0xdd   : > { %v2975_v35 = vsel %vm465_vm0, %v2930_v37, 0  ;;  %v2683_v21 = vmul.f32 %v4600_v19, %v5314_v42  ;;  %v2783_v52 = vmul.f32 %v5239_v9, %v5316_v58  ;;  %v2784_v8 = vmul.f32 %v5239_v9, %v5322_v54  ;;  %v775_v57 = vld [vmem:[#allocation2 + $0x228] sm:$0xff]  ;;  %v6941_v25 = vld [vmem:[#allocation60_spill] sm:$0xff] }
  0xde   : > { %3747 = vmatpush3.bf16.xpose.msra.mxu0 %v2975_v35  ;;  %v2939_v3 = vpack.c.bf16 %v2903_v12, %v2902_v40  ;;  %v2512_v36 = vadd.f32 %v2480_v24, %v2411_v27  ;;  %v2028_v45 = vmul.f32 %v4555_v48, %v1992_v33  ;;  %v2513_v38 = vadd.f32 %v2481_v44, %v2412_v13  ;;  %v5343_v40 = vld [vmem:[#allocation3 + $0x380] sm:$0xff]  ;;  %v777_v5 = vld [vmem:[#allocation2 + $0x248] sm:$0xff] }
  0xdf   : > { %v2029_v1 = vmul.f32 %v4555_v48, %v1993_v0  ;;  %v2128_v2 = vmul.f32 %v4582_v59, %v2092_v51  ;;  %v2129_v37 = vmul.f32 %v4582_v59, %v2093_v50  ;;  %6939 = vst [vmem:[#allocation50_spill] sm:$0xff] %v5343_v40  ;;  %v614_v24 = vld [vmem:[#allocation2 + $0x226] sm:$0xff]  ;;  %v2228_v33 = vmul.f32 %v4594_v16, %v2192_v17  ;;  %v615_v27 = vld [vmem:[#allocation2 + $0x22e] sm:$0xff] }
  0xe0   : > { %3881 = vmatprep.subr.msk.bf16.mxu0 %vm465_vm0, %v2939_v3  ;;  %v2613_v44 = vadd.f32 %v2581_v56, %v2512_v36  ;;  %v2229_v35 = vmul.f32 %v4594_v16, %v2193_v7  ;;  %v2329_v12 = vmul.f32 %v5133_v32, %v4558_v49  ;;  %654 = vst.msk [vmem:[#allocation3 + $0x110] sm:$0xff] %vm465_vm0, %v614_v24  ;;  %v776_v0 = vld [vmem:[#allocation2 + $0x230] sm:$0xff]  ;;  %816 = vst.msk [vmem:[#allocation3 + $0x390] sm:$0xff] %vm465_vm0, %v775_v57 }
  0xe1   : > { %v937_v51 = vld [vmem:[#allocation2 + $0x22a] sm:$0xff]  ;;  %818 = vst.msk [vmem:[#allocation3 + $0x3a0] sm:$0xff] %vm465_vm0, %v777_v5  ;;  %v2614_v50 = vadd.f32 %v2582_v30, %v2513_v38  ;;  %v2160_v13 = vadd.f32 %v2128_v2, %v2028_v45  ;;  %v2161_v3 = vadd.f32 %v2129_v37, %v2029_v1  ;;  %655 = vst.msk [vmem:[#allocation3 + $0x118] sm:$0xff] %vm465_vm0, %v615_v27  ;;  %v938_v32 = vld [vmem:[#allocation2 + $0x232] sm:$0xff] }
  0xe2   : > { %v6940_v56 = vld [vmem:[#allocation59_spill] sm:$0xff]  ;;  %817 = vst.msk [vmem:[#allocation3 + $0x398] sm:$0xff] %vm465_vm0, %v776_v0  ;;  %978 = vst.msk [vmem:[#allocation3 + $0x610] sm:$0xff] %vm465_vm0, %v937_v51  ;;  %v2714_v11 = vadd.f32 %v2682_v22, %v2613_v44  ;;  %v2397_v24 = vmul.f32 %v6941_v25, %v4585_v60  ;;  %v6942_v30 = vld [vmem:[#allocation61_spill] sm:$0xff]  ;;  %v2498_v38 = vmul.f32 %v5152_v15, %v4597_v18 }
  0xe3   : > { %v2330_v17 = vmul.f32 %v6940_v56, %v4558_v49  ;;  %v778_v7 = vld [vmem:[#allocation2 + $0x250] sm:$0xff]  ;;  %v2398_v45 = vmul.f32 %v6942_v30, %v4585_v60  ;;  %v5366_v1 = vld [vmem:[#allocation3 + $0x388] sm:$0xff]  ;;  %979 = vst.msk [vmem:[#allocation3 + $0x618] sm:$0xff] %vm465_vm0, %v938_v32  ;;  %v2715_v37 = vadd.f32 %v2683_v21, %v2614_v50  ;;  %v2260_v22 = vadd.f32 %v2228_v33, %v2160_v13  ;;  %v5373_v44 = vld [vmem:[#allocation3 + $0x600] sm:$0xff] }
  0xe4   : > { %v939_v36 = vld [vmem:[#allocation2 + $0x24a] sm:$0xff]  ;;  %6943 = vst [vmem:[#allocation59_spill] sm:$0xff] %v5366_v1  ;;  %819 = vst.msk [vmem:[#allocation3 + $0x3a8] sm:$0xff] %vm465_vm0, %v778_v7  ;;  %v940_v2 = vld [vmem:[#allocation2 + $0x252] sm:$0xff]  ;;  %v2261_v57 = vadd.f32 %v2229_v35, %v2161_v3  ;;  %v2499_v5 = vmul.f32 %v5154_v47, %v4597_v18  ;;  %v2815_v0 = vadd.f32 %v2783_v52, %v2714_v11 }
  0xe5   : > { %980 = vst.msk [vmem:[#allocation3 + $0x620] sm:$0xff] %vm465_vm0, %v939_v36  ;;  %6944 = vst [vmem:[#allocation60_spill] sm:$0xff] %v5373_v44  ;;  %v5375_v27 = vld [vmem:[#allocation3 + $0x608] sm:$0xff]  ;;  %v1976_v15 = vld [vmem:[#allocation3 + $0x40] sm:$0xff]  ;;  %v2599_v51 = vmul.f32 %v4573_v53, %v5339_v55  ;;  %v2600_v56 = vmul.f32 %v4573_v53, %v5341_v28  ;;  %v2700_v21 = vmul.f32 %v4600_v19, %v5343_v40 }
  0xe6   : > { %6945 = vst [vmem:[#allocation61_spill] sm:$0xff] %v5375_v27  ;;  %981 = vst.msk [vmem:[#allocation3 + $0x628] sm:$0xff] %vm465_vm0, %v940_v2  ;;  %v1977_v33 = vld [vmem:[#allocation3 + $0x48] sm:$0xff]  ;;  %v2816_v35 = vadd.f32 %v2784_v8, %v2715_v37  ;;  %v2361_v47 = vadd.f32 %v2329_v12, %v2260_v22  ;;  %v2362_v50 = vadd.f32 %v2330_v17, %v2261_v57  ;;  %v2076_v3 = vld [vmem:[#allocation3 + $0x2c0] sm:$0xff] }
  0xe7   : > { %v2701_v13 = vmul.f32 %v4600_v19, %v5366_v1  ;;  %v2077_v32 = vld [vmem:[#allocation3 + $0x2c8] sm:$0xff]  ;;  %v2176_v7 = vld [vmem:[#allocation3 + $0x540] sm:$0xff]  ;;  %v2801_v11 = vmul.f32 %v5239_v9, %v5373_v44  ;;  %v2802_v8 = vmul.f32 %v5239_v9, %v5375_v27  ;;  %v2012_v12 = vmul.f32 %v4555_v48, %v1976_v15 }
  0xe8   : > { %v5389_v52 = vld [vmem:[%s6802_s4] ss:$0 sm:$0xff]  ;;  %v2177_v17 = vld [vmem:[#allocation3 + $0x548] sm:$0xff]  ;;  %v2429_v30 = vadd.f32 %v2397_v24, %v2361_v47  ;;  %v2430_v2 = vadd.f32 %v2398_v45, %v2362_v50  ;;  %v2013_v37 = vmul.f32 %v4555_v48, %v1977_v33  ;;  %v2112_v57 = vmul.f32 %v4582_v59, %v2076_v3 }
  0xe9   : > { %v2854_v36 = vadd.f32 %v5389_v52, %v2815_v0  ;;  %v2855_v25 = vadd.f32 %v5389_v52, %v2816_v35  ;;  %v2113_v0 = vmul.f32 %v4582_v59, %v2077_v32  ;;  %v2212_v46 = vmul.f32 %v4594_v16, %v2176_v7  ;;  %v5403_v15 = vld [vmem:[#allocation3 + $0x80] sm:$0xff]  ;;  %v5405_v40 = vld [vmem:[#allocation3 + $0x88] sm:$0xff] }
  0xea   : > { %v2530_v44 = vadd.f32 %v2498_v38, %v2429_v30  ;;  %v2531_v1 = vadd.f32 %v2499_v5, %v2430_v2  ;;  %v2213_v27 = vmul.f32 %v4594_v16, %v2177_v17  ;;  %v2144_v24 = vadd.f32 %v2112_v57, %v2012_v12  ;;  %v5411_v47 = vld [vmem:[#allocation3 + $0x300] sm:$0xff]  ;;  %v5413_v50 = vld [vmem:[#allocation3 + $0x308] sm:$0xff] }
  0xeb   : > { %v2886_v22 = vmax.f32 %v2854_v36, 0.0  ;;  %v2887_v43 = vmax.f32 %v2855_v25, 0.0  ;;  %v2145_v45 = vadd.f32 %v2113_v0, %v2013_v37  ;;  %v2313_v33 = vmul.f32 %v5208_v6, %v4558_v49  ;;  %6946 = vst [vmem:[#allocation62_spill] sm:$0xff] %v5413_v50  ;;  %v618_v38 = vld [vmem:[#allocation2 + $0x266] sm:$0xff]  ;;  %v619_v5 = vld [vmem:[#allocation2 + $0x26e] sm:$0xff] }
  0xec   : > { %v2314_v35 = vmul.f32 %v5210_v10, %v4558_v49  ;;  %v2631_v32 = vadd.f32 %v2599_v51, %v2530_v44  ;;  %v2632_v7 = vadd.f32 %v2600_v56, %v2531_v1  ;;  %v2381_v36 = vmul.f32 %v5212_v39, %v4585_v60  ;;  %v5417_v12 = vld [vmem:[#allocation3 + $0x580] sm:$0xff]  ;;  %658 = vst.msk [vmem:[#allocation3 + $0x130] sm:$0xff] %vm465_vm0, %v618_v38  ;;  %v779_v17 = vld [vmem:[#allocation2 + $0x268] sm:$0xff]  ;;  %v780_v44 = vld [vmem:[#allocation2 + $0x270] sm:$0xff] }
  0xed   : > { %v2931_v3 = vpack.c.bf16 %v2887_v43, %v2886_v22  ;;  %6947 = vst [vmem:[#allocation63_spill] sm:$0xff] %v5417_v12  ;;  %659 = vst.msk [vmem:[#allocation3 + $0x138] sm:$0xff] %vm465_vm0, %v619_v5  ;;  %v2244_v25 = vadd.f32 %v2212_v46, %v2144_v24  ;;  %v2245_v30 = vadd.f32 %v2213_v27, %v2145_v45  ;;  %v5429_v22 = vld [vmem:[#allocation3 + $0x588] sm:$0xff]  ;;  %v942_v27 = vld [vmem:[#allocation2 + $0x272] sm:$0xff] }
  0xee   : > { %v2382_v2 = vmul.f32 %v5225_v63, %v4585_v60  ;;  %v2482_v43 = vmul.f32 %v5229_v14, %v4597_v18  ;;  %820 = vst.msk [vmem:[#allocation3 + $0x3b0] sm:$0xff] %vm465_vm0, %v779_v17  ;;  %v2732_v51 = vadd.f32 %v2700_v21, %v2631_v32  ;;  %v2733_v56 = vadd.f32 %v2701_v13, %v2632_v7  ;;  %v941_v46 = vld [vmem:[#allocation2 + $0x26a] sm:$0xff]  ;;  %v1995_v13 = vld [vmem:[#allocation3 + $0xd8] sm:$0xff] }
  0xef   : > { %v2978_v1 = vsel %vm465_vm0, %v2931_v3, 0  ;;  %v2483_v37 = vmul.f32 %v5231_v4, %v4597_v18  ;;  %6948 = vst [vmem:[#allocation64_spill] sm:$0xff] %v5429_v22  ;;  %821 = vst.msk [vmem:[#allocation3 + $0x3b8] sm:$0xff] %vm465_vm0, %v780_v44  ;;  %v2345_v57 = vadd.f32 %v2313_v33, %v2244_v25  ;;  %v2346_v0 = vadd.f32 %v2314_v35, %v2245_v30  ;;  %v1994_v21 = vld [vmem:[#allocation3 + $0xd0] sm:$0xff]  ;;  %v2095_v32 = vld [vmem:[#allocation3 + $0x358] sm:$0xff] }
  0xf0   : > { %3749 = vmatpush3.bf16.xpose.msra.mxu0 %v2978_v1  ;;  %v2583_v24 = vmul.f32 %v4573_v53, %v5403_v15  ;;  %v2584_v45 = vmul.f32 %v4573_v53, %v5405_v40  ;;  %982 = vst.msk [vmem:[#allocation3 + $0x630] sm:$0xff] %vm465_vm0, %v941_v46  ;;  %983 = vst.msk [vmem:[#allocation3 + $0x638] sm:$0xff] %vm465_vm0, %v942_v27  ;;  %v2833_v38 = vadd.f32 %v2801_v11, %v2732_v51  ;;  %v2094_v35 = vld [vmem:[#allocation3 + $0x350] sm:$0xff]  ;;  %v2195_v1 = vld [vmem:[#allocation3 + $0x5d8] sm:$0xff] }
  0xf1   : > { %v2834_v5 = vadd.f32 %v2802_v8, %v2733_v56  ;;  %v2684_v3 = vmul.f32 %v4600_v19, %v5411_v47  ;;  %v2685_v33 = vmul.f32 %v4600_v19, %v5413_v50  ;;  %v2413_v7 = vadd.f32 %v2381_v36, %v2345_v57  ;;  %v2194_v44 = vld [vmem:[#allocation3 + $0x5d0] sm:$0xff] }
  0xf2   : > { %v2414_v17 = vadd.f32 %v2382_v2, %v2346_v0  ;;  %v2785_v25 = vmul.f32 %v5239_v9, %v5417_v12  ;;  %v2786_v30 = vmul.f32 %v5239_v9, %v5429_v22  ;;  %v2872_v11 = vadd.f32 %v5389_v52, %v2833_v38  ;;  %v5454_v50 = vld [vmem:[#allocation3 + $0x110] sm:$0xff]  ;;  %v678_v38 = vld [vmem:[#allocation2 + $0x127] sm:$0xff] }
  0xf3   : > { %v2873_v8 = vadd.f32 %v5389_v52, %v2834_v5  ;;  %v2030_v51 = vmul.f32 %v4555_v48, %v1994_v21  ;;  %v2031_v56 = vmul.f32 %v4555_v48, %v1995_v13  ;;  %v2514_v46 = vadd.f32 %v2482_v43, %v2413_v7  ;;  %v3948_v21 = vld [vmem:[%s6804_s6] sm:$0xff]   ;;  %v679_v7 = vld [vmem:[#allocation2 + $0x12f] sm:$0xff]  ;;  %719 = vst.msk [vmem:[#allocation3 + $0x1d0] sm:$0xff] %vm465_vm0, %v678_v38 }
  0xf4   : > { %v2515_v27 = vadd.f32 %v2483_v37, %v2414_v17  ;;  %v2130_v36 = vmul.f32 %v4582_v59, %v2094_v35  ;;  %v2131_v2 = vmul.f32 %v4582_v59, %v2095_v32  ;;  %v2904_v57 = vmax.f32 %v2872_v11, 0.0  ;;  %v5459_v35 = vld [vmem:[#allocation3 + $0x118] sm:$0xff]  ;;  %v5461_v32 = vld [vmem:[#allocation3 + $0x390] sm:$0xff]  ;;  %v680_v17 = vld [vmem:[#allocation2 + $0x147] sm:$0xff]  ;;  %3758 = vmatprep.mubr.msk.bf16.mxu0 %vm465_vm0, %v3948_v21  ;;  %720 = vst.msk [vmem:[#allocation3 + $0x1d8] sm:$0xff] %vm465_vm0, %v679_v7 }
  0xf5   : > { %v2905_v0 = vmax.f32 %v2873_v8, 0.0  ;;  %v2230_v22 = vmul.f32 %v4594_v16, %v2194_v44  ;;  %v2231_v12 = vmul.f32 %v4594_v16, %v2195_v1  ;;  %v2615_v13 = vadd.f32 %v2583_v24, %v2514_v46  ;;  %v5472_v8 = vld [vmem:[#allocation3 + $0x610] sm:$0xff]  ;;  %721 = vst.msk [vmem:[#allocation3 + $0x1e0] sm:$0xff] %vm465_vm0, %v680_v17  ;;  %v2079_v7 = vld [vmem:[#allocation3 + $0x2d8] sm:$0xff] }
  0xf6   : > { %v2616_v43 = vadd.f32 %v2584_v45, %v2515_v27  ;;  %v2162_v37 = vadd.f32 %v2130_v36, %v2030_v51  ;;  %v2163_v5 = vadd.f32 %v2131_v2, %v2031_v56  ;;  %v2331_v1 = vmul.f32 %v5245_v34, %v4558_v49  ;;  %v5470_v45 = vld [vmem:[#allocation3 + $0x398] sm:$0xff]  ;;  %6949 = vst [vmem:[#allocation65_spill] sm:$0xff] %v5472_v8  ;;  %v681_v51 = vld [vmem:[#allocation2 + $0x14f] sm:$0xff] }
  0xf7   : > { %v2940_v44 = vpack.c.bf16 %v2905_v0, %v2904_v57  ;;  %v2332_v11 = vmul.f32 %v5247_v23, %v4558_v49  ;;  %v2399_v24 = vmul.f32 %v5249_v29, %v4585_v60  ;;  %v2716_v56 = vadd.f32 %v2684_v3, %v2615_v13  ;;  %v1978_v36 = vld [vmem:[#allocation3 + $0x50] sm:$0xff]  ;;  %v1979_v23 = vld [vmem:[#allocation3 + $0x58] sm:$0xff]  ;;  %v682_v57 = vld [vmem:[#allocation2 + $0x167] sm:$0xff]  ;;  %722 = vst.msk [vmem:[#allocation3 + $0x1e8] sm:$0xff] %vm465_vm0, %v681_v51 }
  0xf8   : > { %v2717_v46 = vadd.f32 %v2685_v33, %v2616_v43  ;;  %v2262_v34 = vadd.f32 %v2230_v22, %v2162_v37  ;;  %v2263_v27 = vadd.f32 %v2231_v12, %v2163_v5  ;;  %v2078_v2 = vld [vmem:[#allocation3 + $0x2d0] sm:$0xff]  ;;  %v2400_v21 = vmul.f32 %v5253_v31, %v4585_v60  ;;  %723 = vst.msk [vmem:[#allocation3 + $0x1f0] sm:$0xff] %vm465_vm0, %v682_v57 }
  0xf9   : > { %v683_v29 = vld [vmem:[#allocation2 + $0x16f] sm:$0xff]  ;;  %3882 = vmatprep.subr.msk.bf16.mxu0 %vm465_vm0, %v2940_v44  ;;  %v2500_v38 = vmul.f32 %v5255_v62, %v4597_v18  ;;  %v2501_v22 = vmul.f32 %v5257_v26, %v4597_v18  ;;  %v2601_v12 = vmul.f32 %v4573_v53, %v5454_v50  ;;  %v2817_v43 = vadd.f32 %v2785_v25, %v2716_v56  ;;  %v5490_v62 = vld [vmem:[#allocation3 + $0x618] sm:$0xff]  ;;  %v662_v56 = vld [vmem:[#allocation2 + $0x27] sm:$0xff] }
  0xfa   : > { %v840_v0 = vld [vmem:[#allocation2 + $0x129] sm:$0xff]  ;;  %724 = vst.msk [vmem:[#allocation3 + $0x1f8] sm:$0xff] %vm465_vm0, %v683_v29  ;;  %v841_v3 = vld [vmem:[#allocation2 + $0x131] sm:$0xff]  ;;  %v2818_v31 = vadd.f32 %v2786_v30, %v2717_v46  ;;  %v2363_v37 = vadd.f32 %v2331_v1, %v2262_v34  ;;  %v2364_v5 = vadd.f32 %v2332_v11, %v2263_v27  ;;  %v2602_v51 = vmul.f32 %v4573_v53, %v5459_v35 }
  0xfb   : > { %v842_v33 = vld [vmem:[#allocation2 + $0x149] sm:$0xff]  ;;  %v843_v13 = vld [vmem:[#allocation2 + $0x151] sm:$0xff]  ;;  %881 = vst.msk [vmem:[#allocation3 + $0x450] sm:$0xff] %vm465_vm0, %v840_v0  ;;  %882 = vst.msk [vmem:[#allocation3 + $0x458] sm:$0xff] %vm465_vm0, %v841_v3  ;;  %v2702_v25 = vmul.f32 %v4600_v19, %v5461_v32  ;;  %v2703_v30 = vmul.f32 %v4600_v19, %v5470_v45  ;;  %v5503_v1 = vmul.f32 %v5239_v9, %v5472_v8 }
  0xfc   : > { %v2178_v26 = vld [vmem:[#allocation3 + $0x550] sm:$0xff]  ;;  %883 = vst.msk [vmem:[#allocation3 + $0x460] sm:$0xff] %vm465_vm0, %v842_v33  ;;  %884 = vst.msk [vmem:[#allocation3 + $0x468] sm:$0xff] %vm465_vm0, %v843_v13  ;;  %v2179_v11 = vld [vmem:[#allocation3 + $0x558] sm:$0xff]  ;;  %v2856_v34 = vadd.f32 %v5389_v52, %v2817_v43  ;;  %v2857_v27 = vadd.f32 %v5389_v52, %v2818_v31  ;;  %v2431_v57 = vadd.f32 %v2399_v24, %v2363_v37 }
  0xfd   : > { %v844_v17 = vld [vmem:[#allocation2 + $0x169] sm:$0xff]  ;;  %v845_v44 = vld [vmem:[#allocation2 + $0x171] sm:$0xff]  ;;  %v2432_v29 = vadd.f32 %v2400_v21, %v2364_v5  ;;  %703 = vst.msk [vmem:[#allocation3 + $0x150] sm:$0xff] %vm465_vm0, %v662_v56  ;;  %v2804_v13 = vmul.f32 %v5239_v9, %v5490_v62  ;;  %v2114_v43 = vmul.f32 %v4582_v59, %v2078_v2  ;;  %v2214_v2 = vmul.f32 %v4594_v16, %v2178_v26 }
  0xfe   : > { %885 = vst.msk [vmem:[#allocation3 + $0x470] sm:$0xff] %vm465_vm0, %v844_v17  ;;  %886 = vst.msk [vmem:[#allocation3 + $0x478] sm:$0xff] %vm465_vm0, %v845_v44  ;;  %v663_v46 = vld [vmem:[#allocation2 + $0x2f] sm:$0xff]  ;;  %v664_v0 = vld [vmem:[#allocation2 + $0x47] sm:$0xff]  ;;  %v2014_v17 = vmul.f32 %v4555_v48, %v1978_v36  ;;  %v2015_v44 = vmul.f32 %v4555_v48, %v1979_v23  ;;  %v2888_v21 = vmax.f32 %v2856_v34, 0.0  ;;  %v2889_v31 = vmax.f32 %v2857_v27, 0.0 }
  0xff   : > { %v665_v3 = vld [vmem:[#allocation2 + $0x4f] sm:$0xff]  ;;  %v666_v33 = vld [vmem:[#allocation2 + $0x67] sm:$0xff]  ;;  %704 = vst.msk [vmem:[#allocation3 + $0x158] sm:$0xff] %vm465_vm0, %v663_v46  ;;  %705 = vst.msk [vmem:[#allocation3 + $0x160] sm:$0xff] %vm465_vm0, %v664_v0  ;;  %v2532_v37 = vadd.f32 %v2500_v38, %v2431_v57  ;;  %v2533_v5 = vadd.f32 %v2501_v22, %v2432_v29  ;;  %v2115_v36 = vmul.f32 %v4582_v59, %v2079_v7 }
 0x100   : > { %v667_v8 = vld [vmem:[#allocation2 + $0x6f] sm:$0xff]  ;;  %706 = vst.msk [vmem:[#allocation3 + $0x168] sm:$0xff] %vm465_vm0, %v665_v3  ;;  %707 = vst.msk [vmem:[#allocation3 + $0x170] sm:$0xff] %vm465_vm0, %v666_v33  ;;  %v2146_v23 = vadd.f32 %v2114_v43, %v2014_v17  ;;  %v2215_v46 = vmul.f32 %v4594_v16, %v2179_v11  ;;  %v2932_v34 = vpack.c.bf16 %v2889_v31, %v2888_v21  ;;  %v5535_v29 = vld [vmem:[#allocation3 + $0x98] sm:$0xff] }
 0x101   : > { %v824_v24 = vld [vmem:[#allocation2 + $0x29] sm:$0xff]  ;;  %708 = vst.msk [vmem:[#allocation3 + $0x178] sm:$0xff] %vm465_vm0, %v667_v8  ;;  %v825_v56 = vld [vmem:[#allocation2 + $0x31] sm:$0xff]  ;;  %v2633_v27 = vadd.f32 %v2601_v12, %v2532_v37  ;;  %v2634_v38 = vadd.f32 %v2602_v51, %v2533_v5  ;;  %v2315_v8 = vmul.f32 %v5293_v41, %v4558_v49  ;;  %v2147_v22 = vadd.f32 %v2115_v36, %v2015_v44 }
 0x102   : > { %865 = vst.msk [vmem:[#allocation3 + $0x3d0] sm:$0xff] %vm465_vm0, %v824_v24  ;;  %v826_v0 = vld [vmem:[#allocation2 + $0x49] sm:$0xff]  ;;  %v827_v3 = vld [vmem:[#allocation2 + $0x51] sm:$0xff]  ;;  %866 = vst.msk [vmem:[#allocation3 + $0x3d8] sm:$0xff] %vm465_vm0, %v825_v56  ;;  %v2246_v7 = vadd.f32 %v2214_v2, %v2146_v23  ;;  %v2316_v26 = vmul.f32 %v5305_v61, %v4558_v49  ;;  %v2383_v11 = vmul.f32 %v5312_v20, %v4585_v60  ;;  %v2981_v12 = vsel %vm465_vm0, %v2932_v34, 0 }
 0x103   : > { %867 = vst.msk [vmem:[#allocation3 + $0x3e0] sm:$0xff] %vm465_vm0, %v826_v0  ;;  %868 = vst.msk [vmem:[#allocation3 + $0x3e8] sm:$0xff] %vm465_vm0, %v827_v3  ;;  %v5533_v57 = vld [vmem:[#allocation3 + $0x90] sm:$0xff]  ;;  %v2734_v51 = vadd.f32 %v2702_v25, %v2633_v27  ;;  %v2735_v41 = vadd.f32 %v2703_v30, %v2634_v38  ;;  %v2384_v33 = vmul.f32 %v5314_v42, %v4585_v60  ;;  %v5542_v44 = vld [vmem:[#allocation3 + $0x318] sm:$0xff]  ;;  %3751 = vmatpush3.bf16.xpose.msra.mxu0 %v2981_v12 }
 0x104   : > { %v5540_v17 = vld [vmem:[#allocation3 + $0x310] sm:$0xff]  ;;  %v2247_v61 = vadd.f32 %v2215_v46, %v2147_v22  ;;  %v2347_v24 = vadd.f32 %v2315_v8, %v2246_v7  ;;  %v2484_v20 = vmul.f32 %v5316_v58, %v4597_v18  ;;  %v2485_v21 = vmul.f32 %v5322_v54, %v4597_v18  ;;  %v5550_v25 = vld [vmem:[#allocation3 + $0x598] sm:$0xff]  ;;  %v1996_v58 = vld [vmem:[#allocation3 + $0xe0] sm:$0xff] }
 0x105   : > { %v828_v43 = vld [vmem:[#allocation2 + $0x69] sm:$0xff]  ;;  %6950 = vst [vmem:[#allocation66_spill] sm:$0xff] %v5550_v25  ;;  %v829_v30 = vld [vmem:[#allocation2 + $0x71] sm:$0xff]  ;;  %v2835_v42 = vadd.f32 %v5503_v1, %v2734_v51  ;;  %v2836_v37 = vadd.f32 %v2804_v13, %v2735_v41  ;;  %v2585_v5 = vmul.f32 %v4573_v53, %v5533_v57  ;;  %v2586_v56 = vmul.f32 %v4573_v53, %v5535_v29  ;;  %v2096_v1 = vld [vmem:[#allocation3 + $0x360] sm:$0xff] }
 0x106   : > { %v5548_v31 = vld [vmem:[#allocation3 + $0x590] sm:$0xff]  ;;  %869 = vst.msk [vmem:[#allocation3 + $0x3f0] sm:$0xff] %vm465_vm0, %v828_v43  ;;  %v1997_v36 = vld [vmem:[#allocation3 + $0xe8] sm:$0xff]  ;;  %870 = vst.msk [vmem:[#allocation3 + $0x3f8] sm:$0xff] %vm465_vm0, %v829_v30  ;;  %v2348_v54 = vadd.f32 %v2316_v26, %v2247_v61  ;;  %v2415_v23 = vadd.f32 %v2383_v11, %v2347_v24  ;;  %v2686_v2 = vmul.f32 %v4600_v19, %v5540_v17 }
 0x107   : > { %v2687_v46 = vmul.f32 %v4600_v19, %v5542_v44  ;;  %v2097_v13 = vld [vmem:[#allocation3 + $0x368] sm:$0xff]  ;;  %v2874_v0 = vadd.f32 %v5389_v52, %v2835_v42  ;;  %v2875_v3 = vadd.f32 %v5389_v52, %v2836_v37  ;;  %v2787_v34 = vmul.f32 %v5239_v9, %v5548_v31  ;;  %v2196_v38 = vld [vmem:[#allocation3 + $0x5e0] sm:$0xff] }
 0x108   : > { %v5569_v27 = vmul.f32 %v5239_v9, %v5550_v25  ;;  %v2197_v8 = vld [vmem:[#allocation3 + $0x5e8] sm:$0xff]  ;;  %v2416_v22 = vadd.f32 %v2384_v33, %v2348_v54  ;;  %v2516_v7 = vadd.f32 %v2484_v20, %v2415_v23  ;;  %v2032_v26 = vmul.f32 %v4555_v48, %v1996_v58  ;;  %v2567_v20 = vld [vmem:[#allocation3 + $0x120] sm:$0xff]  ;;  %v847_v58 = vld [vmem:[#allocation2 + $0x191] sm:$0xff] }
 0x109   : > { %v2033_v11 = vmul.f32 %v4555_v48, %v1997_v36  ;;  %v2906_v12 = vmax.f32 %v2874_v0, 0.0  ;;  %v2907_v51 = vmax.f32 %v2875_v3, 0.0  ;;  %v2132_v41 = vmul.f32 %v4582_v59, %v2096_v1  ;;  %v684_v61 = vld [vmem:[#allocation2 + $0x187] sm:$0xff]  ;;  %v685_v24 = vld [vmem:[#allocation2 + $0x18f] sm:$0xff]  ;;  %888 = vst.msk [vmem:[#allocation3 + $0x488] sm:$0xff] %vm465_vm0, %v847_v58 }
 0x10a   : > { %v2133_v43 = vmul.f32 %v4582_v59, %v2097_v13  ;;  %v846_v30 = vld [vmem:[#allocation2 + $0x189] sm:$0xff]  ;;  %v2517_v42 = vadd.f32 %v2485_v21, %v2416_v22  ;;  %v2617_v37 = vadd.f32 %v2585_v5, %v2516_v7  ;;  %v2232_v25 = vmul.f32 %v4594_v16, %v2196_v38  ;;  %725 = vst.msk [vmem:[#allocation3 + $0x200] sm:$0xff] %vm465_vm0, %v684_v61  ;;  %v2668_v7 = vld [vmem:[#allocation3 + $0x3a0] sm:$0xff] }
 0x10b   : > { %v2233_v33 = vmul.f32 %v4594_v16, %v2197_v8  ;;  %726 = vst.msk [vmem:[#allocation3 + $0x208] sm:$0xff] %vm465_vm0, %v685_v24  ;;  %887 = vst.msk [vmem:[#allocation3 + $0x480] sm:$0xff] %vm465_vm0, %v846_v30  ;;  %v2941_v36 = vpack.c.bf16 %v2907_v51, %v2906_v12  ;;  %v2164_v54 = vadd.f32 %v2132_v41, %v2032_v26  ;;  %v2568_v21 = vld [vmem:[#allocation3 + $0x128] sm:$0xff]  ;;  %v6953_v51 = vld [vmem:[#allocation60_spill] sm:$0xff] }
 0x10c   : > { %v2165_v23 = vadd.f32 %v2133_v43, %v2033_v11  ;;  %v2333_v1 = vmul.f32 %v5339_v55, %v4558_v49  ;;  %v668_v5 = vld [vmem:[#allocation2 + $0x87] sm:$0xff]  ;;  %v669_v13 = vld [vmem:[#allocation2 + $0x8f] sm:$0xff]  ;;  %v2618_v0 = vadd.f32 %v2586_v56, %v2517_v42  ;;  %v2718_v3 = vadd.f32 %v2686_v2, %v2617_v37 }
 0x10d   : > { %v2334_v38 = vmul.f32 %v5341_v28, %v4558_v49  ;;  %v6951_v8 = vld [vmem:[#allocation50_spill] sm:$0xff]  ;;  %709 = vst.msk [vmem:[#allocation3 + $0x180] sm:$0xff] %vm465_vm0, %v668_v5  ;;  %710 = vst.msk [vmem:[#allocation3 + $0x188] sm:$0xff] %vm465_vm0, %v669_v13  ;;  %v831_v55 = vld [vmem:[#allocation2 + $0x91] sm:$0xff]  ;;  %3883 = vmatprep.subr.msk.bf16.mxu0 %vm465_vm0, %v2941_v36  ;;  %v2264_v11 = vadd.f32 %v2232_v25, %v2164_v54  ;;  %v2502_v28 = vmul.f32 %v6953_v51, %v4597_v18 }
 0x10e   : > { %v2401_v22 = vmul.f32 %v6951_v8, %v4585_v60  ;;  %v830_v26 = vld [vmem:[#allocation2 + $0x89] sm:$0xff]  ;;  %v2265_v12 = vadd.f32 %v2233_v33, %v2165_v23  ;;  %v2769_v43 = vld [vmem:[#allocation3 + $0x620] sm:$0xff]  ;;  %872 = vst.msk [vmem:[#allocation3 + $0x408] sm:$0xff] %vm465_vm0, %v831_v55  ;;  %v2719_v61 = vadd.f32 %v2687_v46, %v2618_v0  ;;  %v2819_v24 = vadd.f32 %v2787_v34, %v2718_v3  ;;  %v849_v34 = vld [vmem:[#allocation2 + $0x1b1] sm:$0xff] }
 0x10f   : > { %v6952_v56 = vld [vmem:[#allocation59_spill] sm:$0xff]  ;;  %v2669_v41 = vld [vmem:[#allocation3 + $0x3a8] sm:$0xff]  ;;  %871 = vst.msk [vmem:[#allocation3 + $0x400] sm:$0xff] %vm465_vm0, %v830_v26  ;;  %v6954_v30 = vld [vmem:[#allocation61_spill] sm:$0xff]  ;;  %v2603_v25 = vmul.f32 %v4573_v53, %v2567_v20  ;;  %v2365_v36 = vadd.f32 %v2333_v1, %v2264_v11  ;;  %v2604_v23 = vmul.f32 %v4573_v53, %v2568_v21  ;;  %v2704_v5 = vmul.f32 %v4600_v19, %v2668_v7 }
 0x110   : > { %v2402_v2 = vmul.f32 %v6952_v56, %v4585_v60  ;;  %v2503_v42 = vmul.f32 %v6954_v30, %v4597_v18  ;;  %v2770_v37 = vld [vmem:[#allocation3 + $0x628] sm:$0xff]  ;;  %v2366_v54 = vadd.f32 %v2334_v38, %v2265_v12  ;;  %v2820_v13 = vadd.f32 %v5569_v27, %v2719_v61  ;;  %890 = vst.msk [vmem:[#allocation3 + $0x498] sm:$0xff] %vm465_vm0, %v849_v34  ;;  %v833_v56 = vld [vmem:[#allocation2 + $0xb1] sm:$0xff] }
 0x111   : > { %v686_v33 = vld [vmem:[#allocation2 + $0x1a7] sm:$0xff]  ;;  %v687_v58 = vld [vmem:[#allocation2 + $0x1af] sm:$0xff]  ;;  %v2858_v0 = vadd.f32 %v5389_v52, %v2819_v24  ;;  %v2705_v20 = vmul.f32 %v4600_v19, %v2669_v41  ;;  %v2805_v3 = vmul.f32 %v5239_v9, %v2769_v43  ;;  %v2433_v38 = vadd.f32 %v2401_v22, %v2365_v36  ;;  %874 = vst.msk [vmem:[#allocation3 + $0x418] sm:$0xff] %vm465_vm0, %v833_v56 }
 0x112   : > { %727 = vst.msk [vmem:[#allocation3 + $0x210] sm:$0xff] %vm465_vm0, %v686_v33  ;;  %728 = vst.msk [vmem:[#allocation3 + $0x218] sm:$0xff] %vm465_vm0, %v687_v58  ;;  %v848_v46 = vld [vmem:[#allocation2 + $0x1a9] sm:$0xff]  ;;  %v2434_v8 = vadd.f32 %v2402_v2, %v2366_v54  ;;  %v2806_v7 = vmul.f32 %v5239_v9, %v2770_v37  ;;  %v2016_v26 = vmul.f32 %v5208_v6, %v4555_v48 }
 0x113   : > { %889 = vst.msk [vmem:[#allocation3 + $0x490] sm:$0xff] %vm465_vm0, %v848_v46  ;;  %v670_v1 = vld [vmem:[#allocation2 + $0xa7] sm:$0xff]  ;;  %v671_v21 = vld [vmem:[#allocation2 + $0xaf] sm:$0xff]  ;;  %v2859_v27 = vadd.f32 %v5389_v52, %v2820_v13  ;;  %v2890_v55 = vmax.f32 %v2858_v0, 0.0  ;;  %v2017_v11 = vmul.f32 %v5210_v10, %v4555_v48  ;;  %v2116_v12 = vmul.f32 %v5212_v39, %v4582_v59 }
 0x114   : > { %711 = vst.msk [vmem:[#allocation3 + $0x190] sm:$0xff] %vm465_vm0, %v670_v1  ;;  %712 = vst.msk [vmem:[#allocation3 + $0x198] sm:$0xff] %vm465_vm0, %v671_v21  ;;  %v832_v22 = vld [vmem:[#allocation2 + $0xa9] sm:$0xff]  ;;  %v2534_v2 = vadd.f32 %v2502_v28, %v2433_v38  ;;  %v2535_v9 = vadd.f32 %v2503_v42, %v2434_v8  ;;  %v2117_v6 = vmul.f32 %v5225_v63, %v4582_v59  ;;  %v2551_v28 = vld [vmem:[#allocation3 + $0xa0] sm:$0xff] }
 0x115   : > { %v2216_v51 = vmul.f32 %v5229_v14, %v4594_v16  ;;  %873 = vst.msk [vmem:[#allocation3 + $0x410] sm:$0xff] %vm465_vm0, %v832_v22  ;;  %v2891_v41 = vmax.f32 %v2859_v27, 0.0  ;;  %v2148_v43 = vadd.f32 %v2116_v12, %v2016_v26  ;;  %v2217_v10 = vmul.f32 %v5231_v4, %v4594_v16  ;;  %v688_v14 = vld [vmem:[#allocation2 + $0x1c7] sm:$0xff]  ;;  %v689_v42 = vld [vmem:[#allocation2 + $0x1cf] sm:$0xff]  ;;  %v6957_v26 = vld [vmem:[#allocation64_spill] sm:$0xff] }
 0x116   : > { %v2317_v39 = vmul.f32 %v5403_v15, %v4558_v49  ;;  %v2635_v61 = vadd.f32 %v2603_v25, %v2534_v2  ;;  %v2636_v24 = vadd.f32 %v2604_v23, %v2535_v9  ;;  %v2149_v30 = vadd.f32 %v2117_v6, %v2017_v11  ;;  %v850_v37 = vld [vmem:[#allocation2 + $0x1c9] sm:$0xff]  ;;  %v5635_v15 = vld [vmem:[#allocation3 + $0x320] sm:$0xff]  ;;  %729 = vst.msk [vmem:[#allocation3 + $0x220] sm:$0xff] %vm465_vm0, %v688_v14  ;;  %v851_v25 = vld [vmem:[#allocation2 + $0x1d1] sm:$0xff] }
 0x117   : > { %v2318_v63 = vmul.f32 %v5405_v40, %v4558_v49  ;;  %v2933_v33 = vpack.c.bf16 %v2891_v41, %v2890_v55  ;;  %v2248_v58 = vadd.f32 %v2216_v51, %v2148_v43  ;;  %v2385_v36 = vmul.f32 %v5411_v47, %v4585_v60  ;;  %v6955_v4 = vld [vmem:[#allocation62_spill] sm:$0xff]  ;;  %730 = vst.msk [vmem:[#allocation3 + $0x228] sm:$0xff] %vm465_vm0, %v689_v42  ;;  %v6956_v13 = vld [vmem:[#allocation63_spill] sm:$0xff]  ;;  %v2753_v1 = vld [vmem:[#allocation3 + $0x5a0] sm:$0xff] }
 0x118   : > { %v2386_v54 = vmul.f32 %v6955_v4, %v4585_v60  ;;  %v2552_v46 = vld [vmem:[#allocation3 + $0xa8] sm:$0xff]  ;;  %891 = vst.msk [vmem:[#allocation3 + $0x4a0] sm:$0xff] %vm465_vm0, %v850_v37  ;;  %v2736_v40 = vadd.f32 %v2704_v5, %v2635_v61  ;;  %v2737_v23 = vadd.f32 %v2705_v20, %v2636_v24  ;;  %v2249_v34 = vadd.f32 %v2217_v10, %v2149_v30  ;;  %v1998_v5 = vld [vmem:[#allocation3 + $0xf0] sm:$0xff]  ;;  %v1999_v20 = vld [vmem:[#allocation3 + $0xf8] sm:$0xff] }
 0x119   : > { %v2486_v0 = vmul.f32 %v6956_v13, %v4597_v18  ;;  %v5642_v47 = vld [vmem:[#allocation3 + $0x328] sm:$0xff]  ;;  %892 = vst.msk [vmem:[#allocation3 + $0x4a8] sm:$0xff] %vm465_vm0, %v851_v25  ;;  %v2984_v38 = vsel %vm465_vm0, %v2933_v33, 0  ;;  %v2349_v8 = vadd.f32 %v2317_v39, %v2248_v58  ;;  %v2487_v27 = vmul.f32 %v6957_v26, %v4597_v18  ;;  %v2098_v11 = vld [vmem:[#allocation3 + $0x370] sm:$0xff]  ;;  %v2199_v42 = vld [vmem:[#allocation3 + $0x5f8] sm:$0xff] }
 0x11a   : > { %v2754_v21 = vld [vmem:[#allocation3 + $0x5a8] sm:$0xff]  ;;  %v2587_v55 = vmul.f32 %v4573_v53, %v2551_v28  ;;  %3753 = vmatpush3.bf16.xpose.msra.mxu0 %v2984_v38  ;;  %v2837_v12 = vadd.f32 %v2805_v3, %v2736_v40  ;;  %v2838_v22 = vadd.f32 %v2806_v7, %v2737_v23  ;;  %v2350_v56 = vadd.f32 %v2318_v63, %v2249_v34  ;;  %v2099_v7 = vld [vmem:[#allocation3 + $0x378] sm:$0xff]  ;;  %v2198_v14 = vld [vmem:[#allocation3 + $0x5f0] sm:$0xff] }
 0x11b   : > { %v2588_v2 = vmul.f32 %v4573_v53, %v2552_v46  ;;  %v672_v9 = vld [vmem:[#allocation2 + $0xc7] sm:$0xff]  ;;  %v673_v6 = vld [vmem:[#allocation2 + $0xcf] sm:$0xff]  ;;  %v2417_v41 = vadd.f32 %v2385_v36, %v2349_v8  ;;  %v2688_v43 = vmul.f32 %v4600_v19, %v5635_v15  ;;  %v2689_v10 = vmul.f32 %v4600_v19, %v5642_v47 }
 0x11c   : > { %v834_v51 = vld [vmem:[#allocation2 + $0xc9] sm:$0xff]  ;;  %v5657_v39 = vld [vmem:[%s6801_s3 + $0x8] ss:$0 sm:$0xff]  ;;  %713 = vst.msk [vmem:[#allocation3 + $0x1a0] sm:$0xff] %vm465_vm0, %v672_v9  ;;  %714 = vst.msk [vmem:[#allocation3 + $0x1a8] sm:$0xff] %vm465_vm0, %v673_v6  ;;  %v2876_v61 = vadd.f32 %v5389_v52, %v2837_v12  ;;  %v2877_v24 = vadd.f32 %v5389_v52, %v2838_v22  ;;  %v2418_v30 = vadd.f32 %v2386_v54, %v2350_v56 }
 0x11d   : > { %v2789_v3 = vmul.f32 %v5657_v39, %v2753_v1  ;;  %v835_v28 = vld [vmem:[#allocation2 + $0xd1] sm:$0xff]  ;;  %875 = vst.msk [vmem:[#allocation3 + $0x420] sm:$0xff] %vm465_vm0, %v834_v51  ;;  %v2790_v63 = vmul.f32 %v5657_v39, %v2754_v21  ;;  %v690_v37 = vld [vmem:[#allocation2 + $0x1e7] sm:$0xff]  ;;  %v2518_v33 = vadd.f32 %v2486_v0, %v2417_v41  ;;  %v2034_v58 = vmul.f32 %v4555_v48, %v1998_v5 }
 0x11e   : > { %876 = vst.msk [vmem:[#allocation3 + $0x428] sm:$0xff] %vm465_vm0, %v835_v28  ;;  %v2035_v36 = vmul.f32 %v4555_v48, %v1999_v20  ;;  %v2134_v4 = vmul.f32 %v4582_v59, %v2098_v11  ;;  %v691_v46 = vld [vmem:[#allocation2 + $0x1ef] sm:$0xff]  ;;  %731 = vst.msk [vmem:[#allocation3 + $0x230] sm:$0xff] %vm465_vm0, %v690_v37  ;;  %v2908_v54 = vmax.f32 %v2876_v61, 0.0  ;;  %v2909_v23 = vmax.f32 %v2877_v24, 0.0  ;;  %v674_v11 = vld [vmem:[#allocation2 + $0xe7] sm:$0xff] }
 0x11f   : > { %v852_v25 = vld [vmem:[#allocation2 + $0x1e9] sm:$0xff]  ;;  %v853_v40 = vld [vmem:[#allocation2 + $0x1f1] sm:$0xff]  ;;  %v2519_v34 = vadd.f32 %v2487_v27, %v2418_v30  ;;  %v2135_v13 = vmul.f32 %v4582_v59, %v2099_v7  ;;  %732 = vst.msk [vmem:[#allocation3 + $0x238] sm:$0xff] %vm465_vm0, %v691_v46  ;;  %v2619_v0 = vadd.f32 %v2587_v55, %v2518_v33  ;;  %v2234_v21 = vmul.f32 %v4594_v16, %v2198_v14 }
 0x120   : > { %893 = vst.msk [vmem:[#allocation3 + $0x4b0] sm:$0xff] %vm465_vm0, %v852_v25  ;;  %894 = vst.msk [vmem:[#allocation3 + $0x4b8] sm:$0xff] %vm465_vm0, %v853_v40  ;;  %v2166_v1 = vadd.f32 %v2134_v4, %v2034_v58  ;;  %v2235_v38 = vmul.f32 %v4594_v16, %v2199_v42  ;;  %v2569_v8 = vld [vmem:[#allocation3 + $0x130] sm:$0xff]  ;;  %v2942_v26 = vpack.c.bf16 %v2909_v23, %v2908_v54  ;;  %v2570_v51 = vld [vmem:[#allocation3 + $0x138] sm:$0xff] }
 0x121   : > { %v2620_v5 = vadd.f32 %v2588_v2, %v2519_v34  ;;  %v2167_v20 = vadd.f32 %v2135_v13, %v2035_v36  ;;  %v2335_v27 = vmul.f32 %v5454_v50, %v4558_v49  ;;  %v675_v12 = vld [vmem:[#allocation2 + $0xef] sm:$0xff]  ;;  %v2720_v56 = vadd.f32 %v2688_v43, %v2619_v0  ;;  %715 = vst.msk [vmem:[#allocation3 + $0x1b0] sm:$0xff] %vm465_vm0, %v674_v11  ;;  %v2772_v37 = vld [vmem:[#allocation3 + $0x638] sm:$0xff] }
 0x122   : > { %v836_v22 = vld [vmem:[#allocation2 + $0xe9] sm:$0xff]  ;;  %v2266_v9 = vadd.f32 %v2234_v21, %v2166_v1  ;;  %v2336_v55 = vmul.f32 %v5459_v35, %v4558_v49  ;;  %v2403_v6 = vmul.f32 %v5461_v32, %v4585_v60  ;;  %716 = vst.msk [vmem:[#allocation3 + $0x1b8] sm:$0xff] %vm465_vm0, %v675_v12  ;;  %v837_v2 = vld [vmem:[#allocation2 + $0xf1] sm:$0xff]  ;;  %3884 = vmatprep.subr.msk.bf16.mxu0 %vm465_vm0, %v2942_v26  ;;  %v6958_v35 = vld [vmem:[#allocation65_spill] sm:$0xff] }
 0x123   : > { %v2670_v41 = vld [vmem:[#allocation3 + $0x3b0] sm:$0xff]  ;;  %877 = vst.msk [vmem:[#allocation3 + $0x430] sm:$0xff] %vm465_vm0, %v836_v22  ;;  %v2721_v50 = vadd.f32 %v2689_v10, %v2620_v5  ;;  %v2267_v43 = vadd.f32 %v2235_v38, %v2167_v20  ;;  %v2404_v7 = vmul.f32 %v5470_v45, %v4585_v60  ;;  %v2504_v28 = vmul.f32 %v6958_v35, %v4597_v18  ;;  %v2671_v32 = vld [vmem:[#allocation3 + $0x3b8] sm:$0xff]  ;;  %v692_v10 = vld [vmem:[#allocation2 + $0x207] sm:$0xff] }
 0x124   : > { %v2771_v61 = vld [vmem:[#allocation3 + $0x630] sm:$0xff]  ;;  %878 = vst.msk [vmem:[#allocation3 + $0x438] sm:$0xff] %vm465_vm0, %v837_v2  ;;  %v2821_v24 = vadd.f32 %v2789_v3, %v2720_v56  ;;  %v2367_v30 = vadd.f32 %v2335_v27, %v2266_v9  ;;  %v2505_v14 = vmul.f32 %v5490_v62, %v4597_v18  ;;  %v2605_v42 = vmul.f32 %v4573_v53, %v2569_v8  ;;  %v676_v1 = vld [vmem:[#allocation2 + $0x107] sm:$0xff]  ;;  %v3972_v8 = vld [vmem:[#allocation3 + $0x78] sm:$0xff] }
 0x125   : > { %v693_v33 = vld [vmem:[#allocation2 + $0x20f] sm:$0xff]  ;;  %v2822_v58 = vadd.f32 %v2790_v63, %v2721_v50  ;;  %v2368_v36 = vadd.f32 %v2336_v55, %v2267_v43  ;;  %v2606_v45 = vmul.f32 %v4573_v53, %v2570_v51  ;;  %v2706_v4 = vmul.f32 %v4600_v19, %v2670_v41  ;;  %733 = vst.msk [vmem:[#allocation3 + $0x240] sm:$0xff] %vm465_vm0, %v692_v10  ;;  %v3974_v56 = vld [vmem:[#allocation3 + $0x2f8] sm:$0xff] }
 0x126   : > { %734 = vst.msk [vmem:[#allocation3 + $0x248] sm:$0xff] %vm465_vm0, %v693_v33  ;;  %v854_v3 = vld [vmem:[#allocation2 + $0x209] sm:$0xff]  ;;  %v855_v46 = vld [vmem:[#allocation2 + $0x211] sm:$0xff]  ;;  %v2860_v25 = vadd.f32 %v5389_v52, %v2821_v24  ;;  %v2435_v62 = vadd.f32 %v2403_v6, %v2367_v30  ;;  %v2707_v40 = vmul.f32 %v4600_v19, %v2671_v32  ;;  %v2807_v54 = vmul.f32 %v5657_v39, %v2771_v61 }
 0x127   : > { %895 = vst.msk [vmem:[#allocation3 + $0x4c0] sm:$0xff] %vm465_vm0, %v854_v3  ;;  %896 = vst.msk [vmem:[#allocation3 + $0x4c8] sm:$0xff] %vm465_vm0, %v855_v46  ;;  %v2861_v63 = vadd.f32 %v5389_v52, %v2822_v58  ;;  %v2436_v23 = vadd.f32 %v2404_v7, %v2368_v36  ;;  %v2808_v34 = vmul.f32 %v5657_v39, %v2772_v37  ;;  %v3971_v13 = vld [vmem:[#allocation3 + $0x70] sm:$0xff]  ;;  %v3976_v41 = vld [vmem:[#allocation3 + $0x578] sm:$0xff] }
 0x128   : > { %v2018_v0 = vmul.f32 %v3971_v13, %v4555_v48  ;;  %v2892_v21 = vmax.f32 %v2860_v25, 0.0  ;;  %v2536_v38 = vadd.f32 %v2504_v28, %v2435_v62  ;;  %v2019_v26 = vmul.f32 %v3972_v8, %v4555_v48  ;;  %v3973_v5 = vld [vmem:[#allocation3 + $0x2f0] sm:$0xff]  ;;  %717 = vst.msk [vmem:[#allocation3 + $0x1c0] sm:$0xff] %vm465_vm0, %v676_v1  ;;  %v2554_v7 = vld [vmem:[#allocation3 + $0xb8] sm:$0xff]  ;;  %v694_v61 = vld [vmem:[#allocation2 + $0x227] sm:$0xff] }
 0x129   : > { %v2118_v20 = vmul.f32 %v3973_v5, %v4582_v59  ;;  %v677_v27 = vld [vmem:[#allocation2 + $0x10f] sm:$0xff]  ;;  %v2893_v12 = vmax.f32 %v2861_v63, 0.0  ;;  %v2537_v22 = vadd.f32 %v2505_v14, %v2436_v23  ;;  %v2119_v9 = vmul.f32 %v3974_v56, %v4582_v59  ;;  %v5726_v10 = vld [vmem:[#allocation3 + $0x338] sm:$0xff]  ;;  %735 = vst.msk [vmem:[#allocation3 + $0x250] sm:$0xff] %vm465_vm0, %v694_v61 }
 0x12a   : > { %v838_v11 = vld [vmem:[#allocation2 + $0x109] sm:$0xff]  ;;  %v839_v52 = vld [vmem:[#allocation2 + $0x111] sm:$0xff]  ;;  %718 = vst.msk [vmem:[#allocation3 + $0x1c8] sm:$0xff] %vm465_vm0, %v677_v27  ;;  %v2637_v48 = vadd.f32 %v2605_v42, %v2536_v38  ;;  %v2219_v2 = vmul.f32 %v3976_v41, %v4594_v16  ;;  %v2319_v50 = vmul.f32 %v5533_v57, %v4558_v49  ;;  %v2320_v32 = vmul.f32 %v5535_v29, %v4558_v49  ;;  %v5768_v41 = vld [vmem:[#allocation3 + $0x460] sm:$0xff] }
 0x12b   : > { %v3975_v55 = vld [vmem:[#allocation3 + $0x570] sm:$0xff]  ;;  %879 = vst.msk [vmem:[#allocation3 + $0x440] sm:$0xff] %vm465_vm0, %v838_v11  ;;  %880 = vst.msk [vmem:[#allocation3 + $0x448] sm:$0xff] %vm465_vm0, %v839_v52  ;;  %v2150_v51 = vadd.f32 %v2118_v20, %v2018_v0  ;;  %v2934_v59 = vpack.c.bf16 %v2893_v12, %v2892_v21  ;;  %v2638_v35 = vadd.f32 %v2606_v45, %v2537_v22  ;;  %v6959_v46 = vld [vmem:[#allocation66_spill] sm:$0xff] }
 0x12c   : > { %v2218_v6 = vmul.f32 %v3975_v55, %v4594_v16  ;;  %v2553_v43 = vld [vmem:[#allocation3 + $0xb0] sm:$0xff]  ;;  %v2151_v28 = vadd.f32 %v2119_v9, %v2019_v26  ;;  %v2738_v14 = vadd.f32 %v2706_v4, %v2637_v48  ;;  %v2387_v37 = vmul.f32 %v5540_v17, %v4585_v60  ;;  %v1006_v21 = vld [vmem:[#allocation3 + $0x1d8] sm:$0xff]  ;;  %v3978_v26 = vld [vmem:[%s6799_s1] sm:$0xff] }
 0x12d   : > { %v695_v24 = vld [vmem:[#allocation2 + $0x22f] sm:$0xff]  ;;  %v2388_v16 = vmul.f32 %v5542_v44, %v4585_v60  ;;  %v2987_v29 = vsel %vm465_vm0, %v2934_v59, 0  ;;  %v2739_v33 = vadd.f32 %v2707_v40, %v2638_v35  ;;  %v2488_v36 = vmul.f32 %v5548_v31, %v4597_v18  ;;  %v2756_v60 = vld [vmem:[#allocation3 + $0x5b8] sm:$0xff]  ;;  %v5744_v31 = vld [vmem:[%s6802_s4] ss:$0 sm:$0xff] }
 0x12e   : > { %v856_v30 = vld [vmem:[#allocation2 + $0x229] sm:$0xff]  ;;  %v2250_v42 = vadd.f32 %v2218_v6, %v2150_v51  ;;  %736 = vst.msk [vmem:[#allocation3 + $0x258] sm:$0xff] %vm465_vm0, %v695_v24  ;;  %v857_v49 = vld [vmem:[#allocation2 + $0x231] sm:$0xff]  ;;  %v2251_v58 = vadd.f32 %v2219_v2, %v2151_v28  ;;  %3755 = vmatpush3.bf16.xpose.msra.mxu0 %v2987_v29  ;;  %v2839_v4 = vadd.f32 %v2807_v54, %v2738_v14  ;;  %v5758_v52 = vld [vmem:[#allocation3 + $0x1e0] sm:$0xff] }
 0x12f   : > { %v5724_v57 = vld [vmem:[#allocation3 + $0x330] sm:$0xff]  ;;  %897 = vst.msk [vmem:[#allocation3 + $0x4d0] sm:$0xff] %vm465_vm0, %v856_v30  ;;  %898 = vst.msk [vmem:[#allocation3 + $0x4d8] sm:$0xff] %vm465_vm0, %v857_v49  ;;  %v2489_v25 = vmul.f32 %v6959_v46, %v4597_v18  ;;  %v2589_v62 = vmul.f32 %v4573_v53, %v2553_v43  ;;  %v2840_v63 = vadd.f32 %v2808_v34, %v2739_v33  ;;  %v6960_v5 = vld [vmem:[#allocation24_spill] sm:$0xff] }
 0x130   : > { %v2755_v45 = vld [vmem:[#allocation3 + $0x5b0] sm:$0xff]  ;;  %v2351_v3 = vadd.f32 %v2319_v50, %v2250_v42  ;;  %v2352_v23 = vadd.f32 %v2320_v32, %v2251_v58  ;;  %v2590_v40 = vmul.f32 %v4573_v53, %v2554_v7  ;;  %v2690_v13 = vmul.f32 %v4600_v19, %v5724_v57  ;;  %v1208_v11 = vld [vmem:[#allocation3 + $0x458] sm:$0xff]  ;;  %v6961_v22 = vld [vmem:[#allocation25_spill] sm:$0xff] }
 0x131   : > { %v2878_v54 = vadd.f32 %v5744_v31, %v2839_v4  ;;  %v2691_v18 = vmul.f32 %v4600_v19, %v5726_v10  ;;  %v2791_v1 = vmul.f32 %v5657_v39, %v2755_v45  ;;  %v1005_v34 = vld [vmem:[#allocation3 + $0x1d0] sm:$0xff]  ;;  %v2879_v53 = vadd.f32 %v5744_v31, %v2840_v63  ;;  %v5766_v51 = vld [vmem:[#allocation3 + $0x1e8] sm:$0xff]  ;;  %v5778_v30 = vld [vmem:[#allocation3 + $0x1f8] sm:$0xff] }
 0x132   : > { %v2419_v0 = vadd.f32 %v2387_v37, %v2351_v3  ;;  %v2420_v38 = vadd.f32 %v2388_v16, %v2352_v23  ;;  %v2792_v8 = vmul.f32 %v5657_v39, %v2756_v60  ;;  %v5756_v20 = vrot.slane %v3978_v26, %v6960_v5  ;;  %v1207_v27 = vld [vmem:[#allocation3 + $0x450] sm:$0xff]  ;;  %v5770_v2 = vld [vmem:[#allocation3 + $0x468] sm:$0xff]  ;;  %v6964_v16 = vld [vmem:[#allocation29_spill] sm:$0xff] }
 0x133   : > { %v2910_v19 = vmax.f32 %v2878_v54, 0.0  ;;  %v1142_v56 = vmul.f32 %v5540_v17, %v6961_v22  ;;  %v1143_v9 = vmul.f32 %v5542_v44, %v6961_v22  ;;  %v2911_v39 = vmax.f32 %v2879_v53, 0.0  ;;  %v6962_v43 = vld [vmem:[#allocation26_spill] sm:$0xff]  ;;  %v6963_v59 = vld [vmem:[#allocation27_spill] sm:$0xff]  ;;  %v5796_v3 = vld [vmem:[#allocation3 + $0x478] sm:$0xff] }
 0x134   : > { %v2520_v12 = vadd.f32 %v2488_v36, %v2419_v0  ;;  %v2521_v55 = vadd.f32 %v2489_v25, %v2420_v38  ;;  %v1041_v6 = vmul.f32 %v5756_v20, %v1005_v34  ;;  %v1042_v48 = vmul.f32 %v5756_v20, %v1006_v21  ;;  %v5776_v35 = vld [vmem:[#allocation3 + $0x1f0] sm:$0xff]  ;;  %v5783_v42 = vld [vmem:[%s6799_s1 + $0x8] ss:$0 sm:$0xff]  ;;  %v990_v25 = vld [vmem:[#allocation3 + $0x158] sm:$0xff] }
 0x135   : > { %v1243_v7 = vmul.f32 %v6962_v43, %v1207_v27  ;;  %v1244_v17 = vmul.f32 %v6962_v43, %v1208_v11  ;;  %v1344_v44 = vmul.f32 %v6963_v59, %v5758_v52  ;;  %v2943_v28 = vpack.c.bf16 %v2911_v39, %v2910_v19  ;;  %v5791_v33 = vld [vmem:[#allocation3 + $0x470] sm:$0xff]  ;;  %v6965_v60 = vld [vmem:[#allocation30_spill] sm:$0xff]  ;;  %v1091_v53 = vld [vmem:[#allocation3 + $0x298] sm:$0xff] }
 0x136   : > { %v2621_v50 = vadd.f32 %v2589_v62, %v2520_v12  ;;  %v2622_v32 = vadd.f32 %v2590_v40, %v2521_v55  ;;  %v1174_v61 = vadd.f32 %v1142_v56, %v1041_v6  ;;  %v1175_v24 = vadd.f32 %v1143_v9, %v1042_v48  ;;  %v989_v46 = vld [vmem:[#allocation3 + $0x150] sm:$0xff]  ;;  %v1192_v26 = vld [vmem:[#allocation3 + $0x3d8] sm:$0xff]  ;;  %v5811_v12 = vld [vmem:[#allocation3 + $0x160] sm:$0xff] }
 0x137   : > { %v1345_v37 = vmul.f32 %v6963_v59, %v5766_v51  ;;  %v1546_v49 = vmul.f32 %v6964_v16, %v5768_v41  ;;  %v1547_v29 = vmul.f32 %v6964_v16, %v5770_v2  ;;  %3885 = vmatprep.subr.msk.bf16.mxu0 %vm465_vm0, %v2943_v28  ;;  %v1647_v4 = vmul.f32 %v6965_v60, %v5776_v35  ;;  %v6966_v23 = vld [vmem:[#allocation31_spill] sm:$0xff]  ;;  %v6967_v56 = vld [vmem:[#allocation32_spill] sm:$0xff]  ;;  %v6968_v39 = vld [vmem:[#allocation33_spill] sm:$0xff] }
 0x138   : > { %v2722_v14 = vadd.f32 %v2690_v13, %v2621_v50  ;;  %v2723_v58 = vadd.f32 %v2691_v18, %v2622_v32  ;;  %v1275_v36 = vadd.f32 %v1243_v7, %v1174_v61  ;;  %v1276_v45 = vadd.f32 %v1244_v17, %v1175_v24  ;;  %v1090_v54 = vld [vmem:[#allocation3 + $0x290] sm:$0xff]  ;;  %v5817_v48 = vld [vmem:[#allocation3 + $0x168] sm:$0xff]  ;;  %v5819_v50 = vld [vmem:[#allocation3 + $0x3e0] sm:$0xff] }
 0x139   : > { %v1648_v63 = vmul.f32 %v6965_v60, %v5778_v30  ;;  %v1748_v40 = vmul.f32 %v5724_v57, %v6966_v23  ;;  %v1749_v13 = vmul.f32 %v5726_v10, %v6966_v23  ;;  %v1849_v21 = vmul.f32 %v5783_v42, %v5791_v33  ;;  %v1191_v38 = vld [vmem:[#allocation3 + $0x3d0] sm:$0xff]  ;;  %v696_v7 = vld [vmem:[#allocation2 + $0x247] sm:$0xff] }
 0x13a   : > { %v2823_v62 = vadd.f32 %v2791_v1, %v2722_v14  ;;  %v2824_v0 = vadd.f32 %v2792_v8, %v2723_v58  ;;  %v1376_v18 = vadd.f32 %v1344_v44, %v1275_v36  ;;  %v1377_v34 = vadd.f32 %v1345_v37, %v1276_v45  ;;  %v697_v61 = vld [vmem:[#allocation2 + $0x24f] sm:$0xff]  ;;  %737 = vst.msk [vmem:[#allocation3 + $0x260] sm:$0xff] %vm465_vm0, %v696_v7  ;;  %v5829_v45 = vld [vmem:[#allocation3 + $0x178] sm:$0xff] }
 0x13b   : > { %v1850_v27 = vmul.f32 %v5783_v42, %v5796_v3  ;;  %v1025_v11 = vmul.f32 %v5756_v20, %v989_v46  ;;  %v1026_v19 = vmul.f32 %v5756_v20, %v990_v25  ;;  %v1126_v6 = vmul.f32 %v6961_v22, %v1090_v54  ;;  %v5825_v58 = vld [vmem:[#allocation3 + $0x3e8] sm:$0xff]  ;;  %v5827_v36 = vld [vmem:[#allocation3 + $0x170] sm:$0xff]  ;;  %738 = vst.msk [vmem:[#allocation3 + $0x268] sm:$0xff] %vm465_vm0, %v697_v61 }
 0x13c   : > { %v2862_v1 = vadd.f32 %v5744_v31, %v2823_v62  ;;  %v2863_v8 = vadd.f32 %v5744_v31, %v2824_v0  ;;  %v1477_v9 = vadd.f32 %v6967_v56, %v1376_v18  ;;  %v1478_v55 = vadd.f32 %v6968_v39, %v1377_v34  ;;  %v5850_v56 = vld [vmem:[#allocation3 + $0x3f8] sm:$0xff] }
 0x13d   : > { %v1127_v44 = vmul.f32 %v6961_v22, %v1091_v53  ;;  %v1227_v28 = vmul.f32 %v6962_v43, %v1191_v38  ;;  %v1228_v32 = vmul.f32 %v6962_v43, %v1192_v26  ;;  %v1158_v37 = vadd.f32 %v1126_v6, %v1025_v11  ;;  %v5840_v53 = vld [vmem:[#allocation3 + $0x2b8] sm:$0xff]  ;;  %v5842_v38 = vld [vmem:[#allocation3 + $0x3f0] sm:$0xff]  ;;  %v5858_v6 = vld [vmem:[%s6800_s2] ss:$0 sm:$0xff] }
 0x13e   : > { %v2894_v17 = vmax.f32 %v2862_v1, 0.0  ;;  %v2895_v31 = vmax.f32 %v2863_v8, 0.0  ;;  %v1578_v24 = vadd.f32 %v1546_v49, %v1477_v9  ;;  %v1579_v14 = vadd.f32 %v1547_v29, %v1478_v55  ;;  %v5838_v29 = vld [vmem:[#allocation3 + $0x2b0] sm:$0xff] }
 0x13f   : > { %v1159_v46 = vadd.f32 %v1127_v44, %v1026_v19  ;;  %v1328_v25 = vmul.f32 %v6963_v59, %v5811_v12  ;;  %v1329_v62 = vmul.f32 %v6963_v59, %v5817_v48  ;;  %v1530_v49 = vmul.f32 %v6964_v16, %v5819_v50  ;;  %v858_v26 = vld [vmem:[#allocation2 + $0x249] sm:$0xff] }
 0x140   : > { %v2935_v54 = vpack.c.bf16 %v2895_v31, %v2894_v17  ;;  %v1679_v0 = vadd.f32 %v1647_v4, %v1578_v24  ;;  %v1680_v18 = vadd.f32 %v1648_v63, %v1579_v14  ;;  %v1259_v34 = vadd.f32 %v1227_v28, %v1158_v37  ;;  %v859_v4 = vld [vmem:[#allocation2 + $0x251] sm:$0xff]  ;;  %899 = vst.msk [vmem:[#allocation3 + $0x4e0] sm:$0xff] %vm465_vm0, %v858_v26 }
 0x141   : > { %v1260_v1 = vadd.f32 %v1228_v32, %v1159_v46  ;;  %v1531_v11 = vmul.f32 %v6964_v16, %v5825_v58  ;;  %v1631_v19 = vmul.f32 %v6965_v60, %v5827_v36  ;;  %v1632_v8 = vmul.f32 %v6965_v60, %v5829_v45  ;;  %900 = vst.msk [vmem:[#allocation3 + $0x4e8] sm:$0xff] %vm465_vm0, %v859_v4  ;;  %v6969_v32 = vld [vmem:[#allocation34_spill] sm:$0xff]  ;;  %v6970_v24 = vld [vmem:[#allocation35_spill] sm:$0xff] }
 0x142   : > { %v2990_v63 = vsel %vm465_vm0, %v2935_v54, 0  ;;  %v1780_v9 = vadd.f32 %v1748_v40, %v1679_v0  ;;  %v1781_v39 = vadd.f32 %v1749_v13, %v1680_v18  ;;  %v1360_v55 = vadd.f32 %v1328_v25, %v1259_v34 }
 0x143   : > { %3757 = vmatpush3.bf16.xpose.msra.mxu0 %v2990_v63  ;;  %v1361_v7 = vadd.f32 %v1329_v62, %v1260_v1  ;;  %v1732_v17 = vmul.f32 %v6966_v23, %v5838_v29  ;;  %v1733_v44 = vmul.f32 %v6966_v23, %v5840_v53  ;;  %v1833_v40 = vmul.f32 %v5783_v42, %v5842_v38 }
 0x144   : > { %v1881_v13 = vadd.f32 %v1849_v21, %v1780_v9  ;;  %v1882_v28 = vadd.f32 %v1850_v27, %v1781_v39  ;;  %v1461_v61 = vadd.f32 %v6969_v32, %v1360_v55  ;;  %v1834_v31 = vmul.f32 %v5783_v42, %v5850_v56  ;;  %v3980_v39 = vld [vmem:[#allocation3 + $0x330] sm:$0xff] }
 0x145   : > { %v1462_v14 = vadd.f32 %v6970_v24, %v1361_v7  ;;  %v1043_v37 = vmul.f32 %v5758_v52, %v5756_v20  ;;  %v1044_v46 = vmul.f32 %v5766_v51, %v5756_v20  ;;  %v1144_v25 = vmul.f32 %v5635_v15, %v6961_v22  ;;  %v5895_v7 = vld [vmem:[#allocation3 + $0x208] sm:$0xff] }
 0x146   : > { %v1920_v62 = vadd.f32 %v5858_v6, %v1881_v13  ;;  %v1921_v21 = vadd.f32 %v5858_v6, %v1882_v28  ;;  %v1562_v27 = vadd.f32 %v1530_v49, %v1461_v61  ;;  %v1145_v54 = vmul.f32 %v5642_v47, %v6961_v22  ;;  %v5897_v13 = vld [vmem:[#allocation3 + $0x340] sm:$0xff]  ;;  %v3981_v61 = vld [vmem:[#allocation3 + $0x338] sm:$0xff] }
 0x147   : > { %v1563_v0 = vadd.f32 %v1531_v11, %v1462_v14  ;;  %v1176_v18 = vadd.f32 %v1144_v25, %v1043_v37  ;;  %v1245_v34 = vmul.f32 %v5768_v41, %v6962_v43  ;;  %v1246_v52 = vmul.f32 %v5770_v2, %v6962_v43  ;;  %v5888_v11 = vld [vmem:[#allocation3 + $0x200] sm:$0xff]  ;;  %v5902_v37 = vld [vmem:[#allocation3 + $0x348] sm:$0xff] }
 0x148   : > { %v1952_v51 = vmax.f32 %v1920_v62, 0.0  ;;  %v1953_v26 = vmax.f32 %v1921_v21, 0.0  ;;  %v1663_v1 = vadd.f32 %v1631_v19, %v1562_v27  ;;  %v1177_v15 = vadd.f32 %v1145_v54, %v1044_v46  ;;  %v3979_v41 = vld [vmem:[%s6804_s6] sm:$0xff]   ;;  %v5911_v21 = vld [vmem:[#allocation3 + $0x488] sm:$0xff] }
 0x149   : > { %v1664_v4 = vadd.f32 %v1632_v8, %v1563_v0  ;;  %v1277_v63 = vadd.f32 %v1245_v34, %v1176_v18  ;;  %v1346_v49 = vmul.f32 %v5776_v35, %v6963_v59  ;;  %v1347_v47 = vmul.f32 %v5778_v30, %v6963_v59  ;;  %v6971_v8 = vld [vmem:[#allocation28_spill] sm:$0xff]  ;;  %v5904_v46 = vld [vmem:[#allocation3 + $0x480] sm:$0xff]  ;;  %v3949_v27 = vld [vmem:[%s6804_s6 + $0x8] sm:$0xff]  }
 0x14a   : > { %v2920_v9 = vpack.c.bf16 %v1953_v26, %v1952_v51  ;;  %3759 = vmatmul.mubr.msk.bf16.vlgmr.msra.gmra.mrb[0].mxu0 %vm465_vm0, %v3979_v41  ;;  %v1764_v2 = vadd.f32 %v1732_v17, %v1663_v1  ;;  %v1278_v19 = vadd.f32 %v1246_v52, %v1177_v15  ;;  %v1447_v55 = vmul.f32 %v3980_v39, %v6971_v8  ;;  %v1092_v34 = vld [vmem:[#allocation3 + $0x2a0] sm:$0xff]  ;;  %v1093_v15 = vld [vmem:[#allocation3 + $0x2a8] sm:$0xff] }
 0x14b   : > { %v1765_v28 = vadd.f32 %v1733_v44, %v1664_v4  ;;  %v1378_v32 = vadd.f32 %v1346_v49, %v1277_v63  ;;  %v1448_v24 = vmul.f32 %v3981_v61, %v6971_v8  ;;  %v1548_v14 = vmul.f32 %v5791_v33, %v6964_v16  ;;  %3760 = vmatprep.mubr.msk.bf16.mxu0 %vm465_vm0, %v3949_v27 }
 0x14c   : > { %3886 = vmatprep.subr.msk.bf16.mxu0 %vm465_vm0, %v2920_v9  ;;  %v1865_v17 = vadd.f32 %v1833_v40, %v1764_v2  ;;  %v1379_v25 = vadd.f32 %v1347_v47, %v1278_v19  ;;  %v1549_v62 = vmul.f32 %v5796_v3, %v6964_v16  ;;  %v1649_v44 = vmul.f32 %v6965_v60, %v5888_v11 }
 0x14d   : > { %v1866_v54 = vadd.f32 %v1834_v31, %v1765_v28  ;;  %v1479_v0 = vadd.f32 %v1447_v55, %v1378_v32  ;;  %v1650_v18 = vmul.f32 %v6965_v60, %v5895_v7  ;;  %v1750_v40 = vmul.f32 %v6966_v23, %v5897_v13 }
 0x14e   : > { %v1904_v52 = vadd.f32 %v5858_v6, %v1865_v17  ;;  %v1480_v51 = vadd.f32 %v1448_v24, %v1379_v25  ;;  %v1751_v26 = vmul.f32 %v6966_v23, %v5902_v37  ;;  %v1851_v1 = vmul.f32 %v5783_v42, %v5904_v46 }
 0x14f   : > { %v1905_v31 = vadd.f32 %v5858_v6, %v1866_v54  ;;  %v1580_v4 = vadd.f32 %v1548_v14, %v1479_v0  ;;  %v1852_v63 = vmul.f32 %v5783_v42, %v5911_v21  ;;  %v1027_v49 = vmul.f32 %v5811_v12, %v5756_v20  ;;  %v3982_v54 = vld [vmem:[#allocation3 + $0x2b0] sm:$0xff] }
 0x150   : > { %v1936_v47 = vmax.f32 %v1904_v52, 0.0  ;;  %v1581_v9 = vadd.f32 %v1549_v62, %v1480_v51  ;;  %v1028_v41 = vmul.f32 %v5817_v48, %v5756_v20  ;;  %v1128_v2 = vmul.f32 %v6961_v22, %v1092_v34  ;;  %v5944_v62 = vld [vmem:[#allocation3 + $0x180] sm:$0xff]  ;;  %v5948_v34 = vld [vmem:[#allocation3 + $0x188] sm:$0xff] }
 0x151   : > { %v1937_v19 = vmax.f32 %v1905_v31, 0.0  ;;  %v1681_v39 = vadd.f32 %v1649_v44, %v1580_v4  ;;  %v1129_v55 = vmul.f32 %v6961_v22, %v1093_v15  ;;  %v1229_v28 = vmul.f32 %v5819_v50, %v6962_v43  ;;  %v5950_v52 = vld [vmem:[#allocation3 + $0x2c0] sm:$0xff]  ;;  %v5955_v31 = vld [vmem:[#allocation3 + $0x2c8] sm:$0xff] }
 0x152   : > { %v1682_v32 = vadd.f32 %v1650_v18, %v1581_v9  ;;  %v1160_v61 = vadd.f32 %v1128_v2, %v1027_v49  ;;  %v1230_v24 = vmul.f32 %v5825_v58, %v6962_v43  ;;  %v1330_v12 = vmul.f32 %v5827_v36, %v6963_v59  ;;  %3761 = vmatmul.mubr.msk.bf16.gmra.mrb[4].mxu0 %vm465_vm0, %v3949_v27  ;;  %v3983_v18 = vld [vmem:[#allocation3 + $0x2b8] sm:$0xff] }
 0x153   : > { %v2912_v48 = vpack.c.bf16 %v1937_v19, %v1936_v47  ;;  %v1782_v14 = vadd.f32 %v1750_v40, %v1681_v39  ;;  %v1161_v17 = vadd.f32 %v1129_v55, %v1028_v41  ;;  %v1331_v25 = vmul.f32 %v5829_v45, %v6963_v59  ;;  %v5963_v41 = vld [vmem:[#allocation3 + $0x408] sm:$0xff] }
 0x154   : > { %v1783_v44 = vadd.f32 %v1751_v26, %v1682_v32  ;;  %v1261_v50 = vadd.f32 %v1229_v28, %v1160_v61  ;;  %v1431_v0 = vmul.f32 %v3982_v54, %v6971_v8  ;;  %v1432_v58 = vmul.f32 %v3983_v18, %v6971_v8  ;;  %v5957_v26 = vld [vmem:[#allocation3 + $0x400] sm:$0xff] }
 0x155   : > { %v3086_v27 = vsel %vm465_vm0, %v2912_v48, 0  ;;  %v1883_v40 = vadd.f32 %v1851_v1, %v1782_v14  ;;  %v1262_v51 = vadd.f32 %v1230_v24, %v1161_v17  ;;  %v1532_v15 = vmul.f32 %v5842_v38, %v6964_v16 }
 0x156   : > { %3763 = vmatpush3.bf16.xpose.msra.mxu0 %v3086_v27  ;;  %v1884_v4 = vadd.f32 %v1852_v63, %v1783_v44  ;;  %v1362_v49 = vadd.f32 %v1330_v12, %v1261_v50  ;;  %v1533_v47 = vmul.f32 %v5850_v56, %v6964_v16  ;;  %v1633_v9 = vmul.f32 %v6965_v60, %v5944_v62 }
 0x157   : > { %v1922_v1 = vadd.f32 %v5858_v6, %v1883_v40  ;;  %v1363_v2 = vadd.f32 %v1331_v25, %v1262_v51  ;;  %v1634_v19 = vmul.f32 %v6965_v60, %v5948_v34  ;;  %v1734_v39 = vmul.f32 %v6966_v23, %v5950_v52 }
 0x158   : > { %v1923_v63 = vadd.f32 %v5858_v6, %v1884_v4  ;;  %v1463_v55 = vadd.f32 %v1431_v0, %v1362_v49  ;;  %v1735_v28 = vmul.f32 %v6966_v23, %v5955_v31  ;;  %v1835_v32 = vmul.f32 %v5783_v42, %v5957_v26  ;;  %v5998_v49 = vld [vmem:[#allocation3 + $0x350] sm:$0xff] }
 0x159   : > { %v1954_v61 = vmax.f32 %v1922_v1, 0.0  ;;  %v1464_v24 = vadd.f32 %v1432_v58, %v1363_v2  ;;  %v1836_v12 = vmul.f32 %v5783_v42, %v5963_v41  ;;  %v1045_v48 = vmul.f32 %v5776_v35, %v5756_v20 }
 0x15a   : > { %v1955_v14 = vmax.f32 %v1923_v63, 0.0  ;;  %v1564_v17 = vadd.f32 %v1532_v15, %v1463_v55  ;;  %v1046_v25 = vmul.f32 %v5778_v30, %v5756_v20  ;;  %v1146_v44 = vmul.f32 %v5724_v57, %v6961_v22  ;;  %v5991_v30 = vld [vmem:[#allocation3 + $0x210] sm:$0xff] }
 0x15b   : > { %v1565_v50 = vadd.f32 %v1533_v47, %v1464_v24  ;;  %v1147_v54 = vmul.f32 %v5726_v10, %v6961_v22  ;;  %v1247_v0 = vmul.f32 %v5791_v33, %v6962_v43  ;;  %v1248_v18 = vmul.f32 %v5796_v3, %v6962_v43  ;;  %v3984_v10 = vld [vmem:[#allocation3 + $0x340] sm:$0xff]  ;;  %v5996_v33 = vld [vmem:[#allocation3 + $0x218] sm:$0xff]  ;;  %v6006_v63 = vld [vmem:[#allocation3 + $0x490] sm:$0xff] }
 0x15c   : > { %v2921_v58 = vpack.c.bf16 %v1955_v14, %v1954_v61  ;;  %v1665_v35 = vadd.f32 %v1633_v9, %v1564_v17  ;;  %v1178_v27 = vadd.f32 %v1146_v44, %v1045_v48  ;;  %v1348_v40 = vmul.f32 %v5888_v11, %v6963_v59  ;;  %v3985_v9 = vld [vmem:[#allocation3 + $0x348] sm:$0xff] }
 0x15d   : > { %v1666_v51 = vadd.f32 %v1634_v19, %v1565_v50  ;;  %v1179_v57 = vadd.f32 %v1147_v54, %v1046_v25  ;;  %v1349_v15 = vmul.f32 %v5895_v7, %v6963_v59  ;;  %v1449_v4 = vmul.f32 %v3984_v10, %v6971_v8  ;;  %v6004_v19 = vld [vmem:[#allocation3 + $0x358] sm:$0xff] }
 0x15e   : > { %3887 = vmatprep.subr.msk.bf16.mxu0 %vm465_vm0, %v2921_v58  ;;  %v1766_v3 = vadd.f32 %v1734_v39, %v1665_v35  ;;  %v1279_v47 = vadd.f32 %v1247_v0, %v1178_v27  ;;  %v1450_v1 = vmul.f32 %v3985_v9, %v6971_v8  ;;  %v1550_v2 = vmul.f32 %v5904_v46, %v6964_v16  ;;  %v6012_v39 = vld [vmem:[#allocation3 + $0x498] sm:$0xff] }
 0x15f   : > { %v1767_v55 = vadd.f32 %v1735_v28, %v1666_v51  ;;  %v1280_v61 = vadd.f32 %v1248_v18, %v1179_v57  ;;  %v1551_v24 = vmul.f32 %v5911_v21, %v6964_v16  ;;  %v1651_v48 = vmul.f32 %v6965_v60, %v5991_v30  ;;  %v3950_v28 = vld [vmem:[%s6803_s5] sm:$0xff]  }
 0x160   : > { %v1867_v14 = vadd.f32 %v1835_v32, %v1766_v3  ;;  %v1380_v17 = vadd.f32 %v1348_v40, %v1279_v47  ;;  %v1652_v25 = vmul.f32 %v6965_v60, %v5996_v33  ;;  %v1752_v44 = vmul.f32 %v6966_v23, %v5998_v49  ;;  %3778 = vmatprep.mubr.msk.bf16.mxu0 %vm465_vm0, %v3950_v28  ;;  %v6047_v28 = vld [vmem:[#allocation3 + $0x190] sm:$0xff] }
 0x161   : > { %v1868_v50 = vadd.f32 %v1836_v12, %v1767_v55  ;;  %v1381_v54 = vadd.f32 %v1349_v15, %v1280_v61  ;;  %v1753_v0 = vmul.f32 %v6966_v23, %v6004_v19  ;;  %v1853_v18 = vmul.f32 %v5783_v42, %v6006_v63 }
 0x162   : > { %v1906_v32 = vadd.f32 %v5858_v6, %v1867_v14  ;;  %v1481_v58 = vadd.f32 %v1449_v4, %v1380_v17  ;;  %v1854_v35 = vmul.f32 %v5783_v42, %v6012_v39  ;;  %v1029_v27 = vmul.f32 %v5827_v36, %v5756_v20  ;;  %v3986_v17 = vld [vmem:[#allocation3 + $0x2c0] sm:$0xff] }
 0x163   : > { %v1907_v12 = vadd.f32 %v5858_v6, %v1868_v50  ;;  %v1482_v40 = vadd.f32 %v1450_v1, %v1381_v54  ;;  %v1030_v51 = vmul.f32 %v5829_v45, %v5756_v20  ;;  %v1130_v57 = vmul.f32 %v5838_v29, %v6961_v22 }
 0x164   : > { %v1938_v15 = vmax.f32 %v1906_v32, 0.0  ;;  %v1582_v10 = vadd.f32 %v1550_v2, %v1481_v58  ;;  %v1131_v4 = vmul.f32 %v5840_v53, %v6961_v22  ;;  %v1231_v3 = vmul.f32 %v5842_v38, %v6962_v43  ;;  %v6054_v58 = vld [vmem:[#allocation3 + $0x2d0] sm:$0xff] }
 0x165   : > { %v1939_v36 = vmax.f32 %v1907_v12, 0.0  ;;  %v1583_v47 = vadd.f32 %v1551_v24, %v1482_v40  ;;  %v1162_v9 = vadd.f32 %v1130_v57, %v1029_v27  ;;  %v1232_v1 = vmul.f32 %v5850_v56, %v6962_v43  ;;  %v6049_v24 = vld [vmem:[#allocation3 + $0x198] sm:$0xff]  ;;  %v6061_v57 = vld [vmem:[#allocation3 + $0x410] sm:$0xff] }
 0x166   : > { %v1683_v55 = vadd.f32 %v1651_v48, %v1582_v10  ;;  %v1163_v61 = vadd.f32 %v1131_v4, %v1030_v51  ;;  %v1332_v45 = vmul.f32 %v5944_v62, %v6963_v59  ;;  %v1333_v29 = vmul.f32 %v5948_v34, %v6963_v59  ;;  %v3987_v48 = vld [vmem:[#allocation3 + $0x2c8] sm:$0xff]  ;;  %v6056_v27 = vld [vmem:[#allocation3 + $0x2d8] sm:$0xff] }
 0x167   : > { %v2913_v2 = vpack.c.bf16 %v1939_v36, %v1938_v15  ;;  %v1684_v14 = vadd.f32 %v1652_v25, %v1583_v47  ;;  %v1263_v53 = vadd.f32 %v1231_v3, %v1162_v9  ;;  %v1433_v38 = vmul.f32 %v3986_v17, %v6971_v8 }
 0x168   : > { %v1784_v50 = vadd.f32 %v1752_v44, %v1683_v55  ;;  %v1264_v56 = vadd.f32 %v1232_v1, %v1163_v61  ;;  %v1434_v54 = vmul.f32 %v3987_v48, %v6971_v8  ;;  %v1534_v32 = vmul.f32 %v5957_v26, %v6964_v16  ;;  %v6063_v44 = vld [vmem:[#allocation3 + $0x418] sm:$0xff] }
 0x169   : > { %v3089_v25 = vsel %vm465_vm0, %v2913_v2, 0  ;;  %v1785_v12 = vadd.f32 %v1753_v0, %v1684_v14  ;;  %v1364_v40 = vadd.f32 %v1332_v45, %v1263_v53  ;;  %v1535_v51 = vmul.f32 %v5963_v41, %v6964_v16 }
 0x16a   : > { %3765 = vmatpush3.bf16.xpose.msra.mxu0 %v3089_v25  ;;  %v1885_v15 = vadd.f32 %v1853_v18, %v1784_v50  ;;  %v1365_v10 = vadd.f32 %v1333_v29, %v1264_v56  ;;  %v1635_v4 = vmul.f32 %v6965_v60, %v6047_v28  ;;  %v1636_v3 = vmul.f32 %v6965_v60, %v6049_v24 }
 0x16b   : > { %v1886_v36 = vadd.f32 %v1854_v35, %v1785_v12  ;;  %v1465_v47 = vadd.f32 %v1433_v38, %v1364_v40  ;;  %v1736_v0 = vmul.f32 %v6966_v23, %v6054_v58  ;;  %v1737_v9 = vmul.f32 %v6966_v23, %v6056_v27  ;;  %v6093_v12 = vld [vmem:[#allocation3 + $0x220] sm:$0xff] }
 0x16c   : > { %v1924_v1 = vadd.f32 %v5858_v6, %v1885_v15  ;;  %v1466_v55 = vadd.f32 %v1434_v54, %v1365_v10  ;;  %v1837_v18 = vmul.f32 %v5783_v42, %v6061_v57  ;;  %v1838_v61 = vmul.f32 %v5783_v42, %v6063_v44 }
 0x16d   : > { %v1925_v45 = vadd.f32 %v5858_v6, %v1886_v36  ;;  %v1566_v29 = vadd.f32 %v1534_v32, %v1465_v47  ;;  %v1047_v35 = vmul.f32 %v5888_v11, %v5756_v20  ;;  %v1048_v2 = vmul.f32 %v5895_v7, %v5756_v20  ;;  %v6101_v47 = vld [vmem:[#allocation3 + $0x360] sm:$0xff] }
 0x16e   : > { %v1956_v14 = vmax.f32 %v1924_v1, 0.0  ;;  %v1567_v53 = vadd.f32 %v1535_v51, %v1466_v55  ;;  %v1148_v17 = vmul.f32 %v5897_v13, %v6961_v22  ;;  %v1149_v38 = vmul.f32 %v5902_v37, %v6961_v22  ;;  %v3988_v51 = vld [vmem:[#allocation3 + $0x350] sm:$0xff]  ;;  %v6103_v1 = vld [vmem:[#allocation3 + $0x368] sm:$0xff]  ;;  %v6105_v55 = vld [vmem:[#allocation3 + $0x4a0] sm:$0xff] }
 0x16f   : > { %v1957_v50 = vmax.f32 %v1925_v45, 0.0  ;;  %v1667_v56 = vadd.f32 %v1635_v4, %v1566_v29  ;;  %v1249_v48 = vmul.f32 %v5904_v46, %v6962_v43  ;;  %v1250_v54 = vmul.f32 %v5911_v21, %v6962_v43  ;;  %v6098_v46 = vld [vmem:[#allocation3 + $0x228] sm:$0xff] }
 0x170   : > { %v1668_v11 = vadd.f32 %v1636_v3, %v1567_v53  ;;  %v1180_v32 = vadd.f32 %v1148_v17, %v1047_v35  ;;  %v1181_v25 = vadd.f32 %v1149_v38, %v1048_v2  ;;  %v1350_v7 = vmul.f32 %v5991_v30, %v6963_v59  ;;  %v3989_v3 = vld [vmem:[#allocation3 + $0x358] sm:$0xff]  ;;  %v6114_v35 = vld [vmem:[#allocation3 + $0x4a8] sm:$0xff] }
 0x171   : > { %v2922_v13 = vpack.c.bf16 %v1957_v50, %v1956_v14  ;;  %v1768_v40 = vadd.f32 %v1736_v0, %v1667_v56  ;;  %v1351_v37 = vmul.f32 %v5996_v33, %v6963_v59  ;;  %v1451_v15 = vmul.f32 %v3988_v51, %v6971_v8 }
 0x172   : > { %v1769_v10 = vadd.f32 %v1737_v9, %v1668_v11  ;;  %v1281_v21 = vadd.f32 %v1249_v48, %v1180_v32  ;;  %v1282_v4 = vadd.f32 %v1250_v54, %v1181_v25  ;;  %v1452_v36 = vmul.f32 %v3989_v3, %v6971_v8 }
 0x173   : > { %3888 = vmatprep.subr.msk.bf16.mxu0 %vm465_vm0, %v2922_v13  ;;  %v1869_v0 = vadd.f32 %v1837_v18, %v1768_v40  ;;  %v1552_v45 = vmul.f32 %v6006_v63, %v6964_v16  ;;  %v1553_v9 = vmul.f32 %v6012_v39, %v6964_v16  ;;  %v1653_v29 = vmul.f32 %v6965_v60, %v6093_v12 }
 0x174   : > { %v1870_v2 = vadd.f32 %v1838_v61, %v1769_v10  ;;  %v1382_v14 = vadd.f32 %v1350_v7, %v1281_v21  ;;  %v1383_v53 = vadd.f32 %v1351_v37, %v1282_v4  ;;  %v1654_v17 = vmul.f32 %v6965_v60, %v6098_v46 }
 0x175   : > { %v1908_v38 = vadd.f32 %v5858_v6, %v1869_v0  ;;  %v1754_v18 = vmul.f32 %v6966_v23, %v6101_v47  ;;  %v1755_v50 = vmul.f32 %v6966_v23, %v6103_v1  ;;  %v1855_v56 = vmul.f32 %v5783_v42, %v6105_v55  ;;  %v6142_v0 = vld [vmem:[#allocation3 + $0x1a0] sm:$0xff] }
 0x176   : > { %v1909_v48 = vadd.f32 %v5858_v6, %v1870_v2  ;;  %v1483_v54 = vadd.f32 %v1451_v15, %v1382_v14  ;;  %v1484_v61 = vadd.f32 %v1452_v36, %v1383_v53  ;;  %v1856_v11 = vmul.f32 %v5783_v42, %v6114_v35 }
 0x177   : > { %v1940_v32 = vmax.f32 %v1908_v38, 0.0  ;;  %v1031_v25 = vmul.f32 %v5944_v62, %v5756_v20  ;;  %v1032_v7 = vmul.f32 %v5948_v34, %v5756_v20  ;;  %v1132_v13 = vmul.f32 %v5950_v52, %v6961_v22 }
 0x178   : > { %v1941_v40 = vmax.f32 %v1909_v48, 0.0  ;;  %v1584_v37 = vadd.f32 %v1552_v45, %v1483_v54  ;;  %v1585_v51 = vadd.f32 %v1553_v9, %v1484_v61  ;;  %v1133_v15 = vmul.f32 %v5955_v31, %v6961_v22  ;;  %v3990_v9 = vld [vmem:[#allocation3 + $0x2d0] sm:$0xff]  ;;  %v6151_v48 = vld [vmem:[#allocation3 + $0x2e0] sm:$0xff]  ;;  %v6153_v54 = vld [vmem:[#allocation3 + $0x2e8] sm:$0xff] }
 0x179   : > { %v1164_v10 = vadd.f32 %v1132_v13, %v1031_v25  ;;  %v1233_v21 = vmul.f32 %v5957_v26, %v6962_v43  ;;  %v1234_v4 = vmul.f32 %v5963_v41, %v6962_v43  ;;  %v1334_v62 = vmul.f32 %v6047_v28, %v6963_v59  ;;  %v3991_v26 = vld [vmem:[#allocation3 + $0x2d8] sm:$0xff]  ;;  %v6148_v41 = vld [vmem:[#allocation3 + $0x1a8] sm:$0xff]  ;;  %v6155_v61 = vld [vmem:[#allocation3 + $0x420] sm:$0xff] }
 0x17a   : > { %v2914_v34 = vpack.c.bf16 %v1941_v40, %v1940_v32  ;;  %v1685_v3 = vadd.f32 %v1653_v29, %v1584_v37  ;;  %v1686_v36 = vadd.f32 %v1654_v17, %v1585_v51  ;;  %v1165_v52 = vadd.f32 %v1133_v15, %v1032_v7 }
 0x17b   : > { %v1265_v45 = vadd.f32 %v1233_v21, %v1164_v10  ;;  %v1335_v31 = vmul.f32 %v6049_v24, %v6963_v59  ;;  %v1435_v2 = vmul.f32 %v3990_v9, %v6971_v8  ;;  %v1436_v14 = vmul.f32 %v3991_v26, %v6971_v8 }
 0x17c   : > { %v3092_v53 = vsel %vm465_vm0, %v2914_v34, 0  ;;  %v1786_v38 = vadd.f32 %v1754_v18, %v1685_v3  ;;  %v1787_v29 = vadd.f32 %v1755_v50, %v1686_v36  ;;  %v1266_v17 = vadd.f32 %v1234_v4, %v1165_v52  ;;  %v6163_v18 = vld [vmem:[#allocation3 + $0x428] sm:$0xff] }
 0x17d   : > { %3767 = vmatpush3.bf16.xpose.msra.mxu0 %v3092_v53  ;;  %v1366_v32 = vadd.f32 %v1334_v62, %v1265_v45  ;;  %v1536_v25 = vmul.f32 %v6061_v57, %v6964_v16  ;;  %v1537_v7 = vmul.f32 %v6063_v44, %v6964_v16  ;;  %v1637_v13 = vmul.f32 %v6965_v60, %v6142_v0 }
 0x17e   : > { %v1887_v50 = vadd.f32 %v1855_v56, %v1786_v38  ;;  %v1888_v40 = vadd.f32 %v1856_v11, %v1787_v29  ;;  %v1367_v37 = vadd.f32 %v1335_v31, %v1266_v17  ;;  %v1638_v51 = vmul.f32 %v6965_v60, %v6148_v41 }
 0x17f   : > { %v1467_v15 = vadd.f32 %v1435_v2, %v1366_v32  ;;  %v1738_v10 = vmul.f32 %v6966_v23, %v6151_v48  ;;  %v1739_v21 = vmul.f32 %v6966_v23, %v6153_v54  ;;  %v1839_v4 = vmul.f32 %v5783_v42, %v6155_v61  ;;  %v6191_v32 = vld [vmem:[#allocation3 + $0x230] sm:$0xff] }
 0x180   : > { %v1926_v62 = vadd.f32 %v5858_v6, %v1887_v50  ;;  %v1927_v34 = vadd.f32 %v5858_v6, %v1888_v40  ;;  %v1468_v56 = vadd.f32 %v1436_v14, %v1367_v37  ;;  %v1840_v11 = vmul.f32 %v5783_v42, %v6163_v18  ;;  %v6198_v40 = vld [vmem:[#allocation3 + $0x370] sm:$0xff] }
 0x181   : > { %v1568_v3 = vadd.f32 %v1536_v25, %v1467_v15  ;;  %v1049_v36 = vmul.f32 %v5991_v30, %v5756_v20  ;;  %v1050_v52 = vmul.f32 %v5996_v33, %v5756_v20  ;;  %v1150_v45 = vmul.f32 %v5998_v49, %v6961_v22 }
 0x182   : > { %v1958_v31 = vmax.f32 %v1926_v62, 0.0  ;;  %v1959_v9 = vmax.f32 %v1927_v34, 0.0  ;;  %v1569_v2 = vadd.f32 %v1537_v7, %v1468_v56  ;;  %v1151_v26 = vmul.f32 %v6004_v19, %v6961_v22  ;;  %v6204_v62 = vld [vmem:[#allocation3 + $0x378] sm:$0xff]  ;;  %v6206_v34 = vld [vmem:[#allocation3 + $0x4b0] sm:$0xff] }
 0x183   : > { %v1669_v14 = vadd.f32 %v1637_v13, %v1568_v3  ;;  %v1182_v53 = vadd.f32 %v1150_v45, %v1049_v36  ;;  %v1251_v38 = vmul.f32 %v6006_v63, %v6962_v43  ;;  %v1252_v30 = vmul.f32 %v6012_v39, %v6962_v43  ;;  %v3992_v13 = vld [vmem:[#allocation3 + $0x360] sm:$0xff]  ;;  %v6196_v63 = vld [vmem:[#allocation3 + $0x238] sm:$0xff] }
 0x184   : > { %v2923_v29 = vpack.c.bf16 %v1959_v9, %v1958_v31  ;;  %v1670_v17 = vadd.f32 %v1638_v51, %v1569_v2  ;;  %v1183_v33 = vadd.f32 %v1151_v26, %v1050_v52  ;;  %v1352_v49 = vmul.f32 %v6093_v12, %v6963_v59  ;;  %v3993_v51 = vld [vmem:[#allocation3 + $0x368] sm:$0xff] }
 0x185   : > { %v1770_v25 = vadd.f32 %v1738_v10, %v1669_v14  ;;  %v1283_v7 = vadd.f32 %v1251_v38, %v1182_v53  ;;  %v1353_v19 = vmul.f32 %v6098_v46, %v6963_v59  ;;  %v1453_v50 = vmul.f32 %v3992_v13, %v6971_v8 }
 0x186   : > { %3889 = vmatprep.subr.msk.bf16.mxu0 %vm465_vm0, %v2923_v29  ;;  %v1771_v39 = vadd.f32 %v1739_v21, %v1670_v17  ;;  %v1284_v37 = vadd.f32 %v1252_v30, %v1183_v33  ;;  %v1454_v15 = vmul.f32 %v3993_v51, %v6971_v8  ;;  %v1554_v10 = vmul.f32 %v6105_v55, %v6964_v16  ;;  %v6212_v21 = vld [vmem:[#allocation3 + $0x4b8] sm:$0xff] }
 0x187   : > { %v1871_v56 = vadd.f32 %v1839_v4, %v1770_v25  ;;  %v1384_v3 = vadd.f32 %v1352_v49, %v1283_v7  ;;  %v1555_v36 = vmul.f32 %v6114_v35, %v6964_v16  ;;  %v1655_v52 = vmul.f32 %v6965_v60, %v6191_v32 }
 0x188   : > { %v1872_v45 = vadd.f32 %v1840_v11, %v1771_v39  ;;  %v1385_v31 = vadd.f32 %v1353_v19, %v1284_v37  ;;  %v1656_v9 = vmul.f32 %v6965_v60, %v6196_v63  ;;  %v1756_v2 = vmul.f32 %v6966_v23, %v6198_v40 }
 0x189   : > { %v1910_v26 = vadd.f32 %v5858_v6, %v1871_v56  ;;  %v1485_v4 = vadd.f32 %v1453_v50, %v1384_v3  ;;  %v1757_v14 = vmul.f32 %v6966_v23, %v6204_v62  ;;  %v1857_v53 = vmul.f32 %v5783_v42, %v6206_v34  ;;  %v6242_v56 = vld [vmem:[#allocation3 + $0x1b0] sm:$0xff] }
 0x18a   : > { %v1911_v38 = vadd.f32 %v5858_v6, %v1872_v45  ;;  %v1486_v30 = vadd.f32 %v1454_v15, %v1385_v31  ;;  %v1858_v11 = vmul.f32 %v5783_v42, %v6212_v21  ;;  %v1033_v29 = vmul.f32 %v6047_v28, %v5756_v20  ;;  %v6248_v31 = vld [vmem:[#allocation3 + $0x2f0] sm:$0xff] }
 0x18b   : > { %v1942_v17 = vmax.f32 %v1910_v26, 0.0  ;;  %v1586_v33 = vadd.f32 %v1554_v10, %v1485_v4  ;;  %v1034_v49 = vmul.f32 %v6049_v24, %v5756_v20  ;;  %v1134_v25 = vmul.f32 %v6054_v58, %v6961_v22 }
 0x18c   : > { %v1943_v7 = vmax.f32 %v1911_v38, 0.0  ;;  %v1587_v19 = vadd.f32 %v1555_v36, %v1486_v30  ;;  %v1135_v13 = vmul.f32 %v6056_v27, %v6961_v22  ;;  %v1235_v50 = vmul.f32 %v6061_v57, %v6962_v43  ;;  %v3994_v36 = vld [vmem:[#allocation3 + $0x2e0] sm:$0xff]  ;;  %v6253_v30 = vld [vmem:[#allocation3 + $0x2f8] sm:$0xff] }
 0x18d   : > { %v1687_v39 = vadd.f32 %v1655_v52, %v1586_v33  ;;  %v1166_v37 = vadd.f32 %v1134_v25, %v1033_v29  ;;  %v1236_v28 = vmul.f32 %v6063_v44, %v6962_v43  ;;  %v1336_v51 = vmul.f32 %v6142_v0, %v6963_v59  ;;  %v3995_v52 = vld [vmem:[#allocation3 + $0x2e8] sm:$0xff]  ;;  %v6246_v44 = vld [vmem:[#allocation3 + $0x1b8] sm:$0xff] }
 0x18e   : > { %v2915_v24 = vpack.c.bf16 %v1943_v7, %v1942_v17  ;;  %v1688_v15 = vadd.f32 %v1656_v9, %v1587_v19  ;;  %v1167_v10 = vadd.f32 %v1135_v13, %v1034_v49  ;;  %v1337_v58 = vmul.f32 %v6148_v41, %v6963_v59  ;;  %v6261_v25 = vld [vmem:[#allocation3 + $0x438] sm:$0xff] }
 0x18f   : > { %v1788_v27 = vadd.f32 %v1756_v2, %v1687_v39  ;;  %v1267_v3 = vadd.f32 %v1235_v50, %v1166_v37  ;;  %v1437_v57 = vmul.f32 %v3994_v36, %v6971_v8  ;;  %v1438_v45 = vmul.f32 %v3995_v52, %v6971_v8  ;;  %v6255_v2 = vld [vmem:[#allocation3 + $0x430] sm:$0xff] }
 0x190   : > { %v3095_v9 = vsel %vm465_vm0, %v2915_v24, 0  ;;  %v1789_v26 = vadd.f32 %v1757_v14, %v1688_v15  ;;  %v1268_v4 = vadd.f32 %v1236_v28, %v1167_v10  ;;  %v1538_v38 = vmul.f32 %v6155_v61, %v6964_v16 }
 0x191   : > { %3769 = vmatpush3.bf16.xpose.msra.mxu0 %v3095_v9  ;;  %v1889_v29 = vadd.f32 %v1857_v53, %v1788_v27  ;;  %v1368_v17 = vadd.f32 %v1336_v51, %v1267_v3  ;;  %v1539_v33 = vmul.f32 %v6163_v18, %v6964_v16  ;;  %v1639_v49 = vmul.f32 %v6965_v60, %v6242_v56 }
 0x192   : > { %v1890_v14 = vadd.f32 %v1858_v11, %v1789_v26  ;;  %v1369_v7 = vadd.f32 %v1337_v58, %v1268_v4  ;;  %v1640_v19 = vmul.f32 %v6965_v60, %v6246_v44  ;;  %v1740_v13 = vmul.f32 %v6966_v23, %v6248_v31 }
 0x193   : > { %v1928_v50 = vadd.f32 %v5858_v6, %v1889_v29  ;;  %v1469_v53 = vadd.f32 %v1437_v57, %v1368_v17  ;;  %v1741_v39 = vmul.f32 %v6966_v23, %v6253_v30  ;;  %v1841_v37 = vmul.f32 %v5783_v42, %v6255_v2  ;;  %v6291_v29 = vld [vmem:[#allocation3 + $0x240] sm:$0xff] }
 0x194   : > { %v1929_v28 = vadd.f32 %v5858_v6, %v1890_v14  ;;  %v1470_v51 = vadd.f32 %v1438_v45, %v1369_v7  ;;  %v1842_v11 = vmul.f32 %v5783_v42, %v6261_v25  ;;  %v1051_v24 = vmul.f32 %v6093_v12, %v5756_v20  ;;  %v3997_v14 = vld [vmem:[#allocation3 + $0x378] sm:$0xff]  ;;  %v6297_v7 = vld [vmem:[#allocation3 + $0x380] sm:$0xff] }
 0x195   : > { %v1960_v15 = vmax.f32 %v1928_v50, 0.0  ;;  %v1570_v10 = vadd.f32 %v1538_v38, %v1469_v53  ;;  %v1052_v58 = vmul.f32 %v6098_v46, %v5756_v20  ;;  %v1152_v27 = vmul.f32 %v6101_v47, %v6961_v22  ;;  %v6299_v50 = vld [vmem:[#allocation3 + $0x388] sm:$0xff] }
 0x196   : > { %v1961_v3 = vmax.f32 %v1929_v28, 0.0  ;;  %v1571_v36 = vadd.f32 %v1539_v33, %v1470_v51  ;;  %v1153_v57 = vmul.f32 %v6103_v1, %v6961_v22  ;;  %v1253_v52 = vmul.f32 %v6105_v55, %v6962_v43  ;;  %v6293_v1 = vld [vmem:[#allocation3 + $0x248] sm:$0xff]  ;;  %v3996_v33 = vld [vmem:[#allocation3 + $0x370] sm:$0xff]  ;;  %v6306_v51 = vld [vmem:[#allocation3 + $0x4c0] sm:$0xff] }
 0x197   : > { %v1671_v45 = vadd.f32 %v1639_v49, %v1570_v10  ;;  %v1184_v9 = vadd.f32 %v1152_v27, %v1051_v24  ;;  %v1254_v12 = vmul.f32 %v6114_v35, %v6962_v43  ;;  %v1354_v26 = vmul.f32 %v6191_v32, %v6963_v59  ;;  %v6308_v24 = vld [vmem:[#allocation3 + $0x4c8] sm:$0xff] }
 0x198   : > { %v2924_v46 = vpack.c.bf16 %v1961_v3, %v1960_v15  ;;  %v1672_v4 = vadd.f32 %v1640_v19, %v1571_v36  ;;  %v1185_v38 = vadd.f32 %v1153_v57, %v1052_v58  ;;  %v1355_v47 = vmul.f32 %v6196_v63, %v6963_v59 }
 0x199   : > { %v1772_v17 = vadd.f32 %v1740_v13, %v1671_v45  ;;  %v1285_v55 = vadd.f32 %v1253_v52, %v1184_v9  ;;  %v1455_v49 = vmul.f32 %v3996_v33, %v6971_v8  ;;  %v1456_v35 = vmul.f32 %v3997_v14, %v6971_v8 }
 0x19a   : > { %3890 = vmatprep.subr.msk.bf16.mxu0 %vm465_vm0, %v2924_v46  ;;  %v1773_v19 = vadd.f32 %v1741_v39, %v1672_v4  ;;  %v1286_v53 = vadd.f32 %v1254_v12, %v1185_v38  ;;  %v1556_v28 = vmul.f32 %v6206_v34, %v6964_v16  ;;  %v1557_v13 = vmul.f32 %v6212_v21, %v6964_v16 }
 0x19b   : > { %v1873_v15 = vadd.f32 %v1841_v37, %v1772_v17  ;;  %v1386_v10 = vadd.f32 %v1354_v26, %v1285_v55  ;;  %v1657_v58 = vmul.f32 %v6965_v60, %v6291_v29  ;;  %v1658_v27 = vmul.f32 %v6965_v60, %v6293_v1 }
 0x19c   : > { %v1874_v39 = vadd.f32 %v1842_v11, %v1773_v19  ;;  %v1387_v3 = vadd.f32 %v1355_v47, %v1286_v53  ;;  %v1758_v36 = vmul.f32 %v6966_v23, %v6297_v7  ;;  %v1759_v57 = vmul.f32 %v6966_v23, %v6299_v50 }
 0x19d   : > { %v1912_v52 = vadd.f32 %v5858_v6, %v1873_v15  ;;  %v1487_v45 = vadd.f32 %v1455_v49, %v1386_v10  ;;  %v1859_v37 = vmul.f32 %v5783_v42, %v6306_v51  ;;  %v1860_v9 = vmul.f32 %v5783_v42, %v6308_v24 }
 0x19e   : > { %v1913_v12 = vadd.f32 %v5858_v6, %v1874_v39  ;;  %v1488_v26 = vadd.f32 %v1456_v35, %v1387_v3  ;;  %v1035_v11 = vmul.f32 %v6142_v0, %v5756_v20  ;;  %v1036_v46 = vmul.f32 %v6148_v41, %v5756_v20  ;;  %v6344_v39 = vld [vmem:[#allocation3 + $0x1c8] sm:$0xff]  ;;  %v6346_v3 = vld [vmem:[#allocation3 + $0x300] sm:$0xff] }
 0x19f   : > { %v1944_v4 = vmax.f32 %v1912_v52, 0.0  ;;  %v1588_v38 = vadd.f32 %v1556_v28, %v1487_v45  ;;  %v1136_v47 = vmul.f32 %v6151_v48, %v6961_v22  ;;  %v1137_v17 = vmul.f32 %v6153_v54, %v6961_v22  ;;  %v3998_v54 = vld [vmem:[#allocation3 + $0x2f0] sm:$0xff]  ;;  %v6348_v52 = vld [vmem:[#allocation3 + $0x308] sm:$0xff] }
 0x1a0   : > { %v1945_v55 = vmax.f32 %v1913_v12, 0.0  ;;  %v1589_v33 = vadd.f32 %v1557_v13, %v1488_v26  ;;  %v1237_v42 = vmul.f32 %v6155_v61, %v6962_v43  ;;  %v1238_v49 = vmul.f32 %v6163_v18, %v6962_v43  ;;  %v6341_v13 = vld [vmem:[#allocation3 + $0x1c0] sm:$0xff]  ;;  %v3999_v18 = vld [vmem:[#allocation3 + $0x2f8] sm:$0xff] }
 0x1a1   : > { %v1689_v0 = vadd.f32 %v1657_v58, %v1588_v38  ;;  %v1168_v14 = vadd.f32 %v1136_v47, %v1035_v11  ;;  %v1169_v35 = vadd.f32 %v1137_v17, %v1036_v46  ;;  %v1338_v41 = vmul.f32 %v6242_v56, %v6963_v59  ;;  %v6355_v26 = vld [vmem:[#allocation3 + $0x440] sm:$0xff]  ;;  %v6359_v47 = vld [vmem:[#allocation3 + $0x448] sm:$0xff] }
 0x1a2   : > { %v2916_v19 = vpack.c.bf16 %v1945_v55, %v1944_v4  ;;  %v1690_v53 = vadd.f32 %v1658_v27, %v1589_v33  ;;  %v1339_v48 = vmul.f32 %v6246_v44, %v6963_v59  ;;  %v1439_v28 = vmul.f32 %v3998_v54, %v6971_v8 }
 0x1a3   : > { %v1790_v61 = vadd.f32 %v1758_v36, %v1689_v0  ;;  %v1269_v15 = vadd.f32 %v1237_v42, %v1168_v14  ;;  %v1270_v10 = vadd.f32 %v1238_v49, %v1169_v35  ;;  %v1440_v58 = vmul.f32 %v3999_v18, %v6971_v8  ;;  %v6371_v0 = vld [vmem:[%s6799_s1 + $0x8] ss:$0 sm:$0xff] }
 0x1a4   : > { %v3098_v27 = vsel %vm465_vm0, %v2916_v19, 0  ;;  %v1791_v45 = vadd.f32 %v1759_v57, %v1690_v53  ;;  %v1540_v12 = vmul.f32 %v6255_v2, %v6964_v16  ;;  %v1541_v36 = vmul.f32 %v6261_v25, %v6964_v16 }
 0x1a5   : > { %3771 = vmatpush3.bf16.xpose.msra.mxu0 %v3098_v27  ;;  %v1891_v11 = vadd.f32 %v1859_v37, %v1790_v61  ;;  %v1370_v46 = vadd.f32 %v1338_v41, %v1269_v15  ;;  %v1371_v4 = vadd.f32 %v1339_v48, %v1270_v10  ;;  %v1641_v38 = vmul.f32 %v6965_v60, %v6341_v13  ;;  %v6392_v27 = vld [vmem:[#allocation3 + $0x250] sm:$0xff] }
 0x1a6   : > { %v1892_v17 = vadd.f32 %v1860_v9, %v1791_v45  ;;  %v1642_v57 = vmul.f32 %v6965_v60, %v6344_v39  ;;  %v1742_v55 = vmul.f32 %v6966_v23, %v6346_v3  ;;  %v1743_v33 = vmul.f32 %v6966_v23, %v6348_v52 }
 0x1a7   : > { %v1930_v42 = vadd.f32 %v5858_v6, %v1891_v11  ;;  %v1471_v37 = vadd.f32 %v1439_v28, %v1370_v46  ;;  %v1472_v49 = vadd.f32 %v1440_v58, %v1371_v4  ;;  %v1843_v9 = vmul.f32 %v6371_v0, %v6355_v26  ;;  %v4002_v4 = vld [vmem:[#allocation3 + $0x388] sm:$0xff] }
 0x1a8   : > { %v1931_v14 = vadd.f32 %v5858_v6, %v1892_v17  ;;  %v1844_v35 = vmul.f32 %v6371_v0, %v6359_v47  ;;  %v1053_v41 = vmul.f32 %v6191_v32, %v5756_v20  ;;  %v1054_v19 = vmul.f32 %v6196_v63, %v5756_v20  ;;  %v1724_v17 = vld [vmem:[#allocation3 + $0x390] sm:$0xff] }
 0x1a9   : > { %v1962_v53 = vmax.f32 %v1930_v42, 0.0  ;;  %v1572_v48 = vadd.f32 %v1540_v12, %v1471_v37  ;;  %v1573_v54 = vadd.f32 %v1541_v36, %v1472_v49  ;;  %v1154_v28 = vmul.f32 %v6198_v40, %v6961_v22  ;;  %v6400_v42 = vld [vmem:[#allocation3 + $0x4d0] sm:$0xff] }
 0x1aa   : > { %v1963_v61 = vmax.f32 %v1931_v14, 0.0  ;;  %v1155_v15 = vmul.f32 %v6204_v62, %v6961_v22  ;;  %v1255_v6 = vmul.f32 %v6206_v34, %v6962_v43  ;;  %v1256_v10 = vmul.f32 %v6212_v21, %v6962_v43  ;;  %v4001_v62 = vld [vmem:[#allocation3 + $0x380] sm:$0xff]  ;;  %v6397_v34 = vld [vmem:[#allocation3 + $0x258] sm:$0xff] }
 0x1ab   : > { %v1673_v32 = vadd.f32 %v1641_v38, %v1572_v48  ;;  %v1674_v18 = vadd.f32 %v1642_v57, %v1573_v54  ;;  %v1186_v58 = vadd.f32 %v1154_v28, %v1053_v41  ;;  %v1356_v63 = vmul.f32 %v6291_v29, %v6963_v59  ;;  %v1725_v57 = vld [vmem:[#allocation3 + $0x398] sm:$0xff] }
 0x1ac   : > { %v2925_v45 = vpack.c.bf16 %v1963_v61, %v1962_v53  ;;  %v1187_v40 = vadd.f32 %v1155_v15, %v1054_v19  ;;  %v1357_v12 = vmul.f32 %v6293_v1, %v6963_v59  ;;  %v1457_v36 = vmul.f32 %v4001_v62, %v6971_v8 }
 0x1ad   : > { %v1774_v11 = vadd.f32 %v1742_v55, %v1673_v32  ;;  %v1775_v21 = vadd.f32 %v1743_v33, %v1674_v18  ;;  %v1287_v46 = vadd.f32 %v1255_v6, %v1186_v58  ;;  %v1458_v38 = vmul.f32 %v4002_v4, %v6971_v8  ;;  %v6409_v33 = vld [vmem:[#allocation3 + $0x4d8] sm:$0xff]  ;;  %v6420_v6 = vld [vmem:[%s6800_s2] ss:$0 sm:$0xff] }
 0x1ae   : > { %3891 = vmatprep.subr.msk.bf16.mxu0 %vm465_vm0, %v2925_v45  ;;  %v1288_v37 = vadd.f32 %v1256_v10, %v1187_v40  ;;  %v1558_v49 = vmul.f32 %v6306_v51, %v6964_v16  ;;  %v1559_v14 = vmul.f32 %v6308_v24, %v6964_v16  ;;  %v1659_v55 = vmul.f32 %v6965_v60, %v6392_v27 }
 0x1af   : > { %v1875_v41 = vadd.f32 %v1843_v9, %v1774_v11  ;;  %v1876_v19 = vadd.f32 %v1844_v35, %v1775_v21  ;;  %v1388_v53 = vadd.f32 %v1356_v63, %v1287_v46  ;;  %v1660_v48 = vmul.f32 %v6965_v60, %v6397_v34 }
 0x1b0   : > { %v1389_v54 = vadd.f32 %v1357_v12, %v1288_v37  ;;  %v1760_v28 = vmul.f32 %v6966_v23, %v1724_v17  ;;  %v1761_v61 = vmul.f32 %v6966_v23, %v1725_v57  ;;  %v1861_v15 = vmul.f32 %v6371_v0, %v6400_v42 }
 0x1b1   : > { %v1914_v9 = vadd.f32 %v6420_v6, %v1875_v41  ;;  %v1915_v35 = vadd.f32 %v6420_v6, %v1876_v19  ;;  %v1489_v10 = vadd.f32 %v1457_v36, %v1388_v53  ;;  %v1862_v32 = vmul.f32 %v6371_v0, %v6409_v33  ;;  %v4005_v19 = vld [vmem:[#allocation3 + $0x308] sm:$0xff] }
 0x1b2   : > { %v1490_v18 = vadd.f32 %v1458_v38, %v1389_v54  ;;  %v1037_v58 = vmul.f32 %v6242_v56, %v5756_v20  ;;  %v1038_v63 = vmul.f32 %v6246_v44, %v5756_v20  ;;  %v1138_v45 = vmul.f32 %v6248_v31, %v6961_v22  ;;  %v1708_v54 = vld [vmem:[#allocation3 + $0x310] sm:$0xff] }
 0x1b3   : > { %v1946_v40 = vmax.f32 %v1914_v9, 0.0  ;;  %v1947_v12 = vmax.f32 %v1915_v35, 0.0  ;;  %v1590_v62 = vadd.f32 %v1558_v49, %v1489_v10  ;;  %v1139_v11 = vmul.f32 %v6253_v30, %v6961_v22  ;;  %v4004_v30 = vld [vmem:[#allocation3 + $0x300] sm:$0xff] }
 0x1b4   : > { %v1591_v36 = vadd.f32 %v1559_v14, %v1490_v18  ;;  %v1170_v21 = vadd.f32 %v1138_v45, %v1037_v58  ;;  %v1239_v46 = vmul.f32 %v6255_v2, %v6962_v43  ;;  %v1240_v56 = vmul.f32 %v6261_v25, %v6962_v43  ;;  %v6443_v14 = vld [vmem:[#allocation3 + $0x1d0] sm:$0xff]  ;;  %v6445_v2 = vld [vmem:[#allocation3 + $0x1d8] sm:$0xff] }
 0x1b5   : > { %v2917_v4 = vpack.c.bf16 %v1947_v12, %v1946_v40  ;;  %v1691_v38 = vadd.f32 %v1659_v55, %v1590_v62  ;;  %v1171_v44 = vadd.f32 %v1139_v11, %v1038_v63  ;;  %v1340_v31 = vmul.f32 %v6341_v13, %v6963_v59  ;;  %v6453_v58 = vld [vmem:[#allocation3 + $0x450] sm:$0xff]  ;;  %v6455_v63 = vld [vmem:[#allocation3 + $0x458] sm:$0xff] }
 0x1b6   : > { %v1692_v17 = vadd.f32 %v1660_v48, %v1591_v36  ;;  %v1271_v57 = vadd.f32 %v1239_v46, %v1170_v21  ;;  %v1341_v37 = vmul.f32 %v6344_v39, %v6963_v59  ;;  %v1441_v49 = vmul.f32 %v4004_v30, %v6971_v8  ;;  %v1709_v48 = vld [vmem:[#allocation3 + $0x318] sm:$0xff] }
 0x1b7   : > { %v3101_v25 = vsel %vm465_vm0, %v2917_v4, 0  ;;  %v1792_v41 = vadd.f32 %v1760_v28, %v1691_v38  ;;  %v1272_v55 = vadd.f32 %v1240_v56, %v1171_v44  ;;  %v1442_v53 = vmul.f32 %v4005_v19, %v6971_v8 }
 0x1b8   : > { %3773 = vmatpush3.bf16.xpose.msra.mxu0 %v3101_v25  ;;  %v1793_v9 = vadd.f32 %v1761_v61, %v1692_v17  ;;  %v1372_v35 = vadd.f32 %v1340_v31, %v1271_v57  ;;  %v1542_v10 = vmul.f32 %v6355_v26, %v6964_v16  ;;  %v1543_v18 = vmul.f32 %v6359_v47, %v6964_v16 }
 0x1b9   : > { %v1893_v28 = vadd.f32 %v1861_v15, %v1792_v41  ;;  %v1373_v45 = vadd.f32 %v1341_v37, %v1272_v55  ;;  %v1643_v40 = vmul.f32 %v6965_v60, %v6443_v14  ;;  %v1644_v12 = vmul.f32 %v6965_v60, %v6445_v2 }
 0x1ba   : > { %v1894_v61 = vadd.f32 %v1862_v32, %v1793_v9  ;;  %v1473_v62 = vadd.f32 %v1441_v49, %v1372_v35  ;;  %v1744_v11 = vmul.f32 %v6966_v23, %v1708_v54  ;;  %v1745_v36 = vmul.f32 %v6966_v23, %v1709_v48  ;;  %v4006_v48 = vld [vmem:[#allocation3 + $0x390] sm:$0xff]  ;;  %v1626_v35 = vld [vmem:[#allocation3 + $0x268] sm:$0xff] }
 0x1bb   : > { %v1932_v21 = vadd.f32 %v6420_v6, %v1893_v28  ;;  %v1474_v46 = vadd.f32 %v1442_v53, %v1373_v45  ;;  %v1845_v56 = vmul.f32 %v6371_v0, %v6453_v58  ;;  %v1846_v15 = vmul.f32 %v6371_v0, %v6455_v63  ;;  %v1625_v53 = vld [vmem:[#allocation3 + $0x260] sm:$0xff] }
 0x1bc   : > { %v1933_v4 = vadd.f32 %v6420_v6, %v1894_v61  ;;  %v1574_v38 = vadd.f32 %v1542_v10, %v1473_v62  ;;  %v1055_v32 = vmul.f32 %v6291_v29, %v5756_v20  ;;  %v1056_v44 = vmul.f32 %v6293_v1, %v5756_v20  ;;  %v1726_v45 = vld [vmem:[#allocation3 + $0x3a0] sm:$0xff] }
 0x1bd   : > { %v1964_v31 = vmax.f32 %v1932_v21, 0.0  ;;  %v1575_v17 = vadd.f32 %v1543_v18, %v1474_v46  ;;  %v1156_v57 = vmul.f32 %v6297_v7, %v6961_v22  ;;  %v1157_v37 = vmul.f32 %v6299_v50, %v6961_v22 }
 0x1be   : > { %v1965_v30 = vmax.f32 %v1933_v4, 0.0  ;;  %v1675_v49 = vadd.f32 %v1643_v40, %v1574_v38  ;;  %v1257_v25 = vmul.f32 %v6306_v51, %v6962_v43  ;;  %v1258_v41 = vmul.f32 %v6308_v24, %v6962_v43  ;;  %v4007_v24 = vld [vmem:[#allocation3 + $0x398] sm:$0xff]  ;;  %v1727_v40 = vld [vmem:[#allocation3 + $0x3a8] sm:$0xff] }
 0x1bf   : > { %v1676_v29 = vadd.f32 %v1644_v12, %v1575_v17  ;;  %v1188_v55 = vadd.f32 %v1156_v57, %v1055_v32  ;;  %v1189_v19 = vadd.f32 %v1157_v37, %v1056_v44  ;;  %v1358_v1 = vmul.f32 %v6392_v27, %v6963_v59  ;;  %v1827_v12 = vld [vmem:[#allocation3 + $0x4e0] sm:$0xff] }
 0x1c0   : > { %v2926_v54 = vpack.c.bf16 %v1965_v30, %v1964_v31  ;;  %v1776_v7 = vadd.f32 %v1744_v11, %v1675_v49  ;;  %v1359_v50 = vmul.f32 %v6397_v34, %v6963_v59  ;;  %v1459_v9 = vmul.f32 %v4006_v48, %v6971_v8  ;;  %v1828_v11 = vld [vmem:[#allocation3 + $0x4e8] sm:$0xff] }
 0x1c1   : > { %v1777_v51 = vadd.f32 %v1745_v36, %v1676_v29  ;;  %v1289_v10 = vadd.f32 %v1257_v25, %v1188_v55  ;;  %v1290_v18 = vadd.f32 %v1258_v41, %v1189_v19  ;;  %v1460_v28 = vmul.f32 %v4007_v24, %v6971_v8 }
 0x1c2   : > { %3892 = vmatprep.subr.msk.bf16.mxu0 %vm465_vm0, %v2926_v54  ;;  %v1877_v27 = vadd.f32 %v1845_v56, %v1776_v7  ;;  %v1560_v61 = vmul.f32 %v6400_v42, %v6964_v16  ;;  %v1561_v34 = vmul.f32 %v6409_v33, %v6964_v16  ;;  %v1661_v62 = vmul.f32 %v6965_v60, %v1625_v53 }
 0x1c3   : > { %v1878_v36 = vadd.f32 %v1846_v15, %v1777_v51  ;;  %v1390_v21 = vadd.f32 %v1358_v1, %v1289_v10  ;;  %v1391_v46 = vadd.f32 %v1359_v50, %v1290_v18  ;;  %v1662_v4 = vmul.f32 %v6965_v60, %v1626_v35  ;;  %v4008_v50 = vld [vmem:[#allocation3 + $0x310] sm:$0xff]  ;;  %v1610_v10 = vld [vmem:[#allocation3 + $0x1e8] sm:$0xff] }
 0x1c4   : > { %v1916_v38 = vadd.f32 %v6420_v6, %v1877_v27  ;;  %v1762_v32 = vmul.f32 %v6966_v23, %v1726_v45  ;;  %v1763_v56 = vmul.f32 %v6966_v23, %v1727_v40  ;;  %v1863_v44 = vmul.f32 %v6371_v0, %v1827_v12  ;;  %v1711_v40 = vld [vmem:[#allocation3 + $0x328] sm:$0xff] }
 0x1c5   : > { %v1917_v42 = vadd.f32 %v6420_v6, %v1878_v36  ;;  %v1491_v31 = vadd.f32 %v1459_v9, %v1390_v21  ;;  %v1492_v33 = vadd.f32 %v1460_v28, %v1391_v46  ;;  %v1864_v17 = vmul.f32 %v6371_v0, %v1828_v11  ;;  %v1710_v28 = vld [vmem:[#allocation3 + $0x320] sm:$0xff]  ;;  %v1812_v36 = vld [vmem:[#allocation3 + $0x468] sm:$0xff] }
 0x1c6   : > { %v1948_v57 = vmax.f32 %v1916_v38, 0.0  ;;  %v1039_v15 = vmul.f32 %v6341_v13, %v5756_v20  ;;  %v1040_v37 = vmul.f32 %v6344_v39, %v5756_v20  ;;  %v1140_v30 = vmul.f32 %v6346_v3, %v6961_v22 }
 0x1c7   : > { %v1949_v49 = vmax.f32 %v1917_v42, 0.0  ;;  %v1592_v25 = vadd.f32 %v1560_v61, %v1491_v31  ;;  %v1593_v41 = vadd.f32 %v1561_v34, %v1492_v33  ;;  %v1141_v29 = vmul.f32 %v6348_v52, %v6961_v22  ;;  %v4009_v52 = vld [vmem:[#allocation3 + $0x318] sm:$0xff]  ;;  %v3187_v33 = vld [vmem:[%s6805_s7 + $0x8] sm:$0xff] }
 0x1c8   : > { %v1172_v55 = vadd.f32 %v1140_v30, %v1039_v15  ;;  %v1241_v19 = vmul.f32 %v6355_v26, %v6962_v43  ;;  %v1242_v1 = vmul.f32 %v6359_v47, %v6962_v43  ;;  %v1342_v13 = vmul.f32 %v6443_v14, %v6963_v59  ;;  %v1609_v14 = vld [vmem:[#allocation3 + $0x1e0] sm:$0xff] }
 0x1c9   : > { %v2918_v20 = vpack.c.bf16 %v1949_v49, %v1948_v57  ;;  %v1693_v39 = vadd.f32 %v1661_v62, %v1592_v25  ;;  %v1694_v53 = vadd.f32 %v1662_v4, %v1593_v41  ;;  %v1173_v3 = vadd.f32 %v1141_v29, %v1040_v37  ;;  %v3186_v62 = vld [vmem:[%s6805_s7] sm:$0xff] }
 0x1ca   : > { %v1273_v54 = vadd.f32 %v1241_v19, %v1172_v55  ;;  %v1343_v7 = vmul.f32 %v6445_v2, %v6963_v59  ;;  %v1443_v22 = vmul.f32 %v4008_v50, %v6971_v8  ;;  %v1444_v26 = vmul.f32 %v4009_v52, %v6971_v8  ;;  %v3951_v55 = vld [vmem:[%s6803_s5 + $0x8] sm:$0xff]   ;;  %v4010_v19 = vld [vmem:[%s6803_s5] sm:$0xff]  }
 0x1cb   : > { %v3104_v48 = vsel %vm465_vm0, %v2918_v20, 0  ;;  %v1794_v43 = vadd.f32 %v1762_v32, %v1693_v39  ;;  %v1795_v47 = vadd.f32 %v1763_v56, %v1694_v53  ;;  %v1274_v9 = vadd.f32 %v1242_v1, %v1173_v3 }
 0x1cc   : > { %3775 = vmatpush3.bf16.xpose.msra.mxu0 %v3104_v48  ;;  %v1374_v35 = vadd.f32 %v1342_v13, %v1273_v54  ;;  %v1544_v51 = vmul.f32 %v6453_v58, %v6964_v16  ;;  %v1545_v24 = vmul.f32 %v6455_v63, %v6964_v16  ;;  %v1645_v45 = vmul.f32 %v6965_v60, %v1609_v14  ;;  %v1811_v58 = vld [vmem:[#allocation3 + $0x460] sm:$0xff]  ;;  %v3188_v16 = vld [vmem:[%s6805_s7 + $0x10] sm:$0xff] }
 0x1cd   : > { %v1895_v18 = vadd.f32 %v1863_v44, %v1794_v43  ;;  %v1896_v59 = vadd.f32 %v1864_v17, %v1795_v47  ;;  %v1375_v2 = vadd.f32 %v1343_v7, %v1274_v9  ;;  %v1646_v34 = vmul.f32 %v6965_v60, %v1610_v10 }
 0x1ce   : > { %v1475_v8 = vadd.f32 %v1443_v22, %v1374_v35  ;;  %v1746_v11 = vmul.f32 %v6966_v23, %v1710_v28  ;;  %v1747_v38 = vmul.f32 %v6966_v23, %v1711_v40  ;;  %v4113_v32 = vmov 0   ;;  %v3189_v23 = vld [vmem:[%s6805_s7 + $0x18] sm:$0xff] }
 0x1cf   : > { %v1934_v12 = vadd.f32 %v6420_v6, %v1895_v18  ;;  %v1935_v27 = vadd.f32 %v6420_v6, %v1896_v59  ;;  %v1476_v61 = vadd.f32 %v1444_v26, %v1375_v2  ;;  %3946 = vset.pattern.permute.xlu0 %v4113_v32  ;;  %3947 = vset.pattern.permute.xlu1 %v4113_v32 }
 0x1d0   : > { %v1576_v63 = vadd.f32 %v1544_v51, %v1475_v8  ;;  %v1847_v56 = vmul.f32 %v6371_v0, %v1811_v58  ;;  %3192 = vperm.xlu0 %3946, %v3186_v62   ;;  %3202 = vperm.xlu1 %3947, %v3188_v16   ;;  %v1848_v31 = vmul.f32 %v6371_v0, %v1812_v36  ;;  %v6973_v58 = vld [vmem:[#allocation16_spill] sm:$0xff] }
 0x1d1   : > { %v1966_v21 = vmax.f32 %v1934_v12, 0.0  ;;  %v1967_v46 = vmax.f32 %v1935_v27, 0.0  ;;  %v1577_v4 = vadd.f32 %v1545_v24, %v1476_v61 }
 0x1d2   : > { %v1677_v60 = vadd.f32 %v1645_v45, %v1576_v63  ;;  %v6976_v63 = vld [vmem:[#allocation19_spill] sm:$0xff] }
 0x1d3   : > { %v2927_v44 = vpack.c.bf16 %v1967_v46, %v1966_v21  ;;  %v1678_v42 = vadd.f32 %v1646_v34, %v1577_v4  ;;  %v6972_v34 = vld [vmem:[#allocation15_spill] sm:$0xff]  ;;  %v6978_v21 = vld [vmem:[#allocation38_spill] sm:$0xff] }
 0x1d4   : > { %v1778_v17 = vadd.f32 %v1746_v11, %v1677_v60  ;;  %3197 = vperm.xlu0 %3946, %v3187_v33   ;;  %3207 = vperm.xlu1 %3947, %v3189_v23   ;;  %v3822_v62 = vpack.c.bf16 %v6973_v58, %v6972_v34  ;;  %v6977_v11 = vld [vmem:[#allocation20_spill] sm:$0xff]  ;;  %v6979_v46 = vld [vmem:[#allocation39_spill] sm:$0xff]  ;;  %v6985_v23 = vld [vmem:[#allocation17_spill] sm:$0xff] }
 0x1d5   : > { %3893 = vmatprep.subr.msk.bf16.mxu0 %vm465_vm0, %v2927_v44  ;;  %v1779_v57 = vadd.f32 %v1747_v38, %v1678_v42  ;;  %v3825_v36 = vpack.c.bf16 %v6977_v11, %v6976_v63  ;;  %v3828_v4 = vpack.c.bf16 %v6979_v46, %v6978_v21  ;;  %v6980_v38 = vlaneseq  ;;  %v6981_v60 = vld [vmem:[#allocation23_spill] sm:$0xff]  ;;  %v7005_v58 = vld [vmem:[#allocation48_spill] sm:$0xff] }
 0x1d6   : > { %v1879_v15 = vadd.f32 %v1847_v56, %v1778_v17  ;;  %3824 = vmatprep.subr.msk.bf16.mxu1 %vm6600_vm2, %v3822_v62  ;;  %v6982_v56 = vld [vmem:[#allocation42_spill] sm:$0xff]  ;;  %v6983_v44 = vld [vmem:[#allocation43_spill] sm:$0xff]  ;;  %v7006_v62 = vld [vmem:[#allocation49_spill] sm:$0xff]  ;;  %v3353_v46 = vadd.s32 8, %v6981_v60 }
 0x1d7   : > { %v1880_v37 = vadd.f32 %v1848_v31, %v1779_v57  ;;  %3827 = vmatpush3.bf16.xpose.msk.msra.mxu1 %vm6600_vm2, %v3825_v36  ;;  %v3357_v32 = vand.u32 127, %v6980_v38  ;;  %v3831_v42 = vpack.c.bf16 %v6983_v44, %v6982_v56  ;;  %v6984_v31 = vmov 0.0   ;;  %v6986_v17 = vld [vmem:[#allocation18_spill] sm:$0xff]  ;;  %v7007_v11 = vld [vmem:[#allocation36_spill] sm:$0xff]  ;;  %v7008_v36 = vld [vmem:[#allocation37_spill] sm:$0xff] }
 0x1d8   : > { %v1918_v30 = vadd.f32 %v6420_v6, %v1879_v15  ;;  %3830 = vmatprep.subr.msk.bf16.mxu1 %vm6600_vm2, %v3828_v4  ;;  %v3834_v57 = vpack.c.bf16 %v6986_v17, %v6985_v23  ;;  %v6987_v15 = vld [vmem:[#allocation21_spill] sm:$0xff]  ;;  %v3864_v63 = vpack.c.bf16 %v7006_v62, %v7005_v58  ;;  %v3867_v21 = vpack.c.bf16 %v7008_v36, %v7007_v11  ;;  %v3243_v23 = vld [vmem:[%s6806_s8 + $0x8] sm:$0xff]  ;;  %v3270_v58 = vld [vmem:[%s6808_s10 + $0x18] sm:$0xff] }
 0x1d9   : > { %v1919_v0 = vadd.f32 %v6420_v6, %v1880_v37  ;;  %vm3358_vm3 = vcmp.eq.s32.totalorder %v6981_v60, %v3357_v32  ;;  %v6988_v37 = vld [vmem:[#allocation22_spill] sm:$0xff]  ;;  %vm3359_vm4 = vcmp.eq.s32.totalorder %v3353_v46, %v3357_v32  ;;  %v3354_v4 = vadd.s32 16, %v6981_v60  ;;  %v3242_v17 = vld [vmem:[%s6806_s8] sm:$0xff]  ;;  %v3269_v62 = vld [vmem:[%s6808_s10 + $0x10] sm:$0xff] }
 0x1da   : > { %v1950_v49 = vmax.f32 %v1918_v30, 0.0  ;;  %v3695_v33 = vsel %vm3358_vm3, 1.0, %v6984_v31  ;;  %v3837_v30 = vpack.c.bf16 %v6988_v37, %v6987_v15  ;;  %v3696_v38 = vsel %vm3359_vm4, 1.0, %v6984_v31 }
 0x1db   : > { %v1951_v25 = vmax.f32 %v1919_v0, 0.0  ;;  %3814 = vmatprep.mubr.msk.f32.mxu1 %vm465_vm0, %v3695_v33  ;;  %v6989_v0 = vld [vmem:[#allocation40_spill] sm:$0xff]  ;;  %vm3360_vm5 = vcmp.eq.s32.totalorder %v3354_v4, %v3357_v32  ;;  %v3355_v56 = vadd.s32 24, %v6981_v60 }
 0x1dc   : > { %v3697_v44 = vsel %vm3360_vm5, 1.0, %v6984_v31 }
 0x1dd   : > { %v2919_v41 = vpack.c.bf16 %v1951_v25, %v1950_v49  ;;  %v6990_v49 = vld [vmem:[#allocation41_spill] sm:$0xff]  ;;  %vm3361_vm6 = vcmp.eq.s32.totalorder %v3355_v56, %v3357_v32  ;;  %v3292_v56 = vld [vmem:[%s6809_s11 + $0x8] sm:$0xff] }
 0x1de   : > { %v3840_v25 = vpack.c.bf16 %v6990_v49, %v6989_v0  ;;  %v3698_v16 = vsel %vm3361_vm6, 1.0, %v6984_v31  ;;  %v3244_v31 = vld [vmem:[%s6806_s8 + $0x10] sm:$0xff] }
 0x1df   : > { %v3107_v29 = vsel %vm465_vm0, %v2919_v41, 0  ;;  %3833 = vmatpush3.bf16.xpose.msk.msra.mxu1 %vm6600_vm2, %v3831_v42  ;;  %v6991_v41 = vld [vmem:[#allocation44_spill] sm:$0xff] }
 0x1e0   : > { %3777 = vmatpush3.bf16.xpose.msra.mxu0 %v3107_v29  ;;  %3836 = vmatprep.subr.msk.bf16.mxu1 %vm6600_vm2, %v3834_v57  ;;  %v6992_v29 = vld [vmem:[#allocation45_spill] sm:$0xff] }
 0x1e7   : > { %3779 = vmatmul.mubr.msk.bf16.vlgmr.msra.gmra.mrb[0].mxu0 %vm465_vm0, %v4010_v19  ;;  %3839 = vmatpush3.bf16.xpose.msk.msra.mxu1 %vm6600_vm2, %v3837_v30  ;;  %v6993_v19 = vld [vmem:[#allocation46_spill] sm:$0xff] }
 0x1e8   : > { %3780 = vmatprep.mubr.msk.bf16.mxu0 %vm465_vm0, %v3951_v55  ;;  %3842 = vmatprep.subr.msk.bf16.mxu1 %vm6600_vm2, %v3840_v25  ;;  %v3245_v25 = vld [vmem:[%s6806_s8 + $0x18] sm:$0xff] }
 0x1ef   : > { %3781 = vmatmul.mubr.msk.bf16.gmra.mrb[4].mxu0 %vm465_vm0, %v3951_v55  ;;  %v3843_v55 = vpack.c.bf16 %v6992_v29, %v6991_v41 }
 0x1f1   : > { %3845 = vmatpush3.bf16.xpose.msk.msra.mxu1 %vm6600_vm2, %v3843_v55 }
 0x24f   : > { %v3193_v6 = vpop.permute.xlu0 %3192  ;;  %v3203_v54 = vpop.permute.xlu1 %3202 }
 0x253   : > { %v3198_v13 = vpop.permute.xlu0 %3197  ;;  %v3208_v14 = vpop.permute.xlu1 %3207 }
 0x2ba   : > { %v3167_v1 = vpop.f32.mrb[0].mxu0 }
 0x2bb   : > { %v6556_v20 = vadd.f32 %v3193_v6, %v3167_v1  ;;  %v3169_v39 = vpop.f32.mrb[1].mxu0 }
 0x2bc   : > { %v6558_v53 = vadd.f32 %v3193_v6, %v3169_v39  ;;  %v3171_v3 = vpop.f32.mrb[2].mxu0  ;;  %v6994_v6 = vld [vmem:[#allocation47_spill] sm:$0xff]  ;;  %v6996_v39 = vld [vmem:[#allocation52_spill] sm:$0xff] }
 0x2bd   : > { %v3218_v7 = vmax.f32 %v6556_v20, 0.0  ;;  %v6561_v50 = vadd.f32 %v3198_v13, %v3171_v3  ;;  %v3173_v22 = vpop.f32.mrb[3].mxu0  ;;  %v3846_v1 = vpack.c.bf16 %v6994_v6, %v6993_v19 }
 0x2be   : > { %v3219_v52 = vmax.f32 %v6558_v53, 0.0  ;;  %v6564_v26 = vadd.f32 %v3198_v13, %v3173_v22  ;;  %v6995_v13 = vld [vmem:[#allocation51_spill] sm:$0xff]  ;;  %v6998_v22 = vld [vmem:[#allocation54_spill] sm:$0xff] }
 0x2bf   : > { %v3220_v48 = vmax.f32 %v6561_v50, 0.0  ;;  %3848 = vmatprep.subr.msk.bf16.mxu1 %vm6600_vm2, %v3846_v1  ;;  %v3849_v3 = vpack.c.bf16 %v6996_v39, %v6995_v13 }
 0x2c0   : > { %v3221_v43 = vmax.f32 %v6564_v26, 0.0  ;;  %v3226_v47 = vadd.f32 %v3219_v52, %v3218_v7 }
 0x2c1   : > { %3851 = vmatpush3.bf16.xpose.msk.msra.mxu1 %vm6600_vm2, %v3849_v3 }
 0x2c2   : > { %3227 = vadd.xlane.f32.xlu0 %v3226_v47  ;;  %v3177_v9 = vpop.f32.mrb[4].mxu0  ;;  %v3229_v35 = vadd.f32 %v3221_v43, %v3220_v48 }
 0x2c3   : > { %v6576_v51 = vadd.f32 %v3203_v54, %v3177_v9  ;;  %v3179_v10 = vpop.f32.mrb[5].mxu0  ;;  %v6999_v9 = vld [vmem:[#allocation55_spill] sm:$0xff] }
 0x2c4   : > { %v6578_v18 = vadd.f32 %v3203_v54, %v3179_v10  ;;  %3230 = vadd.xlane.f32.xlu1 %v3229_v35  ;;  %v3181_v59 = vpop.f32.mrb[6].mxu0  ;;  %v6997_v54 = vld [vmem:[#allocation53_spill] sm:$0xff] }
 0x2c5   : > { %v3222_v2 = vmax.f32 %v6576_v51, 0.0  ;;  %v6581_v24 = vadd.f32 %v3208_v14, %v3181_v59  ;;  %v3183_v28 = vpop.f32.mrb[7].mxu0  ;;  %v3852_v47 = vpack.c.bf16 %v6998_v22, %v6997_v54  ;;  %v7001_v10 = vld [vmem:[#allocation57_spill] sm:$0xff]  ;;  %v7002_v59 = vld [vmem:[#allocation58_spill] sm:$0xff] }
 0x2c6   : > { %v3223_v8 = vmax.f32 %v6578_v18, 0.0  ;;  %v6584_v45 = vadd.f32 %v3208_v14, %v3183_v28  ;;  %v7000_v14 = vld [vmem:[#allocation56_spill] sm:$0xff]  ;;  %v3858_v28 = vpack.c.bf16 %v7002_v59, %v7001_v10 }
 0x2c7   : > { %v3224_v40 = vmax.f32 %v6581_v24, 0.0  ;;  %3854 = vmatprep.subr.msk.bf16.mxu1 %vm6600_vm2, %v3852_v47  ;;  %v3855_v35 = vpack.c.bf16 %v7000_v14, %v6999_v9 }
 0x2c8   : > { %v3225_v12 = vmax.f32 %v6584_v45, 0.0  ;;  %v3232_v27 = vadd.f32 %v3223_v8, %v3222_v2 }
 0x2c9   : > { %3857 = vmatpush3.bf16.xpose.msk.msra.mxu1 %vm6600_vm2, %v3855_v35  ;;  %v3264_v35 = vld [vmem:[%s6807_s9] sm:$0x1] }
 0x2ca   : > { %3233 = vadd.xlane.f32.xlu0 %v3232_v27  ;;  %v3235_v61 = vadd.f32 %v3225_v12, %v3224_v40  ;;  %3860 = vmatprep.subr.msk.bf16.mxu1 %vm6600_vm2, %v3858_v28  ;;  %v7003_v27 = vld [vmem:[#allocation13_spill] sm:$0xff] }
 0x2ce   : > { %3236 = vadd.xlane.f32.xlu0 %v3235_v61  ;;  %v7004_v61 = vld [vmem:[#allocation14_spill] sm:$0xff] }
 0x2cf   : > { %v3861_v34 = vpack.c.bf16 %v7004_v61, %v7003_v27  ;;  %v3268_v27 = vld [vmem:[%s6808_s10 + $0x8] sm:$0xff]  ;;  %v3267_v61 = vld [vmem:[%s6808_s10] sm:$0xff] }
 0x2d1   : > { %3863 = vmatpush3.bf16.xpose.msk.msra.mxu1 %vm6600_vm2, %v3861_v34 }
 0x2d2   : > { %3866 = vmatprep.subr.msk.bf16.mxu1 %vm6600_vm2, %v3864_v63 }
 0x2d9   : > { %3869 = vmatpush3.bf16.xpose.msk.msra.mxu1 %vm6600_vm2, %v3867_v21 }
 0x2e0   : > { %3815 = vmatmul.mubr.msk.f32.vlgmr.msra.gmra.mrb[0].mxu1 %vm465_vm0, %v3695_v33 }
 0x2e1   : > { %3816 = vmatprep.mubr.msk.f32.mxu1 %vm465_vm0, %v3696_v38 }
 0x2e4   : > { %3817 = vmatmul.mubr.msk.f32.gmra.mrb[2].mxu1 %vm465_vm0, %v3696_v38 }
 0x2e5   : > { %3818 = vmatprep.mubr.msk.f32.mxu1 %vm465_vm0, %v3697_v44 }
 0x2e8   : > { %3819 = vmatmul.mubr.msk.f32.gmra.mrb[4].mxu1 %vm465_vm0, %v3697_v44  ;;  %v3291_v44 = vld [vmem:[%s6809_s11] sm:$0xff] }
 0x2e9   : > { %3820 = vmatprep.mubr.msk.f32.mxu1 %vm465_vm0, %v3698_v16 }
 0x2ec   : > { %3821 = vmatmul.mubr.msk.f32.gmra.mrb[6].mxu1 %vm465_vm0, %v3698_v16 }
 0x34f   : > { %v3228_v60 = vpop.xlane.xlu0 %3227 }
 0x350   : > { %v3238_v32 = vmul.f32 0.00390625, %v3228_v60 }
 0x351   : > { %v3231_v42 = vpop.xlane.xlu1 %3230 }
 0x352   : > { %v3239_v33 = vmul.f32 0.00390625, %v3231_v42  ;;  %v3246_v37 = vmul.f32 %v3242_v17, %v3238_v32  ;;  %v3293_v32 = vld [vmem:[%s6809_s11 + $0x10] sm:$0xff] }
 0x354   : > { %v3247_v57 = vmul.f32 %v3243_v23, %v3239_v33  ;;  %v3251_v29 = vsel %vm3250_vm7, %v3246_v37, 0.0  ;;  %v3294_v23 = vld [vmem:[%s6809_s11 + $0x18] sm:$0xff] }
 0x356   : > { %v3252_v0 = vsel %vm3250_vm7, %v3247_v57, 0.0 }
 0x357   : > { %v3234_v15 = vpop.xlane.xlu0 %3233  ;;  %v3253_v6 = vadd.f32 %v3252_v0, %v3251_v29 }
 0x358   : > { %v3240_v30 = vmul.f32 0.00390625, %v3234_v15 }
 0x35a   : > { %v3248_v49 = vmul.f32 %v3244_v31, %v3240_v30 }
 0x35b   : > { %v3237_v41 = vpop.xlane.xlu0 %3236 }
 0x35c   : > { %v3254_v55 = vsel %vm3250_vm7, %v3248_v49, 0.0  ;;  %v3241_v19 = vmul.f32 0.00390625, %v3237_v41 }
 0x35d   : > { %v3255_v13 = vadd.f32 %v3254_v55, %v3253_v6 }
 0x35e   : > { %v3249_v1 = vmul.f32 %v3245_v25, %v3241_v19 }
 0x360   : > { %v3256_v39 = vsel %vm3250_vm7, %v3249_v1, 0.0 }
 0x361   : > { %v3257_v3 = vadd.f32 %v3256_v39, %v3255_v13 }
 0x363   : > { %v3258_v54 = vrot.slane %v3257_v3, 4 }
 0x365   : > { %v3259_v22 = vadd.f32 %v3258_v54, %v3257_v3 }
 0x367   : > { %v3260_v47 = vrot.slane %v3259_v22, 2 }
 0x369   : > { %v3261_v9 = vadd.f32 %v3260_v47, %v3259_v22 }
 0x36b   : > { %v3262_v14 = vrot.slane %v3261_v9, 1 }
 0x36d   : > { %v3263_v10 = vadd.f32 %v3262_v14, %v3261_v9 }
 0x36f   : > { %v3265_v59 = vadd.f32 %v3264_v35, %v3263_v10 }
 0x371   : > { %v3266_v28 = vmax.f32 %v3265_v59, 0.0 }
 0x373   : > { %v3274_v34 = vrot.slane %v3266_v28, %v6960_v5 }
 0x375   : > { %v3276_v63 = vmul.f32 %v3274_v34, %v3268_v27  ;;  %v3275_v11 = vmul.f32 %v3274_v34, %v3267_v61  ;;  %v3278_v46 = vmul.f32 %v3274_v34, %v3270_v58  ;;  %v3277_v4 = vmul.f32 %v3274_v34, %v3269_v62 }
 0x377   : > { %v3282_v36 = vsel %vm3250_vm7, %v3276_v63, 0.0  ;;  %v3279_v21 = vsel %vm3250_vm7, %v3275_v11, 0.0  ;;  %v3288_v5 = vsel %vm3250_vm7, %v3278_v46, 0.0  ;;  %v3285_v38 = vsel %vm3250_vm7, %v3277_v4, 0.0 }
 0x378   : > { %3283 = vadd.xlane.f32.xlu0 %v3282_v36  ;;  %3280 = vadd.xlane.f32.xlu1 %v3279_v21 }
 0x37c   : > { %3289 = vadd.xlane.f32.xlu0 %v3288_v5  ;;  %3286 = vadd.xlane.f32.xlu1 %v3285_v38 }
 0x3b3   : > { %v3544_v25 = vpop.f32.mrb[0].mxu1 }
 0x3b4   : > { %v3546_v41 = vpop.f32.mrb[1].mxu1 }
 0x3b7   : > { %v3550_v6 = vpop.f32.mrb[2].mxu1 }
 0x3b8   : > { %v3552_v9 = vpop.f32.mrb[3].mxu1 }
 0x3bb   : > { %v3556_v35 = vpop.f32.mrb[4].mxu1 }
 0x3bc   : > { %v3558_v10 = vpop.f32.mrb[5].mxu1 }
 0x3bf   : > { %v3562_v28 = vpop.f32.mrb[6].mxu1 }
 0x3c0   : > { %v3564_v27 = vpop.f32.mrb[7].mxu1 }
 0x405   : > { %v3284_v16 = vpop.xlane.xlu0 %3283  ;;  %v3281_v60 = vpop.xlane.xlu1 %3280 }
 0x406   : > { %v3296_v42 = vadd.f32 %v3292_v56, %v3284_v16  ;;  %v3295_v33 = vadd.f32 %v3291_v44, %v3281_v60 }
 0x408   : > { %v3692_v17 = vmul.f32 -1.442695, %v3296_v42  ;;  %v3691_v57 = vmul.f32 -1.442695, %v3295_v33 }
 0x409   : > { %v3290_v31 = vpop.xlane.xlu0 %3289  ;;  %v3287_v15 = vpop.xlane.xlu1 %3286 }
 0x40a   : > { %3952 = vpow2.f32 %v3692_v17  ;;  %v3298_v37 = vadd.f32 %v3294_v23, %v3290_v31  ;;  %v3297_v30 = vadd.f32 %v3293_v32, %v3287_v15 }
 0x40b   : > { %3954 = vpow2.f32 %v3691_v57 }
 0x40c   : > { %v3694_v0 = vmul.f32 -1.442695, %v3298_v37  ;;  %v3693_v49 = vmul.f32 -1.442695, %v3297_v30 }
 0x40e   : > { %3956 = vpow2.f32 %v3694_v0 }
 0x40f   : > { %3958 = vpow2.f32 %v3693_v49 }
 0x414   : > { %v3953_v29 = vpop.eup %3952 }
 0x415   : > { %v3955_v55 = vpop.eup %3954  ;;  %v3312_v19 = vadd.f32 1.0, %v3953_v29 }
 0x416   : > { %v3311_v1 = vadd.f32 1.0, %v3955_v55 }
 0x417   : > { %3960 = vrcp.f32 %v3312_v19 }
 0x418   : > { %v3957_v13 = vpop.eup %3956  ;;  %3962 = vrcp.f32 %v3311_v1 }
 0x419   : > { %v3959_v39 = vpop.eup %3958  ;;  %v3314_v54 = vadd.f32 1.0, %v3957_v13 }
 0x41a   : > { %v3313_v3 = vadd.f32 1.0, %v3959_v39 }
 0x41c   : > { %3964 = vrcp.f32 %v3313_v3 }
 0x41d   : > { %3966 = vrcp.f32 %v3314_v54 }
 0x421   : > { %v3961_v22 = vpop.eup %3960 }
 0x422   : > { %v3963_v47 = vpop.eup %3962  ;;  %3330 = vperm.xlu0 %3946, %v3961_v22  }
 0x423   : > { %3325 = vperm.xlu1 %3947, %v3963_v47  }
 0x426   : > { %v3965_v14 = vpop.eup %3964 }
 0x427   : > { %3335 = vperm.xlu1 %3947, %v3965_v14   ;;  %v3967_v59 = vpop.eup %3966 }
 0x42b   : > { %3340 = vperm.xlu1 %3947, %v3967_v59  }
 0x4a1   : > { %v3331_v61 = vpop.permute.xlu0 %3330 }
 0x4a2   : > { %v3345_v34 = vmul.f32 %v3331_v61, %v3220_v48  ;;  %v3346_v58 = vmul.f32 %v3331_v61, %v3221_v43  ;;  %v3326_v62 = vpop.permute.xlu1 %3325 }
 0x4a3   : > { %v3343_v63 = vmul.f32 %v3326_v62, %v3218_v7  ;;  %v3344_v11 = vmul.f32 %v3326_v62, %v3219_v52 }
 0x4a4   : > { %v3569_v36 = vadd.f32 %v3550_v6, %v3345_v34  ;;  %v3570_v21 = vadd.f32 %v3552_v9, %v3346_v58 }
 0x4a5   : > { %v3567_v46 = vadd.f32 %v3544_v25, %v3343_v63  ;;  %v3568_v4 = vadd.f32 %v3546_v41, %v3344_v11 }
 0x4a6   : > { %3577 = vst [vmem:[%s431_s19 + $0x10] sm:$0xff] %v3569_v36  ;;  %3578 = vst [vmem:[%s431_s19 + $0x18] sm:$0xff] %v3570_v21  ;;  %v3336_v50 = vpop.permute.xlu1 %3335 }
 0x4a7   : > { %3575 = vst [vmem:[%s431_s19] sm:$0xff] %v3567_v46  ;;  %3576 = vst [vmem:[%s431_s19 + $0x8] sm:$0xff] %v3568_v4  ;;  %v3347_v26 = vmul.f32 %v3336_v50, %v3222_v2  ;;  %v3348_v20 = vmul.f32 %v3336_v50, %v3223_v8 }
 0x4a9   : > { %v3571_v53 = vadd.f32 %v3556_v35, %v3347_v26  ;;  %v3572_v7 = vadd.f32 %v3558_v10, %v3348_v20 }
 0x4aa   : > { %v3341_v52 = vpop.permute.xlu1 %3340 }
 0x4ab   : > { %3579 = vst [vmem:[%s431_s19 + $0x20] sm:$0xff] %v3571_v53  ;;  %3580 = vst [vmem:[%s431_s19 + $0x28] sm:$0xff] %v3572_v7  ;;  %v3349_v48 = vmul.f32 %v3341_v52, %v3224_v40  ;;  %v3350_v43 = vmul.f32 %v3341_v52, %v3225_v12 }
 0x4ad   : > { %v3573_v51 = vadd.f32 %v3562_v28, %v3349_v48  ;;  %v3574_v18 = vadd.f32 %v3564_v27, %v3350_v43 }
 0x4af   : > { %3581 = vst [vmem:[%s431_s19 + $0x30] sm:$0xff] %v3573_v51  ;;  %3582 = vst [vmem:[%s431_s19 + $0x38] sm:$0xff] %v3574_v18 }
 0x4b0   : > { %4054 = shalt.err (!%p4051_p2)
}
 0x4b1   : > { %s4055_s20 = scalar_lea.hbm %s6754_s27, 1024  ;;  %s4059_s13 = scalar_lea.hbm %s6810_s12, 2048 }
 0x4b2   : > { %p4056_p4 = scmp.ne.s32.totalorder %s6754_s27, %s4055_s20  ;;  %p4060_p9 = scmp.lt.u32.totalorder %s6754_s27, %s6810_s12 }
 0x4b3   : > { %p4061_p1 = scmp.lt.u32.totalorder %s4059_s13, %s4055_s20  ;;  %p4063_p6 = scmp.lt.u32.totalorder %s4055_s20, %s6754_s27 }
 0x4b4   : > { %p4057_p5 = pnand %p4056_p4, %p7009_p11 }
 0x4b5   : > { %p4062_p3 = por %p4061_p1, %p4060_p9 }
 0x4b6   : > { %p4058_p7 = pneg %p4057_p5 }
 0x4b7   : > { %p4064_p12 = por %p4063_p6, %p4062_p3 }
 0x4b9   : > { %p4065_p13 = pnand %p4064_p12, %p4058_p7 }
 0x4bb   : > { %4068 = shalt.err (!%p4065_p13)
}
 0x4bc   : > { %s4115_s30 = smov 256   ;;  %s4116_s29 = smov 16  }
 0x4bd   : > { %3896 = dma.vmem_to_hbm [thread:$0]  (%p7009_p11), %s6745_s17, 1024, %s6754_s27, %s3584_s25, %s4115_s30, %s4115_s30, %s4116_s29  }
 0x4be PF: > { %s3612_s28 = sand.u32 1, %s4095_s21   ;;  %p7010_p8 = scmp.ne.s32.totalorder %s6883_s16, 0 }
 0x4bf   : > { %p7011_p10 = scmp.ge.s32.totalorder %s4107_s24, 2  ;;  %s3613_s20 = scalar_lea.sflag [#allocation6], %s3612_s28 }
 0x4c1   : > { %p3903_p0 = pnand %p7011_p10, %p7010_p8 }
 0x4c3   : > { %4090 = dma.done.wait (!%p3903_p0), %s3613_s20, 1024  }
 0x4c4   : > { %4092 = vsyncadd (!%p3903_p0), %s3613_s20, 4294966272  ;;  %s7012_s24 = sld [smem:[#allocation11_spill]]  ;;  %s7013_s19 = sld [smem:[#allocation10_spill]] }
 0x4c5   : > { %s7014_s23 = sld [smem:[#allocation12_spill]]  ;;  %s7015_s21 = smov %s4099_s22 }
 0x4ca   : > { %p25_p2 = scmp.ge.s32.totalorder %s7012_s24, 4   ;;  %s7016_s22 = smov %s7013_s19 }
 0x4cc   :  { %27 = sbr.rel (!%p25_p2) target bundleno = 5 (0x5), region = 132 }
 0x4d3   :  { %3618 = vsyncpa [#allocation5], 1 }
 0x4d4   :  { %3620 = vsyncpa [#allocation5 + $0x1], 1 }
 0x4d5   :  { %3621 = vsyncpa [#allocation6], 1 }
 0x4d6   :  { %3623 = vsyncpa [#allocation6 + $0x1], 1 }

</bundles_post_ra>
